<compile_context>
chip_gen: v5e
topology: v5e:2x2
jax: 0.10.0
libtpu: 0.0.40
codegen_flags: <defaults>
</compile_context>

<pallas_src>
import functools

import jax
import jax.numpy as jnp
from jax.experimental import pallas as pl
from jax.experimental.pallas import tpu as pltpu

IMAGE_SIZE = 784
H_DIM = 400
Z_DIM = 20

LANE = 128                       # TPU lane width
OUT_PAD = 896                    # 7 * 128, padded fc5 / x_reconst width
HEAD_PAD = 2 * LANE              # mu in lanes [0,20), log_var in [128,148)
ROW_ALIGN = 16                   # sublane alignment (bf16-friendly)
MAX_TB = 512                     # max rows per grid step


def _cdiv(a, b):
    return (a + b - 1) // b


def _round_up(x, m):
    return _cdiv(x, m) * m


def _choose_tb(B, block_b):
    """Batch tile: minimal padding, >=2 grid steps at larger B (v7x megacore)."""
    steps = _cdiv(B, block_b)
    if B > 256:
        steps = max(steps, 2)
    return _round_up(_cdiv(B, steps), ROW_ALIGN)


def _vae_kernel(
    x_ref, eps_ref,
    w1_ref, b1_ref,
    w23_ref, b23_ref,
    w4_ref, b4_ref,
    w5_ref, b5_ref,
    xrec_ref, mulv_ref,
):
    # --- encode: h = relu(x @ W1 + b1) ---  (x already bf16)
    h = jnp.dot(x_ref[...], w1_ref[...], preferred_element_type=jnp.float32)
    h = jnp.maximum(h + b1_ref[...], 0.0)                       # [tb, 400] f32

    # --- fused, lane-padded encoder heads: mu -> lanes [0,20), lv -> [128,148)
    mulv = jnp.dot(h.astype(jnp.bfloat16), w23_ref[...],
                   preferred_element_type=jnp.float32) + b23_ref[...]  # [tb,256]
    mu_pad = mulv[:, :LANE]          # vreg-boundary slice (free), lanes 20+ = 0
    lv_pad = mulv[:, LANE:]          # vreg-boundary slice (free), lanes 20+ = 0

    # --- reparameterize: z = mu + eps * exp(log_var / 2) (lanes 20+ stay 0) ---
    z_pad = mu_pad + eps_ref[...] * jnp.exp(lv_pad * 0.5)       # [tb, 128] f32

    # --- decode: h2 = relu(z @ W4 + b4); x_rec = sigmoid(h2 @ W5 + b5) ---
    h2 = jnp.dot(z_pad.astype(jnp.bfloat16), w4_ref[...],
                 preferred_element_type=jnp.float32)
    h2 = jnp.maximum(h2 + b4_ref[...], 0.0)                     # [tb, 400] f32

    logits = jnp.dot(h2.astype(jnp.bfloat16), w5_ref[...],
                     preferred_element_type=jnp.float32) + b5_ref[...]  # [tb,896]

    xrec_ref[...] = jax.nn.sigmoid(logits).astype(xrec_ref.dtype)
    mulv_ref[...] = mulv.astype(mulv_ref.dtype)


def pack_params(params):
    """One-time packing: bf16 weights, lane-padded fused fc2|fc3, padded fc4/fc5."""
    w1, b1, w2, b2, w3, b3, w4, b4, w5, b5 = params
    bf, f32 = jnp.bfloat16, jnp.float32

    # fused encoder head [400, 256]: mu in lanes 0..19, log_var in lanes 128..147
    w23 = jnp.zeros((H_DIM, HEAD_PAD), f32)
    w23 = w23.at[:, :Z_DIM].set(w2)
    w23 = w23.at[:, LANE:LANE + Z_DIM].set(w3)
    b23 = jnp.zeros((1, HEAD_PAD), f32)
    b23 = b23.at[:, :Z_DIM].set(b2)
    b23 = b23.at[:, LANE:LANE + Z_DIM].set(b3)

    # decoder input padded to K=128 (zero rows 20..127)
    w4p = jnp.zeros((LANE, H_DIM), f32).at[:Z_DIM, :].set(w4)

    # final layer padded to N=896 = 7*128 (zero columns 784..895)
    w5p = jnp.zeros((H_DIM, OUT_PAD), f32).at[:, :IMAGE_SIZE].set(w5)
    b5p = jnp.zeros((1, OUT_PAD), f32).at[:, :IMAGE_SIZE].set(b5)

    return (
        w1.astype(bf), b1.astype(f32),
        w23.astype(bf), b23.astype(f32),
        w4p.astype(bf), b4.astype(f32),
        w5p.astype(bf), b5p.astype(f32),
    )


@functools.partial(jax.jit, static_argnames=("block_b",))
def vae_forward(x, eps, packed, block_b=MAX_TB):
    """x: [B, 784] f32, eps: [B, 20] f32 (the torch.randn_like sample).

    packed: output of pack_params.
    Returns (x_reconst [B,784], mu [B,20], log_var [B,20]) in f32.
    """
    B = x.shape[0]
    w1, b1, w23, b23, w4, b4, w5, b5 = packed

    tb = _choose_tb(B, block_b)
    Bp = _round_up(B, tb)

    # Cast x once in the wrapper (halves the dominant input HBM traffic).
    x_bf = x.astype(jnp.bfloat16)
    if Bp != B:
        x_bf = jnp.pad(x_bf, ((0, Bp - B), (0, 0)))
    # eps pre-padded to 128 lanes so the reparam is vreg-aligned in-kernel.
    eps_p = jnp.pad(eps, ((0, Bp - B), (0, LANE - Z_DIM)))

    grid = (Bp // tb,)

    def batch_map(i):
        return (i, 0)

    def const_map(i):
        return (0, 0)

    in_specs = [
        pl.BlockSpec((tb, IMAGE_SIZE), batch_map),        # x (bf16)
        pl.BlockSpec((tb, LANE), batch_map),              # eps (f32, lane-padded)
        pl.BlockSpec((IMAGE_SIZE, H_DIM), const_map),     # w1 (VMEM-resident)
        pl.BlockSpec((1, H_DIM), const_map),              # b1
        pl.BlockSpec((H_DIM, HEAD_PAD), const_map),       # w2|w3 (lane-padded)
        pl.BlockSpec((1, HEAD_PAD), const_map),           # b2|b3
        pl.BlockSpec((LANE, H_DIM), const_map),           # w4 (K padded to 128)
        pl.BlockSpec((1, H_DIM), const_map),              # b4
        pl.BlockSpec((H_DIM, OUT_PAD), const_map),        # w5 (N padded to 896)
        pl.BlockSpec((1, OUT_PAD), const_map),            # b5
    ]
    out_specs = (
        pl.BlockSpec((tb, OUT_PAD), batch_map),           # x_reconst (padded)
        pl.BlockSpec((tb, HEAD_PAD), batch_map),          # mu | log_var (padded)
    )
    out_shape = (
        jax.ShapeDtypeStruct((Bp, OUT_PAD), jnp.float32),
        jax.ShapeDtypeStruct((Bp, HEAD_PAD), jnp.float32),
    )

    # Advisory cost estimate for XLA's scheduler around the custom call.
    flops = 2 * Bp * (IMAGE_SIZE * H_DIM + H_DIM * 2 * Z_DIM
                      + Z_DIM * H_DIM + H_DIM * IMAGE_SIZE)
    transcendentals = Bp * (IMAGE_SIZE + Z_DIM)           # sigmoid + exp
    weight_bytes = 2 * (IMAGE_SIZE * H_DIM + H_DIM * HEAD_PAD
                        + LANE * H_DIM + H_DIM * OUT_PAD)
    bias_bytes = 4 * (H_DIM + HEAD_PAD + H_DIM + OUT_PAD)
    act_bytes = Bp * (IMAGE_SIZE * 2 + LANE * 4 + OUT_PAD * 4 + HEAD_PAD * 4)
    cost = pl.CostEstimate(flops=flops, transcendentals=transcendentals,
                           bytes_accessed=weight_bytes + bias_bytes + act_bytes)

    xrec, mulv = pl.pallas_call(
        _vae_kernel,
        out_shape=out_shape,
        grid=grid,
        in_specs=in_specs,
        out_specs=out_specs,
        compiler_params=pltpu.CompilerParams(
            dimension_semantics=("parallel",),
            vmem_limit_bytes=32 << 20,
        ),
        cost_estimate=cost,
    )(x_bf, eps_p, w1, b1, w23, b23, w4, b4, w5, b5)

    x_rec = xrec[:B, :IMAGE_SIZE]
    mu = mulv[:B, :Z_DIM]
    log_var = mulv[:B, LANE:LANE + Z_DIM]
    return x_rec, mu, log_var


def init_params(key):
    """Deterministic synthetic parameters with the nn.Linear shapes (f32).

    Weights stored as [in, out] (transposed vs. PyTorch's [out, in]);
    biases stored as [1, out] so they broadcast over the batch.
    """
    dims = [
        (IMAGE_SIZE, H_DIM),  # fc1
        (H_DIM, Z_DIM),       # fc2
        (H_DIM, Z_DIM),       # fc3
        (Z_DIM, H_DIM),       # fc4
        (H_DIM, IMAGE_SIZE),  # fc5
    ]
    params = []
    for fin, fout in dims:
        kw, kb, key = jax.random.split(key, 3)
        bound = 1.0 / jnp.sqrt(jnp.float32(fin))  # PyTorch Linear default scale
        w = jax.random.uniform(kw, (fin, fout), jnp.float32, -bound, bound)
        b = jax.random.uniform(kb, (1, fout), jnp.float32, -bound, bound)
        params += [w, b]
    return tuple(params)


def vae_forward_ref(x, eps, params):
    """Plain-JAX reference matching the kernel's bf16-weight / f32-accum math."""
    w1, b1, w2, b2, w3, b3, w4, b4, w5, b5 = params
    bf = jnp.bfloat16

    def mm(a, w):
        return jnp.dot(a.astype(bf), w.astype(bf),
                       preferred_element_type=jnp.float32)

    h = jax.nn.relu(mm(x, w1) + b1)
    mu = mm(h, w2) + b2
    log_var = mm(h, w3) + b3
    z = mu + eps * jnp.exp(log_var * 0.5)
    h2 = jax.nn.relu(mm(z, w4) + b4)
    x_rec = jax.nn.sigmoid(mm(h2, w5) + b5)
    return x_rec, mu, log_var


if __name__ == "__main__":
    key = jax.random.PRNGKey(0)
    kx, keps, kparam = jax.random.split(key, 3)

    B = 8
    x = jax.random.uniform(kx, (B, IMAGE_SIZE), jnp.float32)      # "image" batch
    # TODO(synk): torch.randn_like inside reparameterize is supplied here as an
    # external deterministic eps sample (the kernel is purely functional).
    eps = jax.random.normal(keps, (B, Z_DIM), jnp.float32)
    params = init_params(kparam)
    packed = pack_params(params)

    x_rec, mu, log_var = vae_forward(x, eps, packed)
    jax.block_until_ready((x_rec, mu, log_var))

    # sanity check against a plain-JAX reference with matching bf16 weights
    r_rec, r_mu, r_lv = vae_forward_ref(x, eps, params)
    assert x_rec.shape == (B, IMAGE_SIZE) and mu.shape == (B, Z_DIM)
    assert jnp.allclose(x_rec, r_rec, atol=5e-3, rtol=5e-3)
    assert jnp.allclose(mu, r_mu, atol=5e-3, rtol=5e-3)
    assert jnp.allclose(log_var, r_lv, atol=5e-3, rtol=5e-3)

    print("KERNEL_OK")
</pallas_src>

<mosaic_0001>
module attributes {stable_mosaic.version = 11 : i64} {
  func.func @_vae_kernel(%arg0: i32, %arg1: memref<16x784xbf16, #tpu.memory_space<vmem>>, %arg2: memref<16x128xf32, #tpu.memory_space<vmem>>, %arg3: memref<784x400xbf16, #tpu.memory_space<vmem>>, %arg4: memref<1x400xf32, #tpu.memory_space<vmem>>, %arg5: memref<400x256xbf16, #tpu.memory_space<vmem>>, %arg6: memref<1x256xf32, #tpu.memory_space<vmem>>, %arg7: memref<128x400xbf16, #tpu.memory_space<vmem>>, %arg8: memref<1x400xf32, #tpu.memory_space<vmem>>, %arg9: memref<400x896xbf16, #tpu.memory_space<vmem>>, %arg10: memref<1x896xf32, #tpu.memory_space<vmem>>, %arg11: memref<16x896xf32, #tpu.memory_space<vmem>>, %arg12: memref<16x256xf32, #tpu.memory_space<vmem>>) attributes {dimension_semantics = [#tpu.dimension_semantics<parallel>], iteration_bounds = array<i64: 1>, scalar_prefetch = 0 : i64, scratch_operands = 0 : i64, tpu.core_type = #tpu.core_type<tc>, window_params = [{transform_indices = @transform_0, window_bounds = array<i64: 16, 784>}, {transform_indices = @transform_1, window_bounds = array<i64: 16, 128>}, {pipeline_mode = #tpu.pipeline_mode<synchronous>, transform_indices = @transform_2, window_bounds = array<i64: 784, 400>}, {pipeline_mode = #tpu.pipeline_mode<synchronous>, transform_indices = @transform_3, window_bounds = array<i64: 1, 400>}, {pipeline_mode = #tpu.pipeline_mode<synchronous>, transform_indices = @transform_4, window_bounds = array<i64: 400, 256>}, {pipeline_mode = #tpu.pipeline_mode<synchronous>, transform_indices = @transform_5, window_bounds = array<i64: 1, 256>}, {pipeline_mode = #tpu.pipeline_mode<synchronous>, transform_indices = @transform_6, window_bounds = array<i64: 128, 400>}, {pipeline_mode = #tpu.pipeline_mode<synchronous>, transform_indices = @transform_7, window_bounds = array<i64: 1, 400>}, {pipeline_mode = #tpu.pipeline_mode<synchronous>, transform_indices = @transform_8, window_bounds = array<i64: 400, 896>}, {pipeline_mode = #tpu.pipeline_mode<synchronous>, transform_indices = @transform_9, window_bounds = array<i64: 1, 896>}, {transform_indices = @transform_10, window_bounds = array<i64: 16, 896>}, {transform_indices = @transform_11, window_bounds = array<i64: 16, 256>}]} {
    %c0 = arith.constant 0 : index
    %c0_0 = arith.constant 0 : index
    %0 = vector.load %arg1[%c0, %c0_0] : memref<16x784xbf16, #tpu.memory_space<vmem>>, vector<16x784xbf16>
    %c0_1 = arith.constant 0 : index
    %c0_2 = arith.constant 0 : index
    %1 = vector.load %arg3[%c0_1, %c0_2] : memref<784x400xbf16, #tpu.memory_space<vmem>>, vector<784x400xbf16>
    %cst = arith.constant dense<0.000000e+00> : vector<16x400xf32>
    %2 = tpu.matmul %0, %1, %cst {dimension_numbers = #tpu.dot_dimension_numbers<[1], [0], [0], [1], [0, 0, 1, 1], [], []>} : vector<16x784xbf16>, vector<784x400xbf16>, vector<16x400xf32> -> vector<16x400xf32>
    %c0_3 = arith.constant 0 : index
    %c0_4 = arith.constant 0 : index
    %3 = vector.load %arg4[%c0_3, %c0_4] : memref<1x400xf32, #tpu.memory_space<vmem>>, vector<1x400xf32>
    %4 = vector.broadcast %3 : vector<1x400xf32> to vector<16x400xf32>
    %5 = arith.addf %2, %4 : vector<16x400xf32>
    %cst_5 = arith.constant 0.000000e+00 : f32
    %6 = vector.broadcast %cst_5 : f32 to vector<16x400xf32>
    %7 = arith.maximumf %5, %6 : vector<16x400xf32>
    %8 = arith.truncf %7 : vector<16x400xf32> to vector<16x400xbf16>
    %c0_6 = arith.constant 0 : index
    %c0_7 = arith.constant 0 : index
    %9 = vector.load %arg5[%c0_6, %c0_7] : memref<400x256xbf16, #tpu.memory_space<vmem>>, vector<400x256xbf16>
    %cst_8 = arith.constant dense<0.000000e+00> : vector<16x256xf32>
    %10 = tpu.matmul %8, %9, %cst_8 {dimension_numbers = #tpu.dot_dimension_numbers<[1], [0], [0], [1], [0, 0, 1, 1], [], []>} : vector<16x400xbf16>, vector<400x256xbf16>, vector<16x256xf32> -> vector<16x256xf32>
    %c0_9 = arith.constant 0 : index
    %c0_10 = arith.constant 0 : index
    %11 = vector.load %arg6[%c0_9, %c0_10] : memref<1x256xf32, #tpu.memory_space<vmem>>, vector<1x256xf32>
    %12 = vector.broadcast %11 : vector<1x256xf32> to vector<16x256xf32>
    %13 = arith.addf %10, %12 : vector<16x256xf32>
    %14 = vector.extract_strided_slice %13 {offsets = [0, 0], sizes = [16, 128], strides = [1, 1]} : vector<16x256xf32> to vector<16x128xf32>
    %15 = vector.extract_strided_slice %13 {offsets = [0, 128], sizes = [16, 128], strides = [1, 1]} : vector<16x256xf32> to vector<16x128xf32>
    %c0_11 = arith.constant 0 : index
    %c0_12 = arith.constant 0 : index
    %16 = vector.load %arg2[%c0_11, %c0_12] : memref<16x128xf32, #tpu.memory_space<vmem>>, vector<16x128xf32>
    %cst_13 = arith.constant 5.000000e-01 : f32
    %17 = vector.broadcast %cst_13 : f32 to vector<16x128xf32>
    %18 = arith.mulf %15, %17 : vector<16x128xf32>
    %19 = math.exp %18 : vector<16x128xf32>
    %20 = arith.mulf %16, %19 : vector<16x128xf32>
    %21 = arith.addf %14, %20 : vector<16x128xf32>
    %22 = arith.truncf %21 : vector<16x128xf32> to vector<16x128xbf16>
    %c0_14 = arith.constant 0 : index
    %c0_15 = arith.constant 0 : index
    %23 = vector.load %arg7[%c0_14, %c0_15] : memref<128x400xbf16, #tpu.memory_space<vmem>>, vector<128x400xbf16>
    %cst_16 = arith.constant dense<0.000000e+00> : vector<16x400xf32>
    %24 = tpu.matmul %22, %23, %cst_16 {dimension_numbers = #tpu.dot_dimension_numbers<[1], [0], [0], [1], [0, 0, 1, 1], [], []>} : vector<16x128xbf16>, vector<128x400xbf16>, vector<16x400xf32> -> vector<16x400xf32>
    %c0_17 = arith.constant 0 : index
    %c0_18 = arith.constant 0 : index
    %25 = vector.load %arg8[%c0_17, %c0_18] : memref<1x400xf32, #tpu.memory_space<vmem>>, vector<1x400xf32>
    %26 = vector.broadcast %25 : vector<1x400xf32> to vector<16x400xf32>
    %27 = arith.addf %24, %26 : vector<16x400xf32>
    %cst_19 = arith.constant 0.000000e+00 : f32
    %28 = vector.broadcast %cst_19 : f32 to vector<16x400xf32>
    %29 = arith.maximumf %27, %28 : vector<16x400xf32>
    %30 = arith.truncf %29 : vector<16x400xf32> to vector<16x400xbf16>
    %c0_20 = arith.constant 0 : index
    %c0_21 = arith.constant 0 : index
    %31 = vector.load %arg9[%c0_20, %c0_21] : memref<400x896xbf16, #tpu.memory_space<vmem>>, vector<400x896xbf16>
    %cst_22 = arith.constant dense<0.000000e+00> : vector<16x896xf32>
    %32 = tpu.matmul %30, %31, %cst_22 {dimension_numbers = #tpu.dot_dimension_numbers<[1], [0], [0], [1], [0, 0, 1, 1], [], []>} : vector<16x400xbf16>, vector<400x896xbf16>, vector<16x896xf32> -> vector<16x896xf32>
    %c0_23 = arith.constant 0 : index
    %c0_24 = arith.constant 0 : index
    %33 = vector.load %arg10[%c0_23, %c0_24] : memref<1x896xf32, #tpu.memory_space<vmem>>, vector<1x896xf32>
    %34 = vector.broadcast %33 : vector<1x896xf32> to vector<16x896xf32>
    %35 = arith.addf %32, %34 : vector<16x896xf32>
    %36 = arith.negf %35 : vector<16x896xf32>
    %37 = math.exp %36 : vector<16x896xf32>
    %cst_25 = arith.constant 1.000000e+00 : f32
    %38 = vector.broadcast %cst_25 : f32 to vector<16x896xf32>
    %39 = arith.addf %38, %37 : vector<16x896xf32>
    %40 = arith.divf %38, %39 : vector<16x896xf32>
    %c0_26 = arith.constant 0 : index
    %c0_27 = arith.constant 0 : index
    %41 = vector.load %arg11[%c0_26, %c0_27] : memref<16x896xf32, #tpu.memory_space<vmem>>, vector<16x896xf32>
    tpu.vector_store %arg11[%c0_26, %c0_27], %40 {strides = array<i32>} : memref<16x896xf32, #tpu.memory_space<vmem>>, vector<16x896xf32>,
    %c0_28 = arith.constant 0 : index
    %c0_29 = arith.constant 0 : index
    %42 = vector.load %arg12[%c0_28, %c0_29] : memref<16x256xf32, #tpu.memory_space<vmem>>, vector<16x256xf32>
    tpu.vector_store %arg12[%c0_28, %c0_29], %13 {strides = array<i32>} : memref<16x256xf32, #tpu.memory_space<vmem>>, vector<16x256xf32>,
    return
  }
  func.func @transform_0(%arg0: i32) -> (i32, i32) {
    %c0_i32 = arith.constant 0 : i32
    %c0_i32_0 = arith.constant 0 : i32
    return %arg0, %c0_i32 : i32, i32
  }
  func.func @transform_1(%arg0: i32) -> (i32, i32) {
    %c0_i32 = arith.constant 0 : i32
    %c0_i32_0 = arith.constant 0 : i32
    return %arg0, %c0_i32 : i32, i32
  }
  func.func @transform_2(%arg0: i32) -> (i32, i32) {
    %c0_i32 = arith.constant 0 : i32
    %c0_i32_0 = arith.constant 0 : i32
    %c0_i32_1 = arith.constant 0 : i32
    return %c0_i32, %c0_i32_0 : i32, i32
  }
  func.func @transform_3(%arg0: i32) -> (i32, i32) {
    %c0_i32 = arith.constant 0 : i32
    %c0_i32_0 = arith.constant 0 : i32
    %c0_i32_1 = arith.constant 0 : i32
    return %c0_i32, %c0_i32_0 : i32, i32
  }
  func.func @transform_4(%arg0: i32) -> (i32, i32) {
    %c0_i32 = arith.constant 0 : i32
    %c0_i32_0 = arith.constant 0 : i32
    %c0_i32_1 = arith.constant 0 : i32
    return %c0_i32, %c0_i32_0 : i32, i32
  }
  func.func @transform_5(%arg0: i32) -> (i32, i32) {
    %c0_i32 = arith.constant 0 : i32
    %c0_i32_0 = arith.constant 0 : i32
    %c0_i32_1 = arith.constant 0 : i32
    return %c0_i32, %c0_i32_0 : i32, i32
  }
  func.func @transform_6(%arg0: i32) -> (i32, i32) {
    %c0_i32 = arith.constant 0 : i32
    %c0_i32_0 = arith.constant 0 : i32
    %c0_i32_1 = arith.constant 0 : i32
    return %c0_i32, %c0_i32_0 : i32, i32
  }
  func.func @transform_7(%arg0: i32) -> (i32, i32) {
    %c0_i32 = arith.constant 0 : i32
    %c0_i32_0 = arith.constant 0 : i32
    %c0_i32_1 = arith.constant 0 : i32
    return %c0_i32, %c0_i32_0 : i32, i32
  }
  func.func @transform_8(%arg0: i32) -> (i32, i32) {
    %c0_i32 = arith.constant 0 : i32
    %c0_i32_0 = arith.constant 0 : i32
    %c0_i32_1 = arith.constant 0 : i32
    return %c0_i32, %c0_i32_0 : i32, i32
  }
  func.func @transform_9(%arg0: i32) -> (i32, i32) {
    %c0_i32 = arith.constant 0 : i32
    %c0_i32_0 = arith.constant 0 : i32
    %c0_i32_1 = arith.constant 0 : i32
    return %c0_i32, %c0_i32_0 : i32, i32
  }
  func.func @transform_10(%arg0: i32) -> (i32, i32) {
    %c0_i32 = arith.constant 0 : i32
    %c0_i32_0 = arith.constant 0 : i32
    return %arg0, %c0_i32 : i32, i32
  }
  func.func @transform_11(%arg0: i32) -> (i32, i32) {
    %c0_i32 = arith.constant 0 : i32
    %c0_i32_0 = arith.constant 0 : i32
    return %arg0, %c0_i32 : i32, i32
  }
}

</mosaic_0001>

<bundles_post_ra>
// kernel: vae_forward.1
= control target key start
LH: loop header
LB: loop body
LE: loop exit
PB: predicated region body
PF: predicated region fallthrough
CT: control target
= control target key end

     0   :  { %vm1267_vm0 = vcmask 130048   ;;  %s9594_s2 = inlined_call_operand.vmem [shape: bf16[784,400], index: 2, kind: input, shape index: {}]   ;;  %s9595_s0 = inlined_call_operand.vmem [shape: bf16[16,784], index: 0, kind: input, shape index: {}]   ;;  %s9596_s3 = inlined_call_operand.vmem [shape: f32[1,400], index: 3, kind: input, shape index: {}]   ;;  %s9597_s4 = inlined_call_operand.vmem [shape: bf16[400,256], index: 4, kind: input, shape index: {}]   ;;  %s9598_s6 = inlined_call_operand.vmem [shape: bf16[128,400], index: 6, kind: input, shape index: {}]   ;;  %s9599_s5 = inlined_call_operand.vmem [shape: f32[1,256], index: 5, kind: input, shape index: {}]   ;;  %s9600_s11 = inlined_call_operand.vmem [shape: f32[16,256], index: 11, kind: output, shape index: {1}]   ;;  %s9601_s8 = inlined_call_operand.vmem [shape: bf16[400,896], index: 8, kind: input, shape index: {}]   ;;  %s9602_s1 = inlined_call_operand.vmem [shape: f32[16,128], index: 1, kind: input, shape index: {}]   ;;  %s9603_s7 = inlined_call_operand.vmem [shape: f32[1,400], index: 7, kind: input, shape index: {}]   ;;  %s9604_s9 = inlined_call_operand.vmem [shape: f32[1,896], index: 9, kind: input, shape index: {}]   ;;  %s9605_s10 = inlined_call_operand.vmem [shape: f32[16,896], index: 10, kind: output, shape index: {0}]  }
   0x1   :  { %v4324_v0 = vld [vmem:[%s9594_s2 + $0xe0] sm:$0xf]  ;;  %v6086_v1 = vld [vmem:[%s9594_s2 + $0xec] sm:$0xf0] }
   0x2   :  { %v4452_v2 = vld [vmem:[%s9594_s2 + $0x1e0] sm:$0xf]  ;;  %v4325_v3 = vor.u32 %v6086_v1, %v4324_v0  ;;  %v6118_v4 = vld [vmem:[%s9594_s2 + $0x1ec] sm:$0xf0] }
   0x3   :  { %v4580_v5 = vld [vmem:[%s9594_s2 + $0x2e0] sm:$0xf]  ;;  %v6150_v6 = vld [vmem:[%s9594_s2 + $0x2ec] sm:$0xf0]  ;;  %v4453_v7 = vor.u32 %v6118_v4, %v4452_v2 }
   0x4   :  { %v4581_v8 = vor.u32 %v6150_v6, %v4580_v5  ;;  %v4708_v9 = vld [vmem:[%s9594_s2 + $0x3e0] sm:$0xf]  ;;  %v6182_v10 = vld [vmem:[%s9594_s2 + $0x3ec] sm:$0xf0]  ;;  %1271 = vmatpush.bf16.msra.mxu0 %v4325_v3 }
   0x5   :  { %v4308_v11 = vld [vmem:[%s9594_s2 + $0xc0] sm:$0xf]  ;;  %v4709_v12 = vor.u32 %v6182_v10, %v4708_v9  ;;  %v6082_v13 = vld [vmem:[%s9594_s2 + $0xcc] sm:$0xf0]  ;;  %1285 = vmatpush.bf16.msra.mxu1 %v4453_v7 }
   0x6   :  { %v4436_v14 = vld [vmem:[%s9594_s2 + $0x1c0] sm:$0xf]  ;;  %v6114_v15 = vld [vmem:[%s9594_s2 + $0x1cc] sm:$0xf0]  ;;  %1299 = vmatpush.bf16.msra.mxu2 %v4581_v8  ;;  %v4309_v16 = vor.u32 %v6082_v13, %v4308_v11 }
   0x7   :  { %v4437_v17 = vor.u32 %v6114_v15, %v4436_v14  ;;  %v4564_v18 = vld [vmem:[%s9594_s2 + $0x2c0] sm:$0xf]  ;;  %v6146_v19 = vld [vmem:[%s9594_s2 + $0x2cc] sm:$0xf0]  ;;  %1313 = vmatpush.bf16.msra.mxu3 %v4709_v12 }
   0x8   :  { %v4692_v20 = vld [vmem:[%s9594_s2 + $0x3c0] sm:$0xf]  ;;  %v4565_v21 = vor.u32 %v6146_v19, %v4564_v18  ;;  %v6178_v22 = vld [vmem:[%s9594_s2 + $0x3cc] sm:$0xf0]  ;;  %1272 = vmatpush.bf16.msra.mxu0 %v4309_v16 }
   0x9   :  { %v4292_v23 = vld [vmem:[%s9594_s2 + $0xa0] sm:$0xf]  ;;  %v6078_v24 = vld [vmem:[%s9594_s2 + $0xac] sm:$0xf0]  ;;  %v4693_v25 = vor.u32 %v6178_v22, %v4692_v20  ;;  %1286 = vmatpush.bf16.msra.mxu1 %v4437_v17 }
   0xa   :  { %v4420_v26 = vld [vmem:[%s9594_s2 + $0x1a0] sm:$0xf]  ;;  %v6110_v27 = vld [vmem:[%s9594_s2 + $0x1ac] sm:$0xf0]  ;;  %v4293_v29 = vor.u32 %v6078_v24, %v4292_v23  ;;  %1300 = vmatpush.bf16.msra.mxu2 %v4565_v21 }
   0xb   :  { %v4548_v28 = vld [vmem:[%s9594_s2 + $0x2a0] sm:$0xf]  ;;  %v6142_v30 = vld [vmem:[%s9594_s2 + $0x2ac] sm:$0xf0]  ;;  %v4421_v33 = vor.u32 %v6110_v27, %v4420_v26  ;;  %1314 = vmatpush.bf16.msra.mxu3 %v4693_v25 }
   0xc   :  { %v4676_v31 = vld [vmem:[%s9594_s2 + $0x3a0] sm:$0xf]  ;;  %v6174_v32 = vld [vmem:[%s9594_s2 + $0x3ac] sm:$0xf0]  ;;  %v4549_v34 = vor.u32 %v6142_v30, %v4548_v28  ;;  %1273 = vmatpush.bf16.msra.mxu0 %v4293_v29 }
   0xd   :  { %v4276_v35 = vld [vmem:[%s9594_s2 + $0x80] sm:$0xf]  ;;  %v6074_v36 = vld [vmem:[%s9594_s2 + $0x8c] sm:$0xf0]  ;;  %v4677_v38 = vor.u32 %v6174_v32, %v4676_v31  ;;  %1287 = vmatpush.bf16.msra.mxu1 %v4421_v33  ;;  %v6084_v32 = vld [vmem:[%s9594_s2 + $0xe4] sm:$0xf] }
   0xe   :  { %v4404_v37 = vld [vmem:[%s9594_s2 + $0x180] sm:$0xf]  ;;  %v6106_v39 = vld [vmem:[%s9594_s2 + $0x18c] sm:$0xf0]  ;;  %v4277_v44 = vor.u32 %v6074_v36, %v4276_v35  ;;  %1301 = vmatpush.bf16.msra.mxu2 %v4549_v34  ;;  %v4326_v33 = vld [vmem:[%s9594_s2 + $0xf0] sm:$0xf0] }
   0xf   :  { %v4532_v40 = vld [vmem:[%s9594_s2 + $0x280] sm:$0xf]  ;;  %v6138_v41 = vld [vmem:[%s9594_s2 + $0x28c] sm:$0xf0]  ;;  %v4405_v45 = vor.u32 %v6106_v39, %v4404_v37  ;;  %1315 = vmatpush.bf16.msra.mxu3 %v4677_v38  ;;  %v4192_v34 = vld [vmem:[%s9595_s0 + $0x8] sm:$0xf] }
  0x10   :  { %v4660_v42 = vld [vmem:[%s9594_s2 + $0x380] sm:$0xf]  ;;  %v6170_v43 = vld [vmem:[%s9594_s2 + $0x38c] sm:$0xf0]  ;;  %v4533_v46 = vor.u32 %v6138_v41, %v4532_v40  ;;  %1274 = vmatpush.bf16.msra.mxu0 %v4277_v44  ;;  %v6053_v36 = vld [vmem:[%s9595_s0 + $0x20] sm:$0xf0] }
  0x11   :  { %v4260_v47 = vld [vmem:[%s9594_s2 + $0x60] sm:$0xf]  ;;  %v6070_v48 = vld [vmem:[%s9594_s2 + $0x6c] sm:$0xf0]  ;;  %v4661_v50 = vor.u32 %v6170_v43, %v4660_v42  ;;  %1288 = vmatpush.bf16.msra.mxu1 %v4405_v45  ;;  %v6116_v41 = vld [vmem:[%s9594_s2 + $0x1e4] sm:$0xf] }
  0x12   :  { %v4388_v49 = vld [vmem:[%s9594_s2 + $0x160] sm:$0xf]  ;;  %v6102_v51 = vld [vmem:[%s9594_s2 + $0x16c] sm:$0xf0]  ;;  %v4261_v56 = vor.u32 %v6070_v48, %v4260_v47  ;;  %1302 = vmatpush.bf16.msra.mxu2 %v4533_v46  ;;  %v6052_v43 = vld [vmem:[%s9595_s0 + $0x18] sm:$0xf0] }
  0x13   :  { %v4516_v52 = vld [vmem:[%s9594_s2 + $0x260] sm:$0xf]  ;;  %v6134_v53 = vld [vmem:[%s9594_s2 + $0x26c] sm:$0xf0]  ;;  %v4389_v57 = vor.u32 %v6102_v51, %v4388_v49  ;;  %1316 = vmatpush.bf16.msra.mxu3 %v4661_v50  ;;  %v4454_v46 = vld [vmem:[%s9594_s2 + $0x1f0] sm:$0xf0]  ;;  %v4329_v50 = vor.u32 %v6084_v32, %v4326_v33 }
  0x14   :  { %v4644_v54 = vld [vmem:[%s9594_s2 + $0x360] sm:$0xf]  ;;  %v6166_v55 = vld [vmem:[%s9594_s2 + $0x36c] sm:$0xf0]  ;;  %v4517_v58 = vor.u32 %v6134_v53, %v4516_v52  ;;  %1275 = vmatpush.bf16.msra.mxu0 %v4261_v56  ;;  %v6050_v47 = vld [vmem:[%s9595_s0 + $0xc] sm:$0xf] }
  0x15   :  { %v4244_v59 = vld [vmem:[%s9594_s2 + $0x40] sm:$0xf]  ;;  %v6066_v60 = vld [vmem:[%s9594_s2 + $0x4c] sm:$0xf0]  ;;  %v4645_v62 = vor.u32 %v6166_v55, %v4644_v54  ;;  %1289 = vmatpush.bf16.msra.mxu1 %v4389_v57  ;;  %v4194_v48 = vld [vmem:[%s9595_s0 + $0x24] sm:$0xf0]  ;;  %v6878_v54 = vor.u32 %v6053_v36, %v4192_v34 }
  0x16   :  { %v4372_v61 = vld [vmem:[%s9594_s2 + $0x140] sm:$0xf]  ;;  %v6098_v63 = vld [vmem:[%s9594_s2 + $0x14c] sm:$0xf0]  ;;  %v4245_v4 = vor.u32 %v6066_v60, %v4244_v59  ;;  %1303 = vmatpush.bf16.msra.mxu2 %v4517_v58  ;;  %v6080_v57 = vld [vmem:[%s9594_s2 + $0xc4] sm:$0xf]  ;;  %v6891_v60 = vor.u32 %v6050_v47, %v4194_v48 }
  0x17   :  { %v4500_v0 = vld [vmem:[%s9594_s2 + $0x240] sm:$0xf]  ;;  %v6130_v1 = vld [vmem:[%s9594_s2 + $0x24c] sm:$0xf0]  ;;  %v4373_v6 = vor.u32 %v6098_v63, %v4372_v61  ;;  %1317 = vmatpush.bf16.msra.mxu3 %v4645_v62  ;;  %v4310_v58 = vld [vmem:[%s9594_s2 + $0xd0] sm:$0xf0]  ;;  %v4457_v63 = vor.u32 %v6116_v41, %v4454_v46 }
  0x18   :  { %v4628_v2 = vld [vmem:[%s9594_s2 + $0x340] sm:$0xf]  ;;  %v6162_v3 = vld [vmem:[%s9594_s2 + $0x34c] sm:$0xf0]  ;;  %v4501_v7 = vor.u32 %v6130_v1, %v4500_v0  ;;  %1276 = vmatpush.bf16.msra.mxu0 %v4245_v4  ;;  %v6049_v61 = vld [vmem:[%s9595_s0 + $0x4] sm:$0xf]  ;;  %v4313_v4 = vor.u32 %v6080_v57, %v4310_v58 }
  0x19   :  { %v4228_v5 = vld [vmem:[%s9594_s2 + $0x20] sm:$0xf]  ;;  %v6062_v8 = vld [vmem:[%s9594_s2 + $0x2c] sm:$0xf0]  ;;  %v4629_v11 = vor.u32 %v6162_v3, %v4628_v2  ;;  %1290 = vmatpush.bf16.msra.mxu1 %v4373_v6  ;;  %v6112_v1 = vld [vmem:[%s9594_s2 + $0x1c4] sm:$0xf] }
  0x1a   :  { %v4356_v9 = vld [vmem:[%s9594_s2 + $0x120] sm:$0xf]  ;;  %v6094_v10 = vld [vmem:[%s9594_s2 + $0x12c] sm:$0xf0]  ;;  %v4229_v18 = vor.u32 %v6062_v8, %v4228_v5  ;;  %1304 = vmatpush.bf16.msra.mxu2 %v4501_v7  ;;  %v4438_v2 = vld [vmem:[%s9594_s2 + $0x1d0] sm:$0xf0] }
  0x1b   :  { %v4484_v12 = vld [vmem:[%s9594_s2 + $0x220] sm:$0xf]  ;;  %v6126_v13 = vld [vmem:[%s9594_s2 + $0x22c] sm:$0xf0]  ;;  %v4357_v23 = vor.u32 %v6094_v10, %v4356_v9  ;;  %1318 = vmatpush.bf16.msra.mxu3 %v4629_v11  ;;  %v6076_v10 = vld [vmem:[%s9594_s2 + $0xa4] sm:$0xf] }
  0x1c   :  { %v4612_v14 = vld [vmem:[%s9594_s2 + $0x320] sm:$0xf]  ;;  %v6158_v15 = vld [vmem:[%s9594_s2 + $0x32c] sm:$0xf0]  ;;  %v4485_v24 = vor.u32 %v6126_v13, %v4484_v12  ;;  %1277 = vmatpush.bf16.msra.mxu0 %v4229_v18  ;;  %v4294_v11 = vld [vmem:[%s9594_s2 + $0xb0] sm:$0xf0]  ;;  %v4441_v12 = vor.u32 %v6112_v1, %v4438_v2 }
  0x1d   :  { %v4212_v16 = vld [vmem:[%s9594_s2] sm:$0xf]  ;;  %v6058_v17 = vld [vmem:[%s9594_s2 + $0xc] sm:$0xf0]  ;;  %v4613_v28 = vor.u32 %v6158_v15, %v4612_v14  ;;  %1291 = vmatpush.bf16.msra.mxu1 %v4357_v23  ;;  %v6108_v14 = vld [vmem:[%s9594_s2 + $0x1a4] sm:$0xf] }
  0x1e   :  { %v4340_v19 = vld [vmem:[%s9594_s2 + $0x100] sm:$0xf]  ;;  %v6090_v20 = vld [vmem:[%s9594_s2 + $0x10c] sm:$0xf0]  ;;  %v4213_v35 = vor.u32 %v6058_v17, %v4212_v16  ;;  %1305 = vmatpush.bf16.msra.mxu2 %v4485_v24  ;;  %v4422_v15 = vld [vmem:[%s9594_s2 + $0x1b0] sm:$0xf0]  ;;  %v4297_v17 = vor.u32 %v6076_v10, %v4294_v11 }
  0x1f   :  { %v4468_v21 = vld [vmem:[%s9594_s2 + $0x200] sm:$0xf]  ;;  %v6122_v22 = vld [vmem:[%s9594_s2 + $0x20c] sm:$0xf0]  ;;  %v4341_v39 = vor.u32 %v6090_v20, %v4340_v19  ;;  %1319 = vmatpush.bf16.msra.mxu3 %v4613_v28  ;;  %v4278_v23 = vld [vmem:[%s9594_s2 + $0x90] sm:$0xf0]  ;;  %v4425_v24 = vor.u32 %v6108_v14, %v4422_v15 }
  0x20   :  { %v4596_v25 = vld [vmem:[%s9594_s2 + $0x300] sm:$0xf]  ;;  %v6154_v26 = vld [vmem:[%s9594_s2 + $0x30c] sm:$0xf0]  ;;  %v4469_v40 = vor.u32 %v6122_v22, %v4468_v21  ;;  %1278 = vmatpush.bf16.msra.mxu0 %v4213_v35  ;;  %v6072_v22 = vld [vmem:[%s9594_s2 + $0x84] sm:$0xf] }
  0x21   :  { %v4836_v27 = vld [vmem:[%s9594_s2 + $0x4e0] sm:$0xf]  ;;  %v6214_v29 = vld [vmem:[%s9594_s2 + $0x4ec] sm:$0xf0]  ;;  %v4597_v44 = vor.u32 %v6154_v26, %v4596_v25  ;;  %1292 = vmatpush.bf16.msra.mxu1 %v4341_v39  ;;  %v6104_v26 = vld [vmem:[%s9594_s2 + $0x184] sm:$0xf] }
  0x22   :  { %v4964_v30 = vld [vmem:[%s9594_s2 + $0x5e0] sm:$0xf]  ;;  %v6246_v31 = vld [vmem:[%s9594_s2 + $0x5ec] sm:$0xf0]  ;;  %v4837_v45 = vor.u32 %v6214_v29, %v4836_v27  ;;  %1306 = vmatpush.bf16.msra.mxu2 %v4469_v40  ;;  %v4406_v27 = vld [vmem:[%s9594_s2 + $0x190] sm:$0xf0]  ;;  %v4281_v29 = vor.u32 %v6072_v22, %v4278_v23 }
  0x23   :  { %v4980_v37 = vld [vmem:[%s9594_s2 + $0x600] sm:$0xf]  ;;  %v6250_v38 = vld [vmem:[%s9594_s2 + $0x60c] sm:$0xf0]  ;;  %v4965_v49 = vor.u32 %v6246_v31, %v4964_v30  ;;  %1320 = vmatpush.bf16.msra.mxu3 %v4597_v44  ;;  %v6068_v34 = vld [vmem:[%s9594_s2 + $0x64] sm:$0xf] }
  0x24   :  { %v4184_v42 = vld [vmem:[%s9595_s0] sm:$0xf]  ;;  %v6210_v52 = vld [vmem:[%s9594_s2 + $0x4cc] sm:$0xf0]  ;;  %v4981_v59 = vor.u32 %v6250_v38, %v4980_v37  ;;  %1327 = vmatpush.bf16.msrb.mxu0 %v4837_v45  ;;  %v4262_v35 = vld [vmem:[%s9594_s2 + $0x70] sm:$0xf0]  ;;  %v4409_v38 = vor.u32 %v6104_v26, %v4406_v27 }
  0x25   :  { %v4820_v51 = vld [vmem:[%s9594_s2 + $0x4c0] sm:$0xf]  ;;  %v6880_v55 = vor.u32 %v6052_v43, %v4184_v42  ;;  %v6242_v56 = vld [vmem:[%s9594_s2 + $0x5cc] sm:$0xf0]  ;;  %1341 = vmatpush.bf16.msrb.mxu1 %v4965_v49  ;;  %1307 = vmatmul.bf16.vlgmr.msra.gmra.mxu2 %v6878_v54  ;;  %v4208_v36 = vld [vmem:[%s9595_s0 + $0x18] sm:$0xf]  ;;  %v4265_v43 = vor.u32 %v6068_v34, %v4262_v35 }
  0x26   :  { %v4948_v53 = vld [vmem:[%s9594_s2 + $0x5c0] sm:$0xf]  ;;  %v4821_v0 = vor.u32 %v6210_v52, %v4820_v51  ;;  %v6206_v6 = vld [vmem:[%s9594_s2 + $0x4ac] sm:$0xf0]  ;;  %1362 = vmatpush.bf16.msrb.mxu2 %v4981_v59  ;;  %1321 = vmatmul.bf16.vlgmr.msra.gmra.mxu3 %v6891_v60  ;;  %v6055_v37 = vld [vmem:[%s9595_s0 + $0x30] sm:$0xf0] }
  0x27   :  { %v4186_v62 = vld [vmem:[%s9595_s0 + $0x1c] sm:$0xf0]  ;;  %1369 = vmatpush.bf16.msrb.mxu3 %v4329_v50  ;;  %v4949_v3 = vor.u32 %v6242_v56, %v4948_v53  ;;  %1279 = vmatmul.bf16.vlgmr.msra.gmra.mxu0 %v6880_v55  ;;  %v6238_v9 = vld [vmem:[%s9594_s2 + $0x5ac] sm:$0xf0]  ;;  %v6100_v40 = vld [vmem:[%s9594_s2 + $0x164] sm:$0xf]  ;;  %v7007_v50 = vor.u32 %v6055_v37, %v4208_v36 }
  0x28   :  { %v4804_v5 = vld [vmem:[%s9594_s2 + $0x4a0] sm:$0xf]  ;;  %v6916_v8 = vor.u32 %v6049_v61, %v4186_v62  ;;  %1328 = vmatpush.bf16.msrb.mxu0 %v4821_v0  ;;  %v6202_v19 = vld [vmem:[%s9594_s2 + $0x48c] sm:$0xf0]  ;;  %v4390_v41 = vld [vmem:[%s9594_s2 + $0x170] sm:$0xf0] }
  0x29   :  { %v4932_v7 = vld [vmem:[%s9594_s2 + $0x5a0] sm:$0xf]  ;;  %v4805_v13 = vor.u32 %v6206_v6, %v4804_v5  ;;  %1342 = vmatpush.bf16.msrb.mxu1 %v4949_v3  ;;  %v6234_v21 = vld [vmem:[%s9594_s2 + $0x58c] sm:$0xf0]  ;;  %v6064_v48 = vld [vmem:[%s9594_s2 + $0x44] sm:$0xf]  ;;  %v4393_v51 = vor.u32 %v6100_v40, %v4390_v41 }
  0x2a   :  { %1383 = vmatpush.bf16.msra.mxu2 %v4457_v63  ;;  %v4933_v16 = vor.u32 %v6238_v9, %v4932_v7  ;;  %v4788_v18 = vld [vmem:[%s9594_s2 + $0x480] sm:$0xf]  ;;  %1293 = vmatmul.bf16.vlgmr.msra.gmra.mxu1 %v6916_v8  ;;  %v6198_v31 = vld [vmem:[%s9594_s2 + $0x46c] sm:$0xf0]  ;;  %v4246_v49 = vld [vmem:[%s9594_s2 + $0x50] sm:$0xf0] }
  0x2b   :  { %1370 = vmatpush.bf16.msrb.mxu3 %v4313_v4  ;;  %v4916_v20 = vld [vmem:[%s9594_s2 + $0x580] sm:$0xf]  ;;  %v4789_v25 = vor.u32 %v6202_v19, %v4788_v18  ;;  %v6230_v33 = vld [vmem:[%s9594_s2 + $0x56c] sm:$0xf0]  ;;  %v6096_v53 = vld [vmem:[%s9594_s2 + $0x144] sm:$0xf]  ;;  %v4249_v58 = vor.u32 %v6064_v48, %v4246_v49 }
  0x2c   :  { %1329 = vmatpush.bf16.msrb.mxu0 %v4805_v13  ;;  %v4917_v28 = vor.u32 %v6234_v21, %v4916_v20  ;;  %v4772_v30 = vld [vmem:[%s9594_s2 + $0x460] sm:$0xf]  ;;  %v6194_v45 = vld [vmem:[%s9594_s2 + $0x44c] sm:$0xf0]  ;;  %v4374_v56 = vld [vmem:[%s9594_s2 + $0x150] sm:$0xf0] }
  0x2d   :  { %1343 = vmatpush.bf16.msrb.mxu1 %v4933_v16  ;;  %v4900_v32 = vld [vmem:[%s9594_s2 + $0x560] sm:$0xf]  ;;  %v4773_v39 = vor.u32 %v6198_v31, %v4772_v30  ;;  %v6226_v47 = vld [vmem:[%s9594_s2 + $0x54c] sm:$0xf0]  ;;  %v6060_v0 = vld [vmem:[%s9594_s2 + $0x24] sm:$0xf]  ;;  %v4377_v4 = vor.u32 %v6096_v53, %v4374_v56 }
  0x2e   :  { %1384 = vmatpush.bf16.msra.mxu2 %v4441_v12  ;;  %v4901_v42 = vor.u32 %v6230_v33, %v4900_v32  ;;  %v4756_v44 = vld [vmem:[%s9594_s2 + $0x440] sm:$0xf]  ;;  %v6190_v61 = vld [vmem:[%s9594_s2 + $0x42c] sm:$0xf0]  ;;  %v4230_v1 = vld [vmem:[%s9594_s2 + $0x30] sm:$0xf0] }
  0x2f   :  { %1371 = vmatpush.bf16.msrb.mxu3 %v4297_v17  ;;  %v4884_v46 = vld [vmem:[%s9594_s2 + $0x540] sm:$0xf]  ;;  %v4757_v52 = vor.u32 %v6194_v45, %v4756_v44  ;;  %v6222_v63 = vld [vmem:[%s9594_s2 + $0x52c] sm:$0xf0]  ;;  %v6092_v2 = vld [vmem:[%s9594_s2 + $0x124] sm:$0xf]  ;;  %v4233_v11 = vor.u32 %v6060_v0, %v4230_v1 }
  0x30   :  { %1330 = vmatpush.bf16.msrb.mxu0 %v4789_v25  ;;  %v4885_v57 = vor.u32 %v6226_v47, %v4884_v46  ;;  %v4740_v59 = vld [vmem:[%s9594_s2 + $0x420] sm:$0xf]  ;;  %v4358_v3 = vld [vmem:[%s9594_s2 + $0x130] sm:$0xf0]  ;;  %v6186_v7 = vld [vmem:[%s9594_s2 + $0x40c] sm:$0xf0] }
  0x31   :  { %1344 = vmatpush.bf16.msrb.mxu1 %v4917_v28  ;;  %v4868_v62 = vld [vmem:[%s9594_s2 + $0x520] sm:$0xf]  ;;  %v4741_v5 = vor.u32 %v6190_v61, %v4740_v59  ;;  %v6218_v12 = vld [vmem:[%s9594_s2 + $0x50c] sm:$0xf0]  ;;  %v6056_v13 = vld [vmem:[%s9594_s2 + $0x4] sm:$0xf]  ;;  %v4361_v21 = vor.u32 %v6092_v2, %v4358_v3 }
  0x32   :  { %1385 = vmatpush.bf16.msra.mxu2 %v4425_v24  ;;  %v4724_v6 = vld [vmem:[%s9594_s2 + $0x400] sm:$0xf]  ;;  %v4869_v10 = vor.u32 %v6222_v63, %v4868_v62  ;;  %v4214_v14 = vld [vmem:[%s9594_s2 + $0x10] sm:$0xf0]  ;;  %v6148_v15 = vld [vmem:[%s9594_s2 + $0x2e4] sm:$0xf] }
  0x33   :  { %1372 = vmatpush.bf16.msrb.mxu3 %v4281_v29  ;;  %v4852_v9 = vld [vmem:[%s9594_s2 + $0x500] sm:$0xf]  ;;  %v4582_v16 = vld [vmem:[%s9594_s2 + $0x2f0] sm:$0xf0]  ;;  %v6180_v17 = vld [vmem:[%s9594_s2 + $0x3e4] sm:$0xf]  ;;  %v4725_v22 = vor.u32 %v6186_v7, %v4724_v6  ;;  %v4217_v27 = vor.u32 %v6056_v13, %v4214_v14 }
  0x34   :  { %1331 = vmatpush.bf16.msrb.mxu0 %v4773_v39  ;;  %v4710_v18 = vld [vmem:[%s9594_s2 + $0x3f0] sm:$0xf0]  ;;  %v6212_v19 = vld [vmem:[%s9594_s2 + $0x4e4] sm:$0xf]  ;;  %v4200_v23 = vld [vmem:[%s9595_s0 + $0x10] sm:$0xf]  ;;  %v4853_v26 = vor.u32 %v6218_v12, %v4852_v9  ;;  %v4585_v31 = vor.u32 %v6148_v15, %v4582_v16 }
  0x35   :  { %1345 = vmatpush.bf16.msrb.mxu1 %v4901_v42  ;;  %4994 = vmatmul.msk.bf16.vlgmr.msrb.gmra.mxu2 %vm1267_vm0, %v7007_v50  ;;  %v4838_v20 = vld [vmem:[%s9594_s2 + $0x4f0] sm:$0xf0]  ;;  %v6054_v24 = vld [vmem:[%s9595_s0 + $0x28] sm:$0xf0]  ;;  %v6088_v25 = vld [vmem:[%s9594_s2 + $0x104] sm:$0xf]  ;;  %v4713_v32 = vor.u32 %v6180_v17, %v4710_v18 }
  0x36   :  { %1386 = vmatpush.bf16.msra.mxu2 %v4409_v38  ;;  %v4342_v28 = vld [vmem:[%s9594_s2 + $0x110] sm:$0xf0]  ;;  %v4202_v30 = vld [vmem:[%s9595_s0 + $0x2c] sm:$0xf0]  ;;  %v6244_v33 = vld [vmem:[%s9594_s2 + $0x5e4] sm:$0xf]  ;;  %v4841_v36 = vor.u32 %v6212_v19, %v4838_v20  ;;  %v7104_v37 = vor.u32 %v6054_v24, %v4200_v23 }
  0x37   :  { %1373 = vmatpush.bf16.msrb.mxu3 %v4265_v43  ;;  %v6051_v29 = vld [vmem:[%s9595_s0 + $0x14] sm:$0xf]  ;;  %v6144_v35 = vld [vmem:[%s9594_s2 + $0x2c4] sm:$0xf]  ;;  %v4345_v41 = vor.u32 %v6088_v25, %v4342_v28 }
  0x38   :  { %1332 = vmatpush.bf16.msrb.mxu0 %v4757_v52  ;;  %v4966_v34 = vld [vmem:[%s9594_s2 + $0x5f0] sm:$0xf0]  ;;  %v6176_v39 = vld [vmem:[%s9594_s2 + $0x3c4] sm:$0xf]  ;;  %v7115_v42 = vor.u32 %v6051_v29, %v4202_v30 }
  0x39   :  { %1346 = vmatpush.bf16.msrb.mxu1 %v4885_v57  ;;  %v4566_v38 = vld [vmem:[%s9594_s2 + $0x2d0] sm:$0xf0]  ;;  %v6208_v43 = vld [vmem:[%s9594_s2 + $0x4c4] sm:$0xf]  ;;  %v4969_v45 = vor.u32 %v6244_v33, %v4966_v34 }
  0x3a   :  { %1387 = vmatpush.bf16.msra.mxu2 %v4393_v51  ;;  %v4694_v40 = vld [vmem:[%s9594_s2 + $0x3d0] sm:$0xf0]  ;;  %v4569_v46 = vor.u32 %v6144_v35, %v4566_v38  ;;  %v6240_v48 = vld [vmem:[%s9594_s2 + $0x5c4] sm:$0xf] }
  0x3b   :  { %1374 = vmatpush.bf16.msrb.mxu3 %v4249_v58  ;;  %v4822_v44 = vld [vmem:[%s9594_s2 + $0x4d0] sm:$0xf0]  ;;  %v4697_v47 = vor.u32 %v6176_v39, %v4694_v40  ;;  %v6140_v51 = vld [vmem:[%s9594_s2 + $0x2a4] sm:$0xf] }
  0x3c   :  { %1333 = vmatpush.bf16.msrb.mxu0 %v4741_v5  ;;  %v4950_v49 = vld [vmem:[%s9594_s2 + $0x5d0] sm:$0xf0]  ;;  %v4825_v52 = vor.u32 %v6208_v43, %v4822_v44  ;;  %v6172_v56 = vld [vmem:[%s9594_s2 + $0x3a4] sm:$0xf] }
  0x3d   :  { %1347 = vmatpush.bf16.msrb.mxu1 %v4869_v10  ;;  %v4550_v53 = vld [vmem:[%s9594_s2 + $0x2b0] sm:$0xf0]  ;;  %v6204_v58 = vld [vmem:[%s9594_s2 + $0x4a4] sm:$0xf]  ;;  %v4953_v61 = vor.u32 %v6240_v48, %v4950_v49 }
  0x3e   :  { %1388 = vmatpush.bf16.msra.mxu2 %v4377_v4  ;;  %v4678_v57 = vld [vmem:[%s9594_s2 + $0x3b0] sm:$0xf0]  ;;  %v4553_v62 = vor.u32 %v6140_v51, %v4550_v53  ;;  %v6236_v0 = vld [vmem:[%s9594_s2 + $0x5a4] sm:$0xf] }
  0x3f   :  { %1375 = vmatpush.bf16.msrb.mxu3 %v4233_v11  ;;  %v4806_v59 = vld [vmem:[%s9594_s2 + $0x4b0] sm:$0xf0]  ;;  %v4681_v63 = vor.u32 %v6172_v56, %v4678_v57  ;;  %v6136_v2 = vld [vmem:[%s9594_s2 + $0x284] sm:$0xf] }
  0x40   :  { %1334 = vmatpush.bf16.msrb.mxu0 %v4725_v22  ;;  %v4934_v1 = vld [vmem:[%s9594_s2 + $0x5b0] sm:$0xf0]  ;;  %v4809_v3 = vor.u32 %v6204_v58, %v4806_v59  ;;  %v6168_v5 = vld [vmem:[%s9594_s2 + $0x384] sm:$0xf] }
  0x41   :  { %1348 = vmatpush.bf16.msrb.mxu1 %v4853_v26  ;;  %v4534_v4 = vld [vmem:[%s9594_s2 + $0x290] sm:$0xf0]  ;;  %v6200_v7 = vld [vmem:[%s9594_s2 + $0x484] sm:$0xf]  ;;  %v4937_v10 = vor.u32 %v6236_v0, %v4934_v1  ;;  %v4332_v0 = vld [vmem:[%s9594_s2 + $0xe8] sm:$0xf] }
  0x42   :  { %1389 = vmatpush.bf16.msra.mxu2 %v4361_v21  ;;  %v4662_v6 = vld [vmem:[%s9594_s2 + $0x390] sm:$0xf0]  ;;  %v4537_v11 = vor.u32 %v6136_v2, %v4534_v4  ;;  %v6232_v13 = vld [vmem:[%s9594_s2 + $0x584] sm:$0xf]  ;;  %v6087_v1 = vld [vmem:[%s9594_s2 + $0xf4] sm:$0xf0] }
  0x43   :  { %1376 = vmatpush.bf16.msrb.mxu3 %v4217_v27  ;;  %1335 = vmatmul.bf16.vlgmr.msrb.gmra.mxu0 %v7104_v37  ;;  %v4790_v9 = vld [vmem:[%s9594_s2 + $0x490] sm:$0xf0]  ;;  %v4665_v12 = vor.u32 %v6168_v5, %v4662_v6  ;;  %v6132_v15 = vld [vmem:[%s9594_s2 + $0x264] sm:$0xf]  ;;  %v4460_v2 = vld [vmem:[%s9594_s2 + $0x1e8] sm:$0xf] }
  0x44   :  { %1397 = vmatpush.bf16.msra.mxu0 %v4585_v31  ;;  %1349 = vmatmul.bf16.vlgmr.msrb.gmra.mxu1 %v7115_v42  ;;  %v4918_v14 = vld [vmem:[%s9594_s2 + $0x590] sm:$0xf0]  ;;  %v4793_v16 = vor.u32 %v6200_v7, %v4790_v9  ;;  %v6164_v18 = vld [vmem:[%s9594_s2 + $0x364] sm:$0xf]  ;;  %v6119_v4 = vld [vmem:[%s9594_s2 + $0x1f4] sm:$0xf0] }
  0x45   :  { %1411 = vmatpush.bf16.msra.mxu1 %v4713_v32  ;;  %v4518_v17 = vld [vmem:[%s9594_s2 + $0x270] sm:$0xf0]  ;;  %v6196_v20 = vld [vmem:[%s9594_s2 + $0x464] sm:$0xf]  ;;  %v4921_v22 = vor.u32 %v6232_v13, %v4918_v14  ;;  %v4333_v13 = vor.u32 %v6087_v1, %v4332_v0  ;;  %v4588_v14 = vld [vmem:[%s9594_s2 + $0x2e8] sm:$0xf] }
  0x46   :  { %1390 = vmatpush.bf16.msra.mxu2 %v4345_v41  ;;  %1377 = vmatmul.bf16.vlgmr.msrb.gmra.mxu3 %v6880_v55  ;;  %v4646_v19 = vld [vmem:[%s9594_s2 + $0x370] sm:$0xf0]  ;;  %v4521_v23 = vor.u32 %v6132_v15, %v4518_v17  ;;  %v6228_v25 = vld [vmem:[%s9594_s2 + $0x564] sm:$0xf]  ;;  %v6151_v15 = vld [vmem:[%s9594_s2 + $0x2f4] sm:$0xf0]  ;;  %v4461_v17 = vor.u32 %v6119_v4, %v4460_v2 }
  0x47   :  { %1425 = vmatpush.bf16.msra.mxu3 %v4841_v36  ;;  %v4774_v21 = vld [vmem:[%s9594_s2 + $0x470] sm:$0xf0]  ;;  %v4649_v24 = vor.u32 %v6164_v18, %v4646_v19  ;;  %v6128_v27 = vld [vmem:[%s9594_s2 + $0x244] sm:$0xf]  ;;  %v6183_v19 = vld [vmem:[%s9594_s2 + $0x3f4] sm:$0xf0] }
  0x48   :  { %1398 = vmatpush.bf16.msra.mxu0 %v4569_v46  ;;  %v4902_v26 = vld [vmem:[%s9594_s2 + $0x570] sm:$0xf0]  ;;  %v4777_v28 = vor.u32 %v6196_v20, %v4774_v21  ;;  %v6160_v30 = vld [vmem:[%s9594_s2 + $0x344] sm:$0xf]  ;;  %v4316_v20 = vld [vmem:[%s9594_s2 + $0xc8] sm:$0xf] }
  0x49   :  { %1412 = vmatpush.bf16.msra.mxu1 %v4697_v47  ;;  %1391 = vmatmul.bf16.vlgmr.msra.gmra.mxu2 %v6916_v8  ;;  %v4502_v29 = vld [vmem:[%s9594_s2 + $0x250] sm:$0xf0]  ;;  %v6192_v32 = vld [vmem:[%s9594_s2 + $0x444] sm:$0xf]  ;;  %v4905_v34 = vor.u32 %v6228_v25, %v4902_v26  ;;  %v6083_v21 = vld [vmem:[%s9594_s2 + $0xd4] sm:$0xf0]  ;;  %v4589_v25 = vor.u32 %v6151_v15, %v4588_v14 }
  0x4a   :  { %1439 = vmatpush.bf16.msrb.mxu2 %v4969_v45  ;;  %v4630_v31 = vld [vmem:[%s9594_s2 + $0x350] sm:$0xf0]  ;;  %v4505_v35 = vor.u32 %v6128_v27, %v4502_v29  ;;  %v6224_v38 = vld [vmem:[%s9594_s2 + $0x544] sm:$0xf]  ;;  %v4317_v27 = vor.u32 %v6083_v21, %v4316_v20  ;;  %v6147_v29 = vld [vmem:[%s9594_s2 + $0x2d4] sm:$0xf0] }
  0x4b   :  { %1426 = vmatpush.bf16.msra.mxu3 %v4825_v52  ;;  %v4758_v33 = vld [vmem:[%s9594_s2 + $0x450] sm:$0xf0]  ;;  %v4633_v36 = vor.u32 %v6160_v30, %v4630_v31  ;;  %v6124_v40 = vld [vmem:[%s9594_s2 + $0x224] sm:$0xf]  ;;  %v4700_v30 = vld [vmem:[%s9594_s2 + $0x3c8] sm:$0xf] }
  0x4c   :  { %1399 = vmatpush.bf16.msra.mxu0 %v4553_v62  ;;  %v4886_v39 = vld [vmem:[%s9594_s2 + $0x550] sm:$0xf0]  ;;  %v4761_v41 = vor.u32 %v6192_v32, %v4758_v33  ;;  %v6156_v44 = vld [vmem:[%s9594_s2 + $0x324] sm:$0xf]  ;;  %v6179_v32 = vld [vmem:[%s9594_s2 + $0x3d4] sm:$0xf0] }
  0x4d   :  { %1413 = vmatpush.bf16.msra.mxu1 %v4681_v63  ;;  %v4486_v43 = vld [vmem:[%s9594_s2 + $0x230] sm:$0xf0]  ;;  %v6188_v46 = vld [vmem:[%s9594_s2 + $0x424] sm:$0xf]  ;;  %v4889_v48 = vor.u32 %v6224_v38, %v4886_v39  ;;  %v4300_v33 = vld [vmem:[%s9594_s2 + $0xa8] sm:$0xf]  ;;  %v4701_v39 = vor.u32 %v6179_v32, %v4700_v30 }
  0x4e   :  { %1440 = vmatpush.bf16.msrb.mxu2 %v4953_v61  ;;  %v4614_v45 = vld [vmem:[%s9594_s2 + $0x330] sm:$0xf0]  ;;  %v6220_v49 = vld [vmem:[%s9594_s2 + $0x524] sm:$0xf]  ;;  %v4489_v52 = vor.u32 %v6124_v40, %v4486_v43  ;;  %v6143_v43 = vld [vmem:[%s9594_s2 + $0x2b4] sm:$0xf0] }
  0x4f   :  { %1427 = vmatpush.bf16.msra.mxu3 %v4809_v3  ;;  %v4742_v47 = vld [vmem:[%s9594_s2 + $0x430] sm:$0xf0]  ;;  %v4617_v53 = vor.u32 %v6156_v44, %v4614_v45  ;;  %v6120_v56 = vld [vmem:[%s9594_s2 + $0x204] sm:$0xf]  ;;  %v4684_v44 = vld [vmem:[%s9594_s2 + $0x3a8] sm:$0xf] }
  0x50   :  { %1400 = vmatpush.bf16.msra.mxu0 %v4537_v11  ;;  %v4870_v51 = vld [vmem:[%s9594_s2 + $0x530] sm:$0xf0]  ;;  %v6152_v58 = vld [vmem:[%s9594_s2 + $0x304] sm:$0xf]  ;;  %v4745_v59 = vor.u32 %v6188_v46, %v4742_v47  ;;  %v6175_v46 = vld [vmem:[%s9594_s2 + $0x3b4] sm:$0xf0] }
  0x51   :  { %1414 = vmatpush.bf16.msra.mxu1 %v4665_v12  ;;  %v4470_v57 = vld [vmem:[%s9594_s2 + $0x210] sm:$0xf0]  ;;  %v6184_v62 = vld [vmem:[%s9594_s2 + $0x404] sm:$0xf]  ;;  %v4873_v3 = vor.u32 %v6220_v49, %v4870_v51  ;;  %v4284_v47 = vld [vmem:[%s9594_s2 + $0x88] sm:$0xf] }
  0x52   :  { %1441 = vmatpush.bf16.msrb.mxu2 %v4937_v10  ;;  %v4598_v61 = vld [vmem:[%s9594_s2 + $0x310] sm:$0xf0]  ;;  %v6248_v5 = vld [vmem:[%s9594_s2 + $0x604] sm:$0xf]  ;;  %v4473_v7 = vor.u32 %v6120_v56, %v4470_v57  ;;  %v4412_v49 = vld [vmem:[%s9594_s2 + $0x188] sm:$0xf] }
  0x53   :  { %1428 = vmatpush.bf16.msra.mxu3 %v4793_v16  ;;  %v4726_v63 = vld [vmem:[%s9594_s2 + $0x410] sm:$0xf0]  ;;  %v4601_v9 = vor.u32 %v6152_v58, %v4598_v61  ;;  %v6216_v10 = vld [vmem:[%s9594_s2 + $0x504] sm:$0xf]  ;;  %v4716_v16 = vld [vmem:[%s9594_s2 + $0x3e8] sm:$0xf] }
  0x54   :  { %1401 = vmatpush.bf16.msra.mxu0 %v4521_v23  ;;  %v4982_v6 = vld [vmem:[%s9594_s2 + $0x610] sm:$0xf0]  ;;  %v4729_v12 = vor.u32 %v6184_v62, %v4726_v63  ;;  %v4444_v23 = vld [vmem:[%s9594_s2 + $0x1c8] sm:$0xf]  ;;  %v4717_v26 = vor.u32 %v6183_v19, %v4716_v16  ;;  %v6107_v51 = vld [vmem:[%s9594_s2 + $0x194] sm:$0xf0] }
  0x55   :  { %1415 = vmatpush.bf16.msra.mxu1 %v4649_v24  ;;  %v4854_v11 = vld [vmem:[%s9594_s2 + $0x510] sm:$0xf0]  ;;  %v4985_v18 = vor.u32 %v6248_v5, %v4982_v6  ;;  %v6115_v24 = vld [vmem:[%s9594_s2 + $0x1d4] sm:$0xf0]  ;;  %v4540_v57 = vld [vmem:[%s9594_s2 + $0x288] sm:$0xf]  ;;  %v4413_v61 = vor.u32 %v6107_v51, %v4412_v49 }
  0x56   :  { %1442 = vmatpush.bf16.msrb.mxu2 %v4921_v22  ;;  %v4857_v22 = vor.u32 %v6216_v10, %v4854_v11  ;;  %v4445_v31 = vor.u32 %v6115_v24, %v4444_v23  ;;  %v6139_v58 = vld [vmem:[%s9594_s2 + $0x294] sm:$0xf0]  ;;  %v4268_v63 = vld [vmem:[%s9594_s2 + $0x68] sm:$0xf] }
  0x57   :  { %1429 = vmatpush.bf16.msra.mxu3 %v4777_v28  ;;  %v4572_v28 = vld [vmem:[%s9594_s2 + $0x2c8] sm:$0xf]  ;;  %v6171_v62 = vld [vmem:[%s9594_s2 + $0x394] sm:$0xf0] }
  0x58   :  { %1402 = vmatpush.bf16.msra.mxu0 %v4505_v35  ;;  %v4428_v35 = vld [vmem:[%s9594_s2 + $0x1a8] sm:$0xf]  ;;  %v4573_v38 = vor.u32 %v6147_v29, %v4572_v28  ;;  %v6071_v0 = vld [vmem:[%s9594_s2 + $0x74] sm:$0xf0] }
  0x59   :  { %1416 = vmatpush.bf16.msra.mxu1 %v4633_v36  ;;  %v6111_v36 = vld [vmem:[%s9594_s2 + $0x1b4] sm:$0xf0]  ;;  %v4396_v1 = vld [vmem:[%s9594_s2 + $0x168] sm:$0xf]  ;;  %v4269_v5 = vor.u32 %v6071_v0, %v4268_v63 }
  0x5a   :  { %1443 = vmatpush.bf16.msrb.mxu2 %v4905_v34  ;;  %v6079_v34 = vld [vmem:[%s9594_s2 + $0xb4] sm:$0xf0]  ;;  %v4429_v45 = vor.u32 %v6111_v36, %v4428_v35  ;;  %v4524_v6 = vld [vmem:[%s9594_s2 + $0x268] sm:$0xf] }
  0x5b   :  { %1430 = vmatpush.bf16.msra.mxu3 %v4761_v41  ;;  %v4301_v40 = vor.u32 %v6079_v34, %v4300_v33  ;;  %v4556_v41 = vld [vmem:[%s9594_s2 + $0x2a8] sm:$0xf]  ;;  %v6103_v2 = vld [vmem:[%s9594_s2 + $0x174] sm:$0xf0] }
  0x5c   :  { %1403 = vmatpush.bf16.msra.mxu0 %v4489_v52  ;;  %v4557_v52 = vor.u32 %v6143_v43, %v4556_v41  ;;  %v4397_v10 = vor.u32 %v6103_v2, %v4396_v1  ;;  %v6167_v11 = vld [vmem:[%s9594_s2 + $0x374] sm:$0xf0]  ;;  %v4380_v14 = vld [vmem:[%s9594_s2 + $0x148] sm:$0xf] }
  0x5d   :  { %1417 = vmatpush.bf16.msra.mxu1 %v4617_v53  ;;  %v4685_v53 = vor.u32 %v6175_v46, %v4684_v44  ;;  %v6099_v15 = vld [vmem:[%s9594_s2 + $0x154] sm:$0xf0]  ;;  %v4508_v19 = vld [vmem:[%s9594_s2 + $0x248] sm:$0xf] }
  0x5e   :  { %1444 = vmatpush.bf16.msrb.mxu2 %v4889_v48  ;;  %v6075_v48 = vld [vmem:[%s9594_s2 + $0x94] sm:$0xf0]  ;;  %v4636_v21 = vld [vmem:[%s9594_s2 + $0x348] sm:$0xf] }
  0x5f   :  { %1431 = vmatpush.bf16.msra.mxu3 %v4745_v59  ;;  %v4285_v56 = vor.u32 %v6075_v48, %v4284_v47  ;;  %v4668_v59 = vld [vmem:[%s9594_s2 + $0x388] sm:$0xf]  ;;  %v6131_v20 = vld [vmem:[%s9594_s2 + $0x254] sm:$0xf0] }
  0x60   :  { %1404 = vmatpush.bf16.msra.mxu0 %v4473_v7  ;;  %v4669_v4 = vor.u32 %v6171_v62, %v4668_v59  ;;  %v6135_v7 = vld [vmem:[%s9594_s2 + $0x274] sm:$0xf0]  ;;  %v4236_v24 = vld [vmem:[%s9594_s2 + $0x28] sm:$0xf]  ;;  %v4509_v28 = vor.u32 %v6131_v20, %v4508_v19  ;;  %v4334_v59 = vld [vmem:[%s9594_s2 + $0xf8] sm:$0xf0] }
  0x61   :  { %1418 = vmatpush.bf16.msra.mxu1 %v4601_v9  ;;  %v4652_v9 = vld [vmem:[%s9594_s2 + $0x368] sm:$0xf]  ;;  %v4525_v16 = vor.u32 %v6135_v7, %v4524_v6  ;;  %v6163_v23 = vld [vmem:[%s9594_s2 + $0x354] sm:$0xf0] }
  0x62   :  { %1445 = vmatpush.bf16.msrb.mxu2 %v4873_v3  ;;  %v4541_v3 = vor.u32 %v6139_v58, %v4540_v57  ;;  %v4492_v29 = vld [vmem:[%s9594_s2 + $0x228] sm:$0xf]  ;;  %v4637_v30 = vor.u32 %v6163_v23, %v4636_v21  ;;  %v6127_v32 = vld [vmem:[%s9594_s2 + $0x234] sm:$0xf0]  ;;  %v6085_v58 = vld [vmem:[%s9594_s2 + $0xec] sm:$0xf] }
  0x63   :  { %1432 = vmatpush.bf16.msra.mxu3 %v4729_v12  ;;  %1405 = vmatmul.bf16.vlgmr.msra.gmra.mxu0 %v6878_v54  ;;  %v4252_v12 = vld [vmem:[%s9594_s2 + $0x48] sm:$0xf]  ;;  %v6159_v34 = vld [vmem:[%s9594_s2 + $0x334] sm:$0xf0]  ;;  %v4493_v44 = vor.u32 %v6127_v32, %v4492_v29  ;;  %v4337_v6 = vor.u32 %v6085_v58, %v4334_v59  ;;  %v4446_v23 = vld [vmem:[%s9594_s2 + $0x1d8] sm:$0xf0] }
  0x64   :  { %1460 = vmatpush.bf16.msrb.mxu0 %v4985_v18  ;;  %1419 = vmatmul.bf16.vlgmr.msra.gmra.mxu1 %v6891_v60  ;;  %v4620_v33 = vld [vmem:[%s9594_s2 + $0x328] sm:$0xf]  ;;  %v6215_v43 = vld [vmem:[%s9594_s2 + $0x4f4] sm:$0xf0] }
  0x65   :  { %1467 = vmatpush.bf16.msrb.mxu1 %v4333_v13  ;;  %v6067_v13 = vld [vmem:[%s9594_s2 + $0x54] sm:$0xf0]  ;;  %v4220_v36 = vld [vmem:[%s9594_s2 + $0x8] sm:$0xf]  ;;  %v4621_v47 = vor.u32 %v6159_v34, %v4620_v33  ;;  %v6109_v34 = vld [vmem:[%s9594_s2 + $0x1ac] sm:$0xf] }
  0x66   :  { %1446 = vmatpush.bf16.msrb.mxu2 %v4857_v22  ;;  %1433 = vmatmul.bf16.vlgmr.msra.gmra.mxu3 %v7104_v37  ;;  %v4253_v18 = vor.u32 %v6067_v13, %v4252_v12  ;;  %v4381_v22 = vor.u32 %v6099_v15, %v4380_v14  ;;  %v4844_v41 = vld [vmem:[%s9594_s2 + $0x4e8] sm:$0xf]  ;;  %v6247_v46 = vld [vmem:[%s9594_s2 + $0x5f4] sm:$0xf0]  ;;  %v4318_v14 = vld [vmem:[%s9594_s2 + $0xd8] sm:$0xf0] }
  0x67   :  { %1481 = vmatpush.bf16.msrb.mxu3 %v4461_v17  ;;  %v4653_v17 = vor.u32 %v6167_v11, %v4652_v9  ;;  %v4476_v49 = vld [vmem:[%s9594_s2 + $0x208] sm:$0xf]  ;;  %v6123_v51 = vld [vmem:[%s9594_s2 + $0x214] sm:$0xf0]  ;;  %v6117_v9 = vld [vmem:[%s9594_s2 + $0x1ec] sm:$0xf] }
  0x68   :  { %1495 = vmatpush.bf16.msra.mxu0 %v4589_v25  ;;  %v6063_v25 = vld [vmem:[%s9594_s2 + $0x34] sm:$0xf0]  ;;  %v4828_v62 = vld [vmem:[%s9594_s2 + $0x4c8] sm:$0xf]  ;;  %v4477_v1 = vor.u32 %v6123_v51, %v4476_v49  ;;  %v6081_v11 = vld [vmem:[%s9594_s2 + $0xcc] sm:$0xf] }
  0x69   :  { %1468 = vmatpush.bf16.msrb.mxu1 %v4317_v27  ;;  %1447 = vmatmul.bf16.vlgmr.msrb.gmra.mxu2 %v7115_v42  ;;  %v6095_v27 = vld [vmem:[%s9594_s2 + $0x134] sm:$0xf0]  ;;  %v4956_v0 = vld [vmem:[%s9594_s2 + $0x5c8] sm:$0xf]  ;;  %v4321_v20 = vor.u32 %v6081_v11, %v4318_v14  ;;  %v4414_v49 = vld [vmem:[%s9594_s2 + $0x198] sm:$0xf0] }
  0x6a   :  { %1509 = vmatpush.bf16.msra.mxu2 %v4717_v26  ;;  %v4364_v26 = vld [vmem:[%s9594_s2 + $0x128] sm:$0xf]  ;;  %v6155_v57 = vld [vmem:[%s9594_s2 + $0x314] sm:$0xf0]  ;;  %v6069_v51 = vld [vmem:[%s9594_s2 + $0x6c] sm:$0xf] }
  0x6b   :  { %1482 = vmatpush.bf16.msrb.mxu3 %v4445_v31  ;;  %v4237_v31 = vor.u32 %v6063_v25, %v4236_v24  ;;  %v4365_v35 = vor.u32 %v6095_v27, %v4364_v26  ;;  %v6211_v63 = vld [vmem:[%s9594_s2 + $0x4d4] sm:$0xf0]  ;;  %v4812_v15 = vld [vmem:[%s9594_s2 + $0x4a8] sm:$0xf]  ;;  %v6077_v24 = vld [vmem:[%s9594_s2 + $0xac] sm:$0xf] }
  0x6c   :  { %1496 = vmatpush.bf16.msra.mxu0 %v4573_v38  ;;  %v6059_v38 = vld [vmem:[%s9594_s2 + $0x14] sm:$0xf0]  ;;  %v4829_v7 = vor.u32 %v6211_v63, %v4828_v62  ;;  %v4302_v26 = vld [vmem:[%s9594_s2 + $0xb8] sm:$0xf0]  ;;  %v4796_v27 = vld [vmem:[%s9594_s2 + $0x488] sm:$0xf] }
  0x6d   :  { %1469 = vmatpush.bf16.msrb.mxu1 %v4301_v40  ;;  %v6091_v40 = vld [vmem:[%s9594_s2 + $0x114] sm:$0xf0]  ;;  %v4221_v48 = vor.u32 %v6059_v38, %v4220_v36  ;;  %v4924_v29 = vld [vmem:[%s9594_s2 + $0x588] sm:$0xf]  ;;  %v4305_v32 = vor.u32 %v6077_v24, %v4302_v26  ;;  %v6073_v36 = vld [vmem:[%s9594_s2 + $0x8c] sm:$0xf] }
  0x6e   :  { %1510 = vmatpush.bf16.msra.mxu2 %v4701_v39  ;;  %v4348_v39 = vld [vmem:[%s9594_s2 + $0x108] sm:$0xf]  ;;  %v6243_v2 = vld [vmem:[%s9594_s2 + $0x5d4] sm:$0xf0]  ;;  %v6097_v11 = vld [vmem:[%s9594_s2 + $0x14c] sm:$0xf] }
  0x6f   :  { %1483 = vmatpush.bf16.msrb.mxu3 %v4429_v45  ;;  %v4972_v45 = vld [vmem:[%s9594_s2 + $0x5e8] sm:$0xf]  ;;  %v4957_v12 = vor.u32 %v6243_v2, %v4956_v0  ;;  %v6227_v59 = vld [vmem:[%s9594_s2 + $0x554] sm:$0xf0]  ;;  %v6101_v0 = vld [vmem:[%s9594_s2 + $0x16c] sm:$0xf] }
  0x70   :  { %1497 = vmatpush.bf16.msra.mxu0 %v4557_v52  ;;  %v4604_v52 = vld [vmem:[%s9594_s2 + $0x308] sm:$0xf]  ;;  %v6065_v2 = vld [vmem:[%s9594_s2 + $0x4c] sm:$0xf]  ;;  %v4382_v14 = vld [vmem:[%s9594_s2 + $0x158] sm:$0xf0] }
  0x71   :  { %1470 = vmatpush.bf16.msrb.mxu1 %v4285_v56  ;;  %v4845_v56 = vor.u32 %v6215_v43, %v4844_v41  ;;  %v6199_v41 = vld [vmem:[%s9594_s2 + $0x474] sm:$0xf0]  ;;  %v4908_v43 = vld [vmem:[%s9594_s2 + $0x568] sm:$0xf]  ;;  %v4385_v24 = vor.u32 %v6097_v11, %v4382_v14  ;;  %v4718_v26 = vld [vmem:[%s9594_s2 + $0x3f8] sm:$0xf0] }
  0x72   :  { %1511 = vmatpush.bf16.msra.mxu2 %v4685_v53  ;;  %v4349_v53 = vor.u32 %v6091_v40, %v4348_v39  ;;  %v4286_v39 = vld [vmem:[%s9594_s2 + $0x98] sm:$0xf0]  ;;  %v4780_v40 = vld [vmem:[%s9594_s2 + $0x468] sm:$0xf]  ;;  %v6169_v11 = vld [vmem:[%s9594_s2 + $0x38c] sm:$0xf] }
  0x73   :  { %1484 = vmatpush.bf16.msrb.mxu3 %v4413_v61  ;;  %4995 = vmatmul.msk.bf16.vlgmr.msrb.gmra.mxu0 %vm1267_vm0, %v7007_v50  ;;  %v4973_v61 = vor.u32 %v6247_v46, %v4972_v45  ;;  %v4289_v46 = vor.u32 %v6073_v36, %v4286_v39  ;;  %v4892_v58 = vld [vmem:[%s9594_s2 + $0x548] sm:$0xf]  ;;  %v6145_v39 = vld [vmem:[%s9594_s2 + $0x2cc] sm:$0xf] }
  0x74   :  { %1498 = vmatpush.bf16.msra.mxu0 %v4541_v3  ;;  %v4988_v3 = vld [vmem:[%s9594_s2 + $0x608] sm:$0xf] }
  0x75   :  { %1471 = vmatpush.bf16.msrb.mxu1 %v4269_v5  ;;  %v4605_v5 = vor.u32 %v6155_v57, %v4604_v52  ;;  %v6195_v57 = vld [vmem:[%s9594_s2 + $0x454] sm:$0xf0] }
  0x76   :  { %1512 = vmatpush.bf16.msra.mxu2 %v4669_v4  ;;  %v6251_v4 = vld [vmem:[%s9594_s2 + $0x614] sm:$0xf0] }
  0x77   :  { %1485 = vmatpush.bf16.msrb.mxu3 %v4397_v10  ;;  %v4462_v10 = vld [vmem:[%s9594_s2 + $0x1f8] sm:$0xf0]  ;;  %v4989_v13 = vor.u32 %v6251_v4, %v4988_v3  ;;  %v4893_v3 = vor.u32 %v6227_v59, %v4892_v58  ;;  %v6141_v58 = vld [vmem:[%s9594_s2 + $0x2ac] sm:$0xf] }
  0x78   :  { %1499 = vmatpush.bf16.msra.mxu0 %v4525_v16  ;;  %v6207_v16 = vld [vmem:[%s9594_s2 + $0x4b4] sm:$0xf0]  ;;  %v4465_v19 = vor.u32 %v6117_v9, %v4462_v10  ;;  %v4254_v4 = vld [vmem:[%s9594_s2 + $0x58] sm:$0xf0] }
  0x79   :  { %1472 = vmatpush.bf16.msrb.mxu1 %v4253_v18  ;;  %v6239_v18 = vld [vmem:[%s9594_s2 + $0x5b4] sm:$0xf0]  ;;  %v4813_v21 = vor.u32 %v6207_v16, %v4812_v15  ;;  %v6061_v15 = vld [vmem:[%s9594_s2 + $0x2c] sm:$0xf]  ;;  %v4238_v16 = vld [vmem:[%s9594_s2 + $0x38] sm:$0xf0] }
  0x7a   :  { %1513 = vmatpush.bf16.msra.mxu2 %v4653_v17  ;;  %v4940_v17 = vld [vmem:[%s9594_s2 + $0x5a8] sm:$0xf]  ;;  %v6223_v9 = vld [vmem:[%s9594_s2 + $0x534] sm:$0xf0]  ;;  %v4558_v59 = vld [vmem:[%s9594_s2 + $0x2b8] sm:$0xf0] }
  0x7b   :  { %1486 = vmatpush.bf16.msrb.mxu3 %v4381_v22  ;;  %v6113_v22 = vld [vmem:[%s9594_s2 + $0x1cc] sm:$0xf]  ;;  %v4941_v25 = vor.u32 %v6239_v18, %v4940_v17  ;;  %v4732_v18 = vld [vmem:[%s9594_s2 + $0x408] sm:$0xf] }
  0x7c   :  { %1500 = vmatpush.bf16.msra.mxu0 %v4509_v28  ;;  %v6203_v28 = vld [vmem:[%s9594_s2 + $0x494] sm:$0xf0] }
  0x7d   :  { %1473 = vmatpush.bf16.msrb.mxu1 %v4237_v31  ;;  %v4449_v31 = vor.u32 %v6113_v22, %v4446_v23  ;;  %v4797_v33 = vor.u32 %v6203_v28, %v4796_v27  ;;  %v6149_v22 = vld [vmem:[%s9594_s2 + $0x2ec] sm:$0xf]  ;;  %v4590_v23 = vld [vmem:[%s9594_s2 + $0x2f8] sm:$0xf0]  ;;  %v4241_v27 = vor.u32 %v6061_v15, %v4238_v16 }
  0x7e   :  { %1514 = vmatpush.bf16.msra.mxu2 %v4637_v30  ;;  %v6235_v30 = vld [vmem:[%s9594_s2 + $0x594] sm:$0xf0]  ;;  %v6237_v16 = vld [vmem:[%s9594_s2 + $0x5ac] sm:$0xf] }
  0x7f   :  { %1487 = vmatpush.bf16.msrb.mxu3 %v4365_v35  ;;  %v4430_v35 = vld [vmem:[%s9594_s2 + $0x1b8] sm:$0xf0]  ;;  %v4925_v38 = vor.u32 %v6235_v30, %v4924_v29  ;;  %v6093_v29 = vld [vmem:[%s9594_s2 + $0x12c] sm:$0xf] }
  0x80   :  { %1501 = vmatpush.bf16.msra.mxu0 %v4493_v44  ;;  %v6231_v44 = vld [vmem:[%s9594_s2 + $0x574] sm:$0xf0]  ;;  %v4433_v45 = vor.u32 %v6109_v34, %v4430_v35  ;;  %v4366_v30 = vld [vmem:[%s9594_s2 + $0x138] sm:$0xf0]  ;;  %v6213_v35 = vld [vmem:[%s9594_s2 + $0x4ec] sm:$0xf] }
  0x81   :  { %1474 = vmatpush.bf16.msrb.mxu1 %v4221_v48  ;;  %v6105_v48 = vld [vmem:[%s9594_s2 + $0x18c] sm:$0xf]  ;;  %v4909_v52 = vor.u32 %v6231_v44, %v4908_v43  ;;  %v4222_v34 = vld [vmem:[%s9594_s2 + $0x18] sm:$0xf0] }
  0x82   :  { %1515 = vmatpush.bf16.msra.mxu2 %v4621_v47  ;;  %v4781_v47 = vor.u32 %v6199_v41, %v4780_v40  ;;  %v4574_v40 = vld [vmem:[%s9594_s2 + $0x2d8] sm:$0xf0]  ;;  %v4369_v41 = vor.u32 %v6093_v29, %v4366_v30  ;;  %v6177_v43 = vld [vmem:[%s9594_s2 + $0x3cc] sm:$0xf] }
  0x83   :  { %1488 = vmatpush.bf16.msrb.mxu3 %v4349_v53  ;;  %v4270_v53 = vld [vmem:[%s9594_s2 + $0x78] sm:$0xf0] }
  0x84   :  { %1502 = vmatpush.bf16.msra.mxu0 %v4477_v1  ;;  %1475 = vmatmul.bf16.vlgmr.msrb.gmra.mxu1 %v6880_v55  ;;  %v4273_v62 = vor.u32 %v6069_v51, %v4270_v53  ;;  %v4398_v1 = vld [vmem:[%s9594_s2 + $0x178] sm:$0xf0]  ;;  %v6245_v51 = vld [vmem:[%s9594_s2 + $0x5ec] sm:$0xf] }
  0x85   :  { %1523 = vmatpush.bf16.msra.mxu1 %v4845_v56  ;;  %v4764_v56 = vld [vmem:[%s9594_s2 + $0x448] sm:$0xf]  ;;  %v4401_v10 = vor.u32 %v6101_v0, %v4398_v1  ;;  %v4702_v44 = vld [vmem:[%s9594_s2 + $0x3d8] sm:$0xf0]  ;;  %v6209_v53 = vld [vmem:[%s9594_s2 + $0x4cc] sm:$0xf] }
  0x86   :  { %1489 = vmatmul.bf16.vlgmr.msrb.gmra.mxu3 %v6916_v8  ;;  %1516 = vmatpush.bf16.msra.mxu2 %v4605_v5  ;;  %v4765_v63 = vor.u32 %v6195_v57, %v4764_v56  ;;  %v4748_v5 = vld [vmem:[%s9594_s2 + $0x428] sm:$0xf]  ;;  %v4705_v56 = vor.u32 %v6177_v43, %v4702_v44  ;;  %v4830_v57 = vld [vmem:[%s9594_s2 + $0x4d8] sm:$0xf0] }
  0x87   :  { %1537 = vmatpush.bf16.msra.mxu3 %v4973_v61  ;;  %1503 = vmatmul.bf16.vlgmr.msra.gmra.mxu0 %v6878_v54  ;;  %v4417_v61 = vor.u32 %v6105_v48, %v4414_v49  ;;  %v4577_v49 = vor.u32 %v6145_v39, %v4574_v40  ;;  %v4833_v1 = vor.u32 %v6209_v53, %v4830_v57  ;;  %v4782_v30 = vld [vmem:[%s9594_s2 + $0x478] sm:$0xf0]  ;;  %v6229_v39 = vld [vmem:[%s9594_s2 + $0x56c] sm:$0xf] }
  0x88   :  { %1558 = vmatpush.bf16.msrb.mxu0 %v4989_v13  ;;  %v4910_v40 = vld [vmem:[%s9594_s2 + $0x578] sm:$0xf0] }
  0x89   :  { %1524 = vmatpush.bf16.msra.mxu1 %v4829_v7  ;;  %1517 = vmatmul.bf16.vlgmr.msra.gmra.mxu2 %v6891_v60  ;;  %v4876_v7 = vld [vmem:[%s9594_s2 + $0x528] sm:$0xf]  ;;  %v4766_v44 = vld [vmem:[%s9594_s2 + $0x458] sm:$0xf0] }
  0x8a   :  { %1565 = vmatpush.bf16.msrb.mxu2 %v4337_v6  ;;  %v6191_v6 = vld [vmem:[%s9594_s2 + $0x434] sm:$0xf0]  ;;  %v4877_v17 = vor.u32 %v6223_v9, %v4876_v7  ;;  %v4814_v7 = vld [vmem:[%s9594_s2 + $0x4b8] sm:$0xf0]  ;;  %v6137_v9 = vld [vmem:[%s9594_s2 + $0x28c] sm:$0xf] }
  0x8b   :  { %1538 = vmatpush.bf16.msra.mxu3 %v4957_v12  ;;  %v4257_v12 = vor.u32 %v6065_v2, %v4254_v4  ;;  %v4749_v13 = vor.u32 %v6191_v6, %v4748_v5  ;;  %v4561_v2 = vor.u32 %v6141_v58, %v4558_v59  ;;  %v4958_v4 = vld [vmem:[%s9594_s2 + $0x5d8] sm:$0xf0]  ;;  %v6205_v5 = vld [vmem:[%s9594_s2 + $0x4ac] sm:$0xf] }
  0x8c   :  { %1579 = vmatpush.bf16.msra.mxu0 %v4465_v19  ;;  %v6187_v19 = vld [vmem:[%s9594_s2 + $0x414] sm:$0xf0]  ;;  %v4817_v14 = vor.u32 %v6205_v5, %v4814_v7  ;;  %v4894_v57 = vld [vmem:[%s9594_s2 + $0x558] sm:$0xf0]  ;;  %v6189_v58 = vld [vmem:[%s9594_s2 + $0x42c] sm:$0xf] }
  0x8d   :  { %1525 = vmatpush.bf16.msra.mxu1 %v4813_v21  ;;  %v6219_v21 = vld [vmem:[%s9594_s2 + $0x514] sm:$0xf0]  ;;  %v4733_v28 = vor.u32 %v6187_v19, %v4732_v18  ;;  %v6201_v18 = vld [vmem:[%s9594_s2 + $0x48c] sm:$0xf]  ;;  %v4798_v19 = vld [vmem:[%s9594_s2 + $0x498] sm:$0xf0] }
  0x8e   :  { %1566 = vmatpush.bf16.msrb.mxu2 %v4321_v20  ;;  %v4860_v20 = vld [vmem:[%s9594_s2 + $0x508] sm:$0xf]  ;;  %v4750_v59 = vld [vmem:[%s9594_s2 + $0x438] sm:$0xf0] }
  0x8f   :  { %1539 = vmatpush.bf16.msra.mxu3 %v4941_v25  ;;  %v6181_v25 = vld [vmem:[%s9594_s2 + $0x3ec] sm:$0xf]  ;;  %v4990_v5 = vld [vmem:[%s9594_s2 + $0x618] sm:$0xf0] }
  0x90   :  { %1580 = vmatpush.bf16.msra.mxu0 %v4449_v31  ;;  %v4861_v31 = vor.u32 %v6219_v21, %v4860_v20  ;;  %v4721_v36 = vor.u32 %v6181_v25, %v4718_v26  ;;  %v6133_v20 = vld [vmem:[%s9594_s2 + $0x26c] sm:$0xf]  ;;  %v4526_v21 = vld [vmem:[%s9594_s2 + $0x278] sm:$0xf0]  ;;  %v4801_v25 = vor.u32 %v6201_v18, %v4798_v19 }
  0x91   :  { %1526 = vmatpush.bf16.msra.mxu1 %v4797_v33  ;;  %v6057_v33 = vld [vmem:[%s9594_s2 + $0xc] sm:$0xf]  ;;  %v4529_v26 = vor.u32 %v6133_v20, %v4526_v21  ;;  %v4734_v18 = vld [vmem:[%s9594_s2 + $0x418] sm:$0xf0]  ;;  %v5048_v21 = vld [vmem:[%s9597_s4 + $0x60] sm:$0xf] }
  0x92   :  { %1567 = vmatpush.bf16.msrb.mxu2 %v4305_v32  ;;  %v4593_v32 = vor.u32 %v6149_v22, %v4590_v23  ;;  %v6165_v22 = vld [vmem:[%s9594_s2 + $0x36c] sm:$0xf]  ;;  %v4654_v23 = vld [vmem:[%s9594_s2 + $0x378] sm:$0xf0] }
  0x93   :  { %1540 = vmatpush.bf16.msra.mxu3 %v4925_v38  ;;  %v4846_v38 = vld [vmem:[%s9594_s2 + $0x4f8] sm:$0xf0]  ;;  %v4657_v29 = vor.u32 %v6165_v22, %v4654_v23  ;;  %v6265_v22 = vld [vmem:[%s9597_s4 + $0x64] sm:$0xf0] }
  0x94   :  { %1581 = vmatpush.bf16.msra.mxu0 %v4433_v45  ;;  %v4225_v45 = vor.u32 %v6057_v33, %v4222_v34  ;;  %v4849_v48 = vor.u32 %v6213_v35, %v4846_v38  ;;  %v6161_v33 = vld [vmem:[%s9594_s2 + $0x34c] sm:$0xf]  ;;  %v4638_v34 = vld [vmem:[%s9594_s2 + $0x358] sm:$0xf0] }
  0x95   :  { %1527 = vmatpush.bf16.msra.mxu1 %v4781_v47  ;;  %v4350_v47 = vld [vmem:[%s9594_s2 + $0x118] sm:$0xf0]  ;;  %v4641_v43 = vor.u32 %v6161_v33, %v4638_v34 }
  0x96   :  { %1568 = vmatpush.bf16.msrb.mxu2 %v4289_v46  ;;  %v6089_v46 = vld [vmem:[%s9594_s2 + $0x10c] sm:$0xf] }
  0x97   :  { %1541 = vmatpush.bf16.msra.mxu3 %v4909_v52  ;;  %4996 = vmatmul.msk.bf16.vlgmr.msrb.gmra.mxu0 %vm1267_vm0, %v7007_v50  ;;  %v4974_v52 = vld [vmem:[%s9594_s2 + $0x5f8] sm:$0xf0] }
  0x98   :  { %1582 = vmatpush.bf16.msra.mxu0 %v4417_v61  ;;  %v4353_v61 = vor.u32 %v6089_v46, %v4350_v47  ;;  %v4977_v0 = vor.u32 %v6245_v51, %v4974_v52  ;;  %v4494_v46 = vld [vmem:[%s9594_s2 + $0x238] sm:$0xf0]  ;;  %v6157_v47 = vld [vmem:[%s9594_s2 + $0x32c] sm:$0xf]  ;;  %v7845_v52 = vld [vmem:[%s9596_s3] sm:$0xf] }
  0x99   :  { %1528 = vmatpush.bf16.msra.mxu1 %v4765_v63  ;;  %v4686_v63 = vld [vmem:[%s9594_s2 + $0x3b8] sm:$0xf0]  ;;  %v6225_v51 = vld [vmem:[%s9594_s2 + $0x54c] sm:$0xf] }
  0x9a   :  { %1569 = vmatpush.bf16.msrb.mxu2 %v4273_v62  ;;  %v6173_v62 = vld [vmem:[%s9594_s2 + $0x3ac] sm:$0xf]  ;;  %v4897_v7 = vor.u32 %v6225_v51, %v4894_v57 }
  0x9b   :  { %1542 = vmatpush.bf16.msra.mxu3 %v4893_v3  ;;  %v6241_v3 = vld [vmem:[%s9594_s2 + $0x5cc] sm:$0xf]  ;;  %v4689_v6 = vor.u32 %v6173_v62, %v4686_v63 }
  0x9c   :  { %1583 = vmatpush.bf16.msra.mxu0 %v4401_v10  ;;  %v4542_v10 = vld [vmem:[%s9594_s2 + $0x298] sm:$0xf0]  ;;  %v6121_v63 = vld [vmem:[%s9594_s2 + $0x20c] sm:$0xf] }
  0x9d   :  { %1529 = vmatpush.bf16.msra.mxu1 %v4749_v13  ;;  %v4961_v13 = vor.u32 %v6241_v3, %v4958_v4  ;;  %v4545_v15 = vor.u32 %v6137_v9, %v4542_v10  ;;  %v4606_v3 = vld [vmem:[%s9594_s2 + $0x318] sm:$0xf0]  ;;  %v6249_v4 = vld [vmem:[%s9594_s2 + $0x60c] sm:$0xf]  ;;  %v5056_v9 = vld [vmem:[%s9597_s4 + $0x70] sm:$0xf] }
  0x9e   :  { %1570 = vmatpush.bf16.msrb.mxu2 %v4257_v12  ;;  %v4670_v12 = vld [vmem:[%s9594_s2 + $0x398] sm:$0xf0]  ;;  %v6267_v10 = vld [vmem:[%s9597_s4 + $0x74] sm:$0xf0] }
  0x9f   :  { %1543 = vmatpush.bf16.msra.mxu3 %v4877_v17  ;;  %v4942_v17 = vld [vmem:[%s9594_s2 + $0x5b8] sm:$0xf0]  ;;  %v5057_v19 = vor.u32 %v6267_v10, %v5056_v9  ;;  %v5096_v9 = vld [vmem:[%s9597_s4 + $0xc0] sm:$0xf]  ;;  %v6277_v10 = vld [vmem:[%s9597_s4 + $0xc4] sm:$0xf0] }
  0xa0   :  { %1584 = vmatpush.bf16.msra.mxu0 %v4385_v24  ;;  %v4945_v24 = vor.u32 %v6237_v16, %v4942_v17  ;;  %v6185_v17 = vld [vmem:[%s9594_s2 + $0x40c] sm:$0xf] }
  0xa1   :  { %1530 = vmatpush.bf16.msra.mxu1 %v4733_v28  ;;  %v6197_v28 = vld [vmem:[%s9594_s2 + $0x46c] sm:$0xf]  ;;  %v4737_v23 = vor.u32 %v6185_v17, %v4734_v18  ;;  %v6253_v18 = vld [vmem:[%s9597_s4 + $0x4] sm:$0xf0] }
  0xa2   :  { %1571 = vmatpush.bf16.msrb.mxu2 %v4241_v27  ;;  %v6233_v27 = vld [vmem:[%s9594_s2 + $0x58c] sm:$0xf] }
  0xa3   :  { %1544 = vmatpush.bf16.msra.mxu3 %v4861_v31  ;;  %v6129_v31 = vld [vmem:[%s9594_s2 + $0x24c] sm:$0xf] }
  0xa4   :  { %1585 = vmatpush.bf16.msra.mxu0 %v4369_v41  ;;  %1531 = vmatmul.bf16.vlgmr.msra.gmra.mxu1 %v7104_v37  ;;  %v6193_v41 = vld [vmem:[%s9594_s2 + $0x44c] sm:$0xf] }
  0xa5   :  { %1593 = vmatpush.bf16.msrb.mxu1 %v4593_v32  ;;  %v4510_v32 = vld [vmem:[%s9594_s2 + $0x258] sm:$0xf0]  ;;  %v4769_v53 = vor.u32 %v6193_v41, %v4766_v44  ;;  %v5024_v44 = vld [vmem:[%s9597_s4 + $0x30] sm:$0xf] }
  0xa6   :  { %1545 = vmatmul.bf16.vlgmr.msra.gmra.mxu3 %v7115_v42  ;;  %1572 = vmatpush.bf16.msrb.mxu2 %v4225_v45  ;;  %v4513_v38 = vor.u32 %v6129_v31, %v4510_v32  ;;  %v6125_v45 = vld [vmem:[%s9594_s2 + $0x22c] sm:$0xf] }
  0xa7   :  { %1607 = vmatpush.bf16.msrb.mxu3 %v4721_v36  ;;  %v4785_v36 = vor.u32 %v6197_v28, %v4782_v30  ;;  %v6263_v30 = vld [vmem:[%s9597_s4 + $0x54] sm:$0xf0] }
  0xa8   :  { %1586 = vmatpush.bf16.msra.mxu0 %v4353_v61  ;;  %v1280_v61 = vpop.f32.mrf.mxu0 }
  0xa9   :  { %1594 = vmatpush.bf16.msrb.mxu1 %v4577_v49  ;;  %1573 = vmatmul.bf16.vlgmr.msrb.gmra.mxu2 %v6880_v55  ;;  %v4673_v55 = vor.u32 %v6169_v11, %v4670_v12  ;;  %v4913_v49 = vor.u32 %v6229_v39, %v4910_v40  ;;  %v4753_v11 = vor.u32 %v6189_v58, %v4750_v59  ;;  %v1322_v33 = vpop.f32.mrf.mxu3  ;;  %v6283_v39 = vld [vmem:[%s9597_s4 + $0xf4] sm:$0xf0]  ;;  %v5016_v58 = vld [vmem:[%s9597_s4 + $0x20] sm:$0xf] }
  0xaa   :  { %1621 = vmatpush.bf16.msra.mxu2 %v4849_v48  ;;  %v4622_v48 = vld [vmem:[%s9594_s2 + $0x338] sm:$0xf0] }
  0xab   :  { %1608 = vmatpush.bf16.msrb.mxu3 %v4705_v56  ;;  %1587 = vmatmul.bf16.vlgmr.msra.gmra.mxu0 %v6916_v8  ;;  %v4926_v8 = vld [vmem:[%s9594_s2 + $0x598] sm:$0xf0]  ;;  %v4497_v56 = vor.u32 %v6125_v45, %v4494_v46  ;;  %v4625_v62 = vor.u32 %v6157_v47, %v4622_v48  ;;  %v6259_v46 = vld [vmem:[%s9597_s4 + $0x34] sm:$0xf0]  ;;  %v5112_v47 = vld [vmem:[%s9597_s4 + $0xe0] sm:$0xf] }
  0xac   :  { %1635 = vmatpush.bf16.msrb.mxu0 %v4977_v0  ;;  %v4929_v35 = vor.u32 %v6233_v27, %v4926_v8  ;;  %v4478_v0 = vld [vmem:[%s9594_s2 + $0x218] sm:$0xf0]  ;;  %v5049_v27 = vor.u32 %v6265_v22, %v5048_v21  ;;  %v5025_v57 = vor.u32 %v6259_v46, %v5024_v44  ;;  %v6266_v21 = vld [vmem:[%s9597_s4 + $0x74] sm:$0xf]  ;;  %v6260_v44 = vld [vmem:[%s9597_s4 + $0x44] sm:$0xf] }
  0xad   :  { %1595 = vmatpush.bf16.msrb.mxu1 %v4561_v2  ;;  %v1294_v2 = vpop.f32.mrf.mxu1  ;;  %v4481_v12 = vor.u32 %v6121_v63, %v4478_v0  ;;  %v5104_v63 = vld [vmem:[%s9597_s4 + $0xd0] sm:$0xf]  ;;  %v6279_v0 = vld [vmem:[%s9597_s4 + $0xd4] sm:$0xf0]  ;;  %v5058_v22 = vld [vmem:[%s9597_s4 + $0x78] sm:$0xf0] }
  0xae   :  { %1622 = vmatpush.bf16.msra.mxu2 %v4833_v1  ;;  %v6153_v1 = vld [vmem:[%s9594_s2 + $0x30c] sm:$0xf] }
  0xaf   :  { %1609 = vmatpush.bf16.msrb.mxu3 %v4689_v6  ;;  %v1308_v6 = vpop.f32.mrf.mxu2  ;;  %v4609_v16 = vor.u32 %v6153_v1, %v4606_v3  ;;  %v5105_v1 = vor.u32 %v6279_v0, %v5104_v63  ;;  %v5018_v63 = vld [vmem:[%s9597_s4 + $0x28] sm:$0xf0] }
  0xb0   :  { %1636 = vmatpush.bf16.msrb.mxu0 %v4961_v13  ;;  %v6221_v13 = vld [vmem:[%s9594_s2 + $0x52c] sm:$0xf]  ;;  %v1282_v8 = vpop.f32.mrf.mxu0 }
  0xb1   :  { %1596 = vmatpush.bf16.msrb.mxu1 %v4545_v15  ;;  %v244_v15 = vperm.slane %v7845_v52, 0  ;;  %v1324_v59 = vpop.f32.mrf.mxu3 }
  0xb2   :  { %1623 = vmatpush.bf16.msra.mxu2 %v4817_v14  ;;  %v4878_v14 = vld [vmem:[%s9594_s2 + $0x538] sm:$0xf0] }
  0xb3   :  { %1610 = vmatpush.bf16.msrb.mxu3 %v4673_v55  ;;  %v4993_v55 = vor.u32 %v6249_v4, %v4990_v5  ;;  %v4881_v20 = vor.u32 %v6221_v13, %v4878_v14  ;;  %v5008_v4 = vld [vmem:[%s9597_s4 + $0x10] sm:$0xf]  ;;  %v5097_v13 = vor.u32 %v6277_v10, %v5096_v9 }
  0xb4   :  { %1637 = vmatpush.bf16.msrb.mxu0 %v4945_v24  ;;  %v6217_v24 = vld [vmem:[%s9594_s2 + $0x50c] sm:$0xf] }
  0xb5   :  { %1597 = vmatpush.bf16.msrb.mxu1 %v4529_v26  ;;  %v1281_v26 = vadd.f32 %v1280_v61, %v244_v15  ;;  %v1296_v31 = vpop.f32.mrf.mxu1 }
  0xb6   :  { %1624 = vmatpush.bf16.msra.mxu2 %v4801_v25  ;;  %v4862_v25 = vld [vmem:[%s9594_s2 + $0x518] sm:$0xf0] }
  0xb7   :  { %1611 = vmatpush.bf16.msrb.mxu3 %v4657_v29  ;;  %v4865_v28 = vor.u32 %v6217_v24, %v4862_v25  ;;  %v5040_v29 = vld [vmem:[%s9597_s4 + $0x50] sm:$0xf]  ;;  %v1295_v32 = vadd.f32 %v1294_v2, %v1281_v26  ;;  %v1310_v34 = vpop.f32.mrf.mxu2 }
  0xb8   :  { %1638 = vmatpush.bf16.msrb.mxu0 %v4929_v35  ;;  %v1283_v35 = vadd.f32 %v1282_v8, %v244_v15  ;;  %v5000_v15 = vld [vmem:[%s9597_s4] sm:$0xf] }
  0xb9   :  { %1598 = vmatpush.bf16.msrb.mxu1 %v4513_v38  ;;  %v6261_v38 = vld [vmem:[%s9597_s4 + $0x44] sm:$0xf0]  ;;  %v1309_v41 = vadd.f32 %v1308_v6, %v1295_v32  ;;  %v5001_v25 = vor.u32 %v6253_v18, %v5000_v15  ;;  %v5080_v8 = vld [vmem:[%s9597_s4 + $0xa0] sm:$0xf] }
  0xba   :  { %1625 = vmatpush.bf16.msra.mxu2 %v4785_v36  ;;  %v5041_v36 = vor.u32 %v6263_v30, %v5040_v29  ;;  %v6264_v30 = vld [vmem:[%s9597_s4 + $0x64] sm:$0xf] }
  0xbb   :  { %1612 = vmatpush.bf16.msrb.mxu3 %v4641_v43  ;;  %v1297_v43 = vadd.f32 %v1296_v31, %v1283_v35  ;;  %v1323_v51 = vadd.f32 %v1322_v33, %v1309_v41  ;;  %v5050_v31 = vld [vmem:[%s9597_s4 + $0x68] sm:$0xf0]  ;;  %v5064_v41 = vld [vmem:[%s9597_s4 + $0x80] sm:$0xf] }
  0xbc   :  { %1639 = vmatpush.bf16.msrb.mxu0 %v4913_v49  ;;  %v5053_v35 = vor.u32 %v6264_v30, %v5050_v31 }
  0xbd   :  { %1599 = vmatpush.bf16.msrb.mxu1 %v4497_v56  ;;  %v1311_v56 = vadd.f32 %v1310_v34, %v1297_v43  ;;  %v6269_v43 = vld [vmem:[%s9597_s4 + $0x84] sm:$0xf0] }
  0xbe   :  { %1626 = vmatpush.bf16.msra.mxu2 %v4769_v53  ;;  %v5065_v46 = vor.u32 %v6269_v43, %v5064_v41 }
  0xbf   :  { %1613 = vmatpush.bf16.msrb.mxu3 %v4625_v62  ;;  %v1364_v53 = vpop.f32.mrf.mxu2  ;;  %v6257_v62 = vld [vmem:[%s9597_s4 + $0x24] sm:$0xf0]  ;;  %v1325_v2 = vadd.f32 %v1324_v59, %v1311_v56 }
  0xc0   :  { %1640 = vmatpush.bf16.msrb.mxu0 %v4897_v7  ;;  %v1336_v45 = vpop.f32.mrf.mxu0  ;;  %v5017_v3 = vor.u32 %v6257_v62, %v5016_v58  ;;  %v6255_v7 = vld [vmem:[%s9597_s4 + $0x14] sm:$0xf0]  ;;  %v6256_v62 = vld [vmem:[%s9597_s4 + $0x24] sm:$0xf] }
  0xc1   :  { %1600 = vmatpush.bf16.msrb.mxu1 %v4481_v12  ;;  %v1350_v48 = vpop.f32.mrf.mxu1  ;;  %v1337_v61 = vadd.f32 %v1336_v45, %v1323_v51  ;;  %v5034_v45 = vld [vmem:[%s9597_s4 + $0x48] sm:$0xf0]  ;;  %v5026_v51 = vld [vmem:[%s9597_s4 + $0x38] sm:$0xf0]  ;;  %v5021_v0 = vor.u32 %v6256_v62, %v5018_v63  ;;  %v6288_v62 = vld [vmem:[%s9597_s4 + $0x124] sm:$0xf] }
  0xc2   :  { %1627 = vmatpush.bf16.msra.mxu2 %v4753_v11 }
  0xc3   :  { %1614 = vmatpush.bf16.msrb.mxu3 %v4609_v16  ;;  %v1351_v5 = vadd.f32 %v1350_v48, %v1337_v61 }
  0xc4   :  { %1641 = vmatpush.bf16.msrb.mxu0 %v4881_v20  ;;  %1601 = vmatmul.bf16.vlgmr.msrb.gmra.mxu1 %v6878_v54  ;;  %v5032_v54 = vld [vmem:[%s9597_s4 + $0x40] sm:$0xf] }
  0xc5   :  { %1656 = vmatpush.bf16.msra.mxu1 %v4993_v55  ;;  %v1365_v16 = vadd.f32 %v1364_v53, %v1351_v5  ;;  %v5088_v55 = vld [vmem:[%s9597_s4 + $0xb0] sm:$0xf]  ;;  %v5010_v5 = vld [vmem:[%s9597_s4 + $0x18] sm:$0xf0] }
  0xc6   :  { %1615 = vmatmul.bf16.vlgmr.msrb.gmra.mxu3 %v6891_v60  ;;  %1628 = vmatpush.bf16.msra.mxu2 %v4737_v23  ;;  %v5120_v60 = vld [vmem:[%s9597_s4 + $0xf0] sm:$0xf] }
  0xc7   :  { %1984 = vmatpush.bf16.msra.mxu3 %v5057_v19  ;;  %v5121_v40 = vor.u32 %v6283_v39, %v5120_v60  ;;  %v1366_v17 = vpop.f32.mrf.mxu2  ;;  %v6275_v19 = vld [vmem:[%s9597_s4 + $0xb4] sm:$0xf0]  ;;  %v1663_v26 = vmax.f32 %v1365_v16, 0.0  ;;  %v5042_v60 = vld [vmem:[%s9597_s4 + $0x58] sm:$0xf0] }
  0xc8   :  { %1642 = vmatpush.bf16.msrb.mxu0 %v4865_v28  ;;  %v1338_v6 = vpop.f32.mrf.mxu0  ;;  %v5089_v23 = vor.u32 %v6275_v19, %v5088_v55  ;;  %v6273_v28 = vld [vmem:[%s9597_s4 + $0xa4] sm:$0xf0]  ;;  %v5184_v55 = vld [vmem:[%s9597_s4 + $0x170] sm:$0xf]  ;;  %v6299_v19 = vld [vmem:[%s9597_s4 + $0x174] sm:$0xf0] }
  0xc9   :  { %1629 = vmatmul.bf16.vlgmr.msra.gmra.mxu2 %v7104_v37  ;;  %v5033_v37 = vor.u32 %v6261_v38, %v5032_v54  ;;  %1998 = vmatpush.bf16.msrb.mxu1 %v5121_v40  ;;  %v1339_v11 = vadd.f32 %v1338_v6, %v1325_v2  ;;  %v1352_v12 = vpop.f32.mrf.mxu1  ;;  %v1378_v29 = vpop.f32.mrf.mxu3  ;;  %v5081_v32 = vor.u32 %v6273_v28, %v5080_v8  ;;  %v6271_v54 = vld [vmem:[%s9597_s4 + $0x94] sm:$0xf0]  ;;  %v6262_v38 = vld [vmem:[%s9597_s4 + $0x54] sm:$0xf] }
  0xca   :  { %v5045_v40 = vor.u32 %v6262_v38, %v5042_v60  ;;  %v6294_v38 = vld [vmem:[%s9597_s4 + $0x154] sm:$0xf] }
  0xcb   :  { %1985 = vmatpush.bf16.msra.mxu3 %v5049_v27  ;;  %1643 = vmatmul.bf16.vlgmr.msrb.gmra.mxu0 %v7115_v42  ;;  %v6281_v42 = vld [vmem:[%s9597_s4 + $0xe4] sm:$0xf0]  ;;  %v1353_v14 = vadd.f32 %v1352_v12, %v1339_v11  ;;  %v5061_v27 = vor.u32 %v6266_v21, %v5058_v22  ;;  %v6252_v12 = vld [vmem:[%s9597_s4 + $0x4] sm:$0xf]  ;;  %v5185_v21 = vor.u32 %v6299_v19, %v5184_v55  ;;  %v5186_v22 = vld [vmem:[%s9597_s4 + $0x178] sm:$0xf0] }
  0xcc   :  { %v5113_v49 = vor.u32 %v6281_v42, %v5112_v47  ;;  %v5037_v42 = vor.u32 %v6260_v44, %v5034_v45  ;;  %v6293_v44 = vld [vmem:[%s9597_s4 + $0x144] sm:$0xf0] }
  0xcd   :  { %v1367_v20 = vadd.f32 %v1366_v17, %v1353_v14  ;;  %2012 = vmatpush.bf16.msrb.mxu2 %v5185_v21 }
  0xce   :  { %1999 = vmatpush.bf16.msrb.mxu1 %v5113_v49  ;;  %v6258_v49 = vld [vmem:[%s9597_s4 + $0x34] sm:$0xf] }
  0xcf   :  { %1986 = vmatpush.bf16.msra.mxu3 %v5041_v36  ;;  %v1667_v24 = vmax.f32 %v1367_v20, 0.0  ;;  %v1392_v34 = vpop.f32.mrf.mxu2  ;;  %v5072_v36 = vld [vmem:[%s9597_s4 + $0x90] sm:$0xf]  ;;  %v6298_v20 = vld [vmem:[%s9597_s4 + $0x174] sm:$0xf] }
  0xd0   :  { %v5073_v39 = vor.u32 %v6271_v54, %v5072_v36  ;;  %v5168_v36 = vld [vmem:[%s9597_s4 + $0x150] sm:$0xf]  ;;  %v6295_v54 = vld [vmem:[%s9597_s4 + $0x154] sm:$0xf0] }
  0xd1   :  { %v7995_v33 = vpack.c.bf16 %v1667_v24, %v1663_v26  ;;  %v1380_v47 = vpop.f32.mrf.mxu3  ;;  %v6297_v24 = vld [vmem:[%s9597_s4 + $0x164] sm:$0xf0]  ;;  %v6296_v26 = vld [vmem:[%s9597_s4 + $0x164] sm:$0xf] }
  0xd2   :  { %2000 = vmatpush.bf16.msrb.mxu1 %v5105_v1 }
  0xd3   :  { %1987 = vmatpush.bf16.msra.mxu3 %v5033_v37  ;;  %v245_v37 = vperm.slane %v7845_v52, 1 }
  0xd4   :  { %4997 = vmatmul.msk.bf16.vlgmr.msra.gmra.mxu1 %vm1267_vm0, %v7007_v50  ;;  %v5009_v50 = vor.u32 %v6255_v7, %v5008_v4  ;;  %v6254_v4 = vld [vmem:[%s9597_s4 + $0x14] sm:$0xf] }
  0xd5   :  { %v1379_v48 = vadd.f32 %v1378_v29, %v245_v37  ;;  %v1381_v59 = vadd.f32 %v1380_v47, %v245_v37  ;;  %v5013_v9 = vor.u32 %v6254_v4, %v5010_v5  ;;  %v5160_v37 = vld [vmem:[%s9597_s4 + $0x140] sm:$0xf]  ;;  %v5162_v47 = vld [vmem:[%s9597_s4 + $0x148] sm:$0xf0]  ;;  %v6286_v4 = vld [vmem:[%s9597_s4 + $0x114] sm:$0xf] }
  0xd6   :  { %2001 = vmatpush.bf16.msrb.mxu1 %v5097_v13  ;;  %v5002_v13 = vld [vmem:[%s9597_s4 + $0x8] sm:$0xf0]  ;;  %v5161_v45 = vor.u32 %v6293_v44, %v5160_v37  ;;  %v6280_v37 = vld [vmem:[%s9597_s4 + $0xe4] sm:$0xf] }
  0xd7   :  { %1988 = vmatpush.bf16.msra.mxu3 %v5025_v57  ;;  %v1394_v56 = vpop.f32.mrf.mxu2  ;;  %v5029_v57 = vor.u32 %v6258_v49, %v5026_v51  ;;  %v1393_v58 = vadd.f32 %v1392_v34, %v1379_v48  ;;  %v5152_v49 = vld [vmem:[%s9597_s4 + $0x130] sm:$0xf]  ;;  %v6291_v51 = vld [vmem:[%s9597_s4 + $0x134] sm:$0xf0]  ;;  %v5114_v44 = vld [vmem:[%s9597_s4 + $0xe8] sm:$0xf0] }
  0xd8   :  { %v1395_v2 = vadd.f32 %v1394_v56, %v1381_v59  ;;  %v5153_v56 = vor.u32 %v6291_v51, %v5152_v49  ;;  %v5144_v59 = vld [vmem:[%s9597_s4 + $0x120] sm:$0xf]  ;;  %v6278_v49 = vld [vmem:[%s9597_s4 + $0xd4] sm:$0xf]  ;;  %v5106_v51 = vld [vmem:[%s9597_s4 + $0xd8] sm:$0xf0] }
  0xda   :  { %2002 = vmatpush.bf16.msrb.mxu1 %v5089_v23  ;;  %v5176_v23 = vld [vmem:[%s9597_s4 + $0x160] sm:$0xf] }
  0xdb   :  { %1989 = vmatpush.bf16.msra.mxu3 %v5017_v3  ;;  %v5177_v29 = vor.u32 %v6297_v24, %v5176_v23 }
  0xdd   :  { %2013 = vmatpush.bf16.msrb.mxu2 %v5177_v29 }
  0xde   :  { %2003 = vmatpush.bf16.msrb.mxu1 %v5081_v32 }
  0xdf   :  { %1990 = vmatpush.bf16.msra.mxu3 %v5009_v50  ;;  %v5005_v50 = vor.u32 %v6252_v12, %v5002_v13  ;;  %v6285_v12 = vld [vmem:[%s9597_s4 + $0x104] sm:$0xf0]  ;;  %v6284_v13 = vld [vmem:[%s9597_s4 + $0x104] sm:$0xf] }
  0xe0   :  { %v1406_v53 = vpop.f32.mrf.mxu0 }
  0xe1   :  { %v1420_v61 = vpop.f32.mrf.mxu1  ;;  %v1407_v1 = vadd.f32 %v1406_v53, %v1393_v58  ;;  %v6290_v53 = vld [vmem:[%s9597_s4 + $0x134] sm:$0xf] }
  0xe2   :  { %2004 = vmatpush.bf16.msrb.mxu1 %v5073_v39  ;;  %v5169_v39 = vor.u32 %v6295_v54, %v5168_v36 }
  0xe3   :  { %1991 = vmatpush.bf16.msra.mxu3 %v5001_v25  ;;  %v1421_v10 = vadd.f32 %v1420_v61, %v1407_v1  ;;  %v5189_v25 = vor.u32 %v6298_v20, %v5186_v22  ;;  %v6289_v61 = vld [vmem:[%s9597_s4 + $0x124] sm:$0xf0] }
  0xe4   :  { %2014 = vmatpush.bf16.msrb.mxu2 %v5169_v39  ;;  %v5145_v63 = vor.u32 %v6289_v61, %v5144_v59 }
  0xe6   :  { %1992 = vmatmul.bf16.vlgmr.msra.gmra.mxu3 %v7995_v33  ;;  %2005 = vmatpush.bf16.msrb.mxu1 %v5065_v46  ;;  %v6292_v46 = vld [vmem:[%s9597_s4 + $0x144] sm:$0xf] }
  0xe7   :  { %2040 = vmatpush.bf16.msrb.mxu3 %v5061_v27  ;;  %v5178_v27 = vld [vmem:[%s9597_s4 + $0x168] sm:$0xf0]  ;;  %v5165_v48 = vor.u32 %v6292_v46, %v5162_v47  ;;  %v5117_v47 = vor.u32 %v6280_v37, %v5114_v44  ;;  %v6332_v37 = vld [vmem:[%s9598_s6 + $0xec] sm:$0xf0]  ;;  %v6330_v44 = vld [vmem:[%s9598_s6 + $0xe4] sm:$0xf] }
  0xe8   :  { %v1408_v6 = vpop.f32.mrf.mxu0  ;;  %v5181_v31 = vor.u32 %v6296_v26, %v5178_v27  ;;  %2015 = vmatpush.bf16.msrb.mxu2 %v5161_v45 }
  0xe9   :  { %v1434_v3 = vpop.f32.mrf.mxu3  ;;  %v1409_v11 = vadd.f32 %v1408_v6, %v1395_v2  ;;  %v1422_v14 = vpop.f32.mrf.mxu1  ;;  %v5136_v2 = vld [vmem:[%s9597_s4 + $0x110] sm:$0xf] }
  0xea   :  { %v1435_v15 = vadd.f32 %v1434_v3, %v1421_v10  ;;  %2068 = vmatpush.bf16.msra.mxu1 %v5189_v25  ;;  %v6287_v3 = vld [vmem:[%s9597_s4 + $0x114] sm:$0xf0] }
  0xeb   :  { %2041 = vmatpush.bf16.msrb.mxu3 %v5053_v35  ;;  %v1423_v16 = vadd.f32 %v1422_v14, %v1409_v11  ;;  %v5128_v11 = vld [vmem:[%s9597_s4 + $0x100] sm:$0xf] }
  0xec   :  { %v1448_v7 = vpop.f32.mrf.mxu2  ;;  %2016 = vmatpush.bf16.msrb.mxu2 %v5153_v56  ;;  %v5129_v14 = vor.u32 %v6285_v12, %v5128_v11  ;;  %v6272_v12 = vld [vmem:[%s9597_s4 + $0xa4] sm:$0xf] }
  0xed   :  { %v1449_v8 = vadd.f32 %v1448_v7, %v1435_v15  ;;  %v5137_v7 = vor.u32 %v6287_v3, %v5136_v2  ;;  %v5194_v2 = vld [vmem:[%s9597_s4 + $0x188] sm:$0xf0] }
  0xee   :  { %2069 = vmatpush.bf16.msra.mxu1 %v5181_v31 }
  0xef   :  { %2042 = vmatpush.bf16.msrb.mxu3 %v5045_v40 }
  0xf0   :  { %v1462_v18 = vpop.f32.mrf.mxu0  ;;  %2017 = vmatpush.bf16.msrb.mxu2 %v5145_v63  ;;  %v5098_v63 = vld [vmem:[%s9597_s4 + $0xc8] sm:$0xf0] }
  0xf1   :  { %v1436_v17 = vpop.f32.mrf.mxu3  ;;  %v1463_v32 = vadd.f32 %v1462_v18, %v1449_v8 }
  0xf2   :  { %v1437_v28 = vadd.f32 %v1436_v17, %v1423_v16  ;;  %v246_v17 = vperm.slane %v7845_v52, 2 }
  0xf3   :  { %2043 = vmatpush.bf16.msrb.mxu3 %v5037_v42  ;;  %v1664_v41 = vmax.f32 %v1463_v32, 0.0  ;;  %v5192_v32 = vld [vmem:[%s9597_s4 + $0x180] sm:$0xf] }
  0xf4   :  { %v1450_v30 = vpop.f32.mrf.mxu2  ;;  %2018 = vmatpush.bf16.msrb.mxu2 %v5137_v7 }
  0xf5   :  { %v1451_v34 = vadd.f32 %v1450_v30, %v1437_v28 }
  0xf7   :  { %2044 = vmatpush.bf16.msrb.mxu3 %v5029_v57  ;;  %v5154_v57 = vld [vmem:[%s9597_s4 + $0x138] sm:$0xf0] }
  0xf8   :  { %v1464_v35 = vpop.f32.mrf.mxu0  ;;  %v5157_v58 = vor.u32 %v6290_v53, %v5154_v57  ;;  %2019 = vmatpush.bf16.msrb.mxu2 %v5129_v14  ;;  %v5109_v57 = vor.u32 %v6278_v49, %v5106_v51  ;;  %v6331_v51 = vld [vmem:[%s9598_s6 + $0xec] sm:$0xf] }
  0xf9   :  { %v1465_v60 = vadd.f32 %v1464_v35, %v1451_v34  ;;  %v6301_v34 = vld [vmem:[%s9597_s4 + $0x184] sm:$0xf0] }
  0xfa   :  { %v5193_v54 = vor.u32 %v6301_v34, %v5192_v32 }
  0xfb   :  { %2045 = vmatpush.bf16.msrb.mxu3 %v5021_v0  ;;  %v1668_v43 = vmax.f32 %v1465_v60, 0.0  ;;  %v5146_v0 = vld [vmem:[%s9597_s4 + $0x128] sm:$0xf0]  ;;  %v5122_v60 = vld [vmem:[%s9597_s4 + $0xf8] sm:$0xf0] }
  0xfc   :  { %v5149_v1 = vor.u32 %v6288_v62, %v5146_v0  ;;  %2033 = vmatpush.bf16.msra.mxu0 %v5193_v54  ;;  %v6276_v62 = vld [vmem:[%s9597_s4 + $0xc4] sm:$0xf] }
  0xfd   :  { %v8096_v42 = vpack.c.bf16 %v1668_v43, %v1664_v41  ;;  %v6300_v0 = vld [vmem:[%s9597_s4 + $0x184] sm:$0xf] }
  0xfe   :  { %v5197_v3 = vor.u32 %v6300_v0, %v5194_v2  ;;  %v5306_v0 = vld [vmem:[%s9598_s6 + $0xc8] sm:$0xf] }
  0xff   :  { %2046 = vmatpush.bf16.msrb.mxu3 %v5013_v9  ;;  %2006 = vmatmul.bf16.vlgmr.msrb.gmra.mxu1 %v8096_v42  ;;  %v5138_v9 = vld [vmem:[%s9597_s4 + $0x118] sm:$0xf0] }
 0x100   :  { %v5141_v10 = vor.u32 %v6286_v4, %v5138_v9  ;;  %2089 = vmatpush.bf16.msra.mxu2 %v5197_v3  ;;  %v6274_v4 = vld [vmem:[%s9597_s4 + $0xb4] sm:$0xf] }
 0x101   :  { %v1476_v5 = vpop.f32.mrf.mxu1 }
 0x102   :  { %v1477_v19 = vadd.f32 %v1476_v5, %v246_v17  ;;  %v5090_v5 = vld [vmem:[%s9597_s4 + $0xb8] sm:$0xf0] }
 0x103   :  { %2047 = vmatpush.bf16.msrb.mxu3 %v5005_v50  ;;  %v5130_v50 = vld [vmem:[%s9597_s4 + $0x108] sm:$0xf0]  ;;  %v5093_v7 = vor.u32 %v6274_v4, %v5090_v5  ;;  %v5308_v5 = vld [vmem:[%s9598_s6 + $0xd8] sm:$0xf0] }
 0x104   :  { %v1504_v6 = vpop.f32.mrf.mxu0  ;;  %v5133_v15 = vor.u32 %v6284_v13, %v5130_v50  ;;  %v5082_v13 = vld [vmem:[%s9597_s4 + $0xa8] sm:$0xf0] }
 0x105   :  { %v5085_v50 = vor.u32 %v6272_v12, %v5082_v13  ;;  %v6327_v4 = vld [vmem:[%s9598_s6 + $0xcc] sm:$0xf]  ;;  %v6322_v12 = vld [vmem:[%s9598_s6 + $0xa4] sm:$0xf] }
 0x106   :  { %2048 = vmatmul.bf16.vlgmr.msrb.gmra.mxu3 %v7995_v33  ;;  %v5170_v33 = vld [vmem:[%s9597_s4 + $0x158] sm:$0xf0] }
 0x107   :  { %v5173_v40 = vor.u32 %v6294_v38, %v5170_v33  ;;  %v6282_v38 = vld [vmem:[%s9597_s4 + $0xf4] sm:$0xf] }
 0x109   :  { %2070 = vmatpush.bf16.msra.mxu1 %v5173_v40  ;;  %v1490_v16 = vpop.f32.mrf.mxu3  ;;  %v1478_v18 = vpop.f32.mrf.mxu1  ;;  %v5125_v40 = vor.u32 %v6282_v38, %v5122_v60 }
 0x10a   :  { %v1491_v22 = vadd.f32 %v1490_v16, %v1477_v19  ;;  %v1479_v23 = vadd.f32 %v1478_v18, %v246_v17 }
 0x10b   :  { %2054 = vmatpush.bf16.msrb.mxu0 %v5125_v40 }
 0x10c   :  { %v1506_v55 = vpop.f32.mrf.mxu0  ;;  %v1518_v20 = vpop.f32.mrf.mxu2  ;;  %v1505_v26 = vadd.f32 %v1504_v6, %v1491_v22  ;;  %v247_v6 = vperm.slane %v7845_v52, 3  ;;  %v6270_v52 = vld [vmem:[%s9597_s4 + $0x94] sm:$0xf]  ;;  %v5066_v22 = vld [vmem:[%s9597_s4 + $0x88] sm:$0xf0] }
 0x10d   :  { %2071 = vmatpush.bf16.msra.mxu1 %v5165_v48 }
 0x10e   :  { %v1519_v28 = vadd.f32 %v1518_v20, %v1505_v26 }
 0x10f   :  { %2055 = vmatpush.bf16.msrb.mxu0 %v5117_v47  ;;  %v6333_v47 = vld [vmem:[%s9598_s6 + $0xf4] sm:$0xf0] }
 0x111   :  { %2072 = vmatpush.bf16.msra.mxu1 %v5157_v58  ;;  %v1492_v21 = vpop.f32.mrf.mxu3 }
 0x112   :  { %v1493_v27 = vadd.f32 %v1492_v21, %v1479_v23  ;;  %v6268_v21 = vld [vmem:[%s9597_s4 + $0x84] sm:$0xf] }
 0x113   :  { %2056 = vmatpush.bf16.msrb.mxu0 %v5109_v57 }
 0x114   :  { %v1560_v25 = vpop.f32.mrf.mxu0  ;;  %v1507_v29 = vadd.f32 %v1506_v55, %v1493_v27  ;;  %v1520_v30 = vpop.f32.mrf.mxu2 }
 0x115   :  { %2073 = vmatpush.bf16.msra.mxu1 %v5149_v1  ;;  %v5101_v1 = vor.u32 %v6276_v62, %v5098_v63  ;;  %v5300_v63 = vld [vmem:[%s9598_s6 + $0xd0] sm:$0xf0] }
 0x116   :  { %v1521_v39 = vadd.f32 %v1520_v30, %v1507_v29 }
 0x117   :  { %2057 = vmatpush.bf16.msrb.mxu0 %v5101_v1  ;;  %v6329_v1 = vld [vmem:[%s9598_s6 + $0xd4] sm:$0xf0] }
 0x118   :  { %v5307_v3 = vor.u32 %v6329_v1, %v5306_v0 }
 0x119   :  { %2074 = vmatpush.bf16.msra.mxu1 %v5141_v10 }
 0x11b   :  { %2058 = vmatpush.bf16.msrb.mxu0 %v5093_v7 }
 0x11c   :  { %v1562_v36 = vpop.f32.mrf.mxu0 }
 0x11d   :  { %2075 = vmatpush.bf16.msra.mxu1 %v5133_v15  ;;  %v5074_v15 = vld [vmem:[%s9597_s4 + $0x98] sm:$0xf0] }
 0x11e   :  { %v5077_v16 = vor.u32 %v6270_v52, %v5074_v15  ;;  %v5290_v52 = vld [vmem:[%s9598_s6 + $0xa8] sm:$0xf]  ;;  %v6325_v15 = vld [vmem:[%s9598_s6 + $0xb4] sm:$0xf0] }
 0x11f   :  { %2059 = vmatpush.bf16.msrb.mxu0 %v5085_v50  ;;  %v5284_v50 = vld [vmem:[%s9598_s6 + $0xb0] sm:$0xf0] }
 0x121   :  { %v1532_v24 = vpop.f32.mrf.mxu1 }
 0x122   :  { %v1533_v31 = vadd.f32 %v1532_v24, %v1519_v28  ;;  %v5069_v24 = vor.u32 %v6268_v21, %v5066_v22  ;;  %v5266_v22 = vld [vmem:[%s9598_s6 + $0x80] sm:$0xf] }
 0x123   :  { %2060 = vmatpush.bf16.msrb.mxu0 %v5077_v16  ;;  %v5287_v16 = vor.u32 %v6322_v12, %v5284_v50  ;;  %v6309_v50 = vld [vmem:[%s9598_s6 + $0x34] sm:$0xf0] }
 0x127   :  { %2061 = vmatpush.bf16.msrb.mxu0 %v5069_v24  ;;  %v6318_v24 = vld [vmem:[%s9598_s6 + $0x84] sm:$0xf] }
 0x128   :  { %v1588_v59 = vpop.f32.mrf.mxu0 }
 0x129   :  { %v1546_v8 = vpop.f32.mrf.mxu3  ;;  %v1534_v35 = vpop.f32.mrf.mxu1 }
 0x12a   :  { %v1547_v33 = vadd.f32 %v1546_v8, %v1533_v31  ;;  %v1535_v41 = vadd.f32 %v1534_v35, %v1521_v39 }
 0x12c   :  { %v1561_v45 = vadd.f32 %v1560_v25, %v1547_v33  ;;  %v1574_v58 = vpop.f32.mrf.mxu2 }
 0x12d   :  { %v1575_v14 = vadd.f32 %v1574_v58, %v247_v6  ;;  %v5298_v58 = vld [vmem:[%s9598_s6 + $0xc0] sm:$0xf] }
 0x12e   :  { %v1665_v53 = vmax.f32 %v1561_v45, 0.0 }
 0x12f   :  { %v1589_v17 = vadd.f32 %v1588_v59, %v1575_v14  ;;  %v6328_v59 = vld [vmem:[%s9598_s6 + $0xcc] sm:$0xf0] }
 0x130   :  { %v1590_v11 = vpop.f32.mrf.mxu0  ;;  %v5299_v62 = vor.u32 %v6328_v59, %v5298_v58 }
 0x131   :  { %v1548_v43 = vpop.f32.mrf.mxu3 }
 0x132   :  { %v1549_v46 = vadd.f32 %v1548_v43, %v1535_v41  ;;  %v5314_v43 = vld [vmem:[%s9598_s6 + $0xe0] sm:$0xf] }
 0x133   :  { %v5315_v45 = vor.u32 %v6332_v37, %v5314_v43  ;;  %v6317_v43 = vld [vmem:[%s9598_s6 + $0x74] sm:$0xf0] }
 0x134   :  { %v1563_v48 = vadd.f32 %v1562_v36, %v1549_v46  ;;  %v1576_v10 = vpop.f32.mrf.mxu2  ;;  %v5316_v46 = vld [vmem:[%s9598_s6 + $0xf0] sm:$0xf0] }
 0x135   :  { %v1577_v55 = vadd.f32 %v1576_v10, %v247_v6  ;;  %v5282_v10 = vld [vmem:[%s9598_s6 + $0xa0] sm:$0xf] }
 0x136   :  { %v1669_v56 = vmax.f32 %v1563_v48, 0.0  ;;  %v5319_v48 = vor.u32 %v6330_v44, %v5316_v46  ;;  %v6315_v46 = vld [vmem:[%s9598_s6 + $0x6c] sm:$0xf] }
 0x137   :  { %v1591_v25 = vadd.f32 %v1590_v11, %v1577_v55  ;;  %v6324_v11 = vld [vmem:[%s9598_s6 + $0xac] sm:$0xf0]  ;;  %v5292_v55 = vld [vmem:[%s9598_s6 + $0xb8] sm:$0xf0] }
 0x138   :  { %v1673_v61 = vpack.c.bf16 %v1669_v56, %v1665_v53  ;;  %v5324_v53 = vld [vmem:[%s9598_s6 + $0xf8] sm:$0xf0]  ;;  %v8239_v56 = vld [vmem:[%s9599_s5] sm:$0x3]  ;;  %2325 = vmatpush.bf16.msra.mxu3 %v5319_v48  ;;  %v5283_v14 = vor.u32 %v6324_v11, %v5282_v10  ;;  %v5220_v10 = vld [vmem:[%s9598_s6 + $0x30] sm:$0xf0] }
 0x139   :  { %v5327_v57 = vor.u32 %v6331_v51, %v5324_v53  ;;  %v1727_v6 = vperm.slane %v8239_v56, 0  ;;  %v5234_v51 = vld [vmem:[%s9598_s6 + $0x40] sm:$0xf]  ;;  %v6312_v53 = vld [vmem:[%s9598_s6 + $0x4c] sm:$0xf0] }
 0x13a   :  { %2020 = vmatmul.bf16.vlgmr.msrb.gmra.mxu2 %v1673_v61  ;;  %2076 = vmatmul.bf16.vlgmr.msra.gmra.mxu1 %v1673_v61  ;;  %v6326_v61 = vld [vmem:[%s9598_s6 + $0xc4] sm:$0xf]  ;;  %v5235_v59 = vor.u32 %v6312_v53, %v5234_v51  ;;  %v6435_v51 = vld [vmem:[%s9601_s8 + $0x328] sm:$0xf0]  ;;  %v5974_v53 = vld [vmem:[%s9601_s8 + $0x508] sm:$0xf] }
 0x13b   :  { %2311 = vmatpush.bf16.msrb.mxu2 %v5315_v45  ;;  %2353 = vmatpush.bf16.msrb.mxu1 %v5327_v57  ;;  %v5303_v2 = vor.u32 %v6326_v61, %v5300_v63  ;;  %v6310_v57 = vld [vmem:[%s9598_s6 + $0x44] sm:$0xf]  ;;  %v5236_v61 = vld [vmem:[%s9598_s6 + $0x50] sm:$0xf0]  ;;  %v6313_v63 = vld [vmem:[%s9598_s6 + $0x54] sm:$0xf0] }
 0x13c   :  { %v5239_v1 = vor.u32 %v6310_v57, %v5236_v61  ;;  %v6498_v57 = vld [vmem:[%s9601_s8 + $0x520] sm:$0xf0] }
 0x13d   :  { %2326 = vmatpush.bf16.msra.mxu3 %v5303_v2 }
 0x13f   :  { %2312 = vmatpush.bf16.msrb.mxu2 %v5299_v62  ;;  %v5242_v62 = vld [vmem:[%s9598_s6 + $0x48] sm:$0xf] }
 0x140   :  { %v5243_v2 = vor.u32 %v6313_v63, %v5242_v62  ;;  %v5975_v62 = vor.u32 %v6498_v57, %v5974_v53  ;;  %v5694_v63 = vld [vmem:[%s9601_s8 + $0x2d8] sm:$0xf]  ;;  %v5528_v53 = vld [vmem:[%s9601_s8 + $0x1a4] sm:$0xf0]  ;;  %v5330_v57 = vld [vmem:[%s9601_s8] sm:$0xf] }
 0x141   :  { %v1602_v9 = vpop.f32.mrf.mxu1  ;;  %2327 = vmatpush.bf16.msra.mxu3 %v5287_v16 }
 0x142   :  { %v1603_v23 = vadd.f32 %v1602_v9, %v1589_v17  ;;  %v5311_v9 = vor.u32 %v6327_v4, %v5308_v5  ;;  %v5291_v17 = vor.u32 %v6325_v15, %v5290_v52  ;;  %v5244_v4 = vld [vmem:[%s9598_s6 + $0x58] sm:$0xf0]  ;;  %v5218_v5 = vld [vmem:[%s9598_s6 + $0x20] sm:$0xf]  ;;  %v6307_v52 = vld [vmem:[%s9598_s6 + $0x2c] sm:$0xf] }
 0x143   :  { %2313 = vmatpush.bf16.msrb.mxu2 %v5283_v14  ;;  %v5226_v14 = vld [vmem:[%s9598_s6 + $0x28] sm:$0xf] }
 0x144   :  { %2354 = vmatpush.bf16.msrb.mxu1 %v5311_v9  ;;  %v6306_v9 = vld [vmem:[%s9598_s6 + $0x24] sm:$0xf]  ;;  %v5227_v16 = vor.u32 %v6309_v50, %v5226_v14 }
 0x148   :  { %v1644_v26 = vpop.f32.mrf.mxu0 }
 0x149   :  { %v1616_v18 = vpop.f32.mrf.mxu3  ;;  %v1604_v19 = vpop.f32.mrf.mxu1 }
 0x14a   :  { %v1617_v27 = vadd.f32 %v1616_v18, %v1603_v23  ;;  %v1605_v8 = vadd.f32 %v1604_v19, %v1591_v25  ;;  %v6323_v18 = vld [vmem:[%s9598_s6 + $0xac] sm:$0xf]  ;;  %v6320_v23 = vld [vmem:[%s9598_s6 + $0x8c] sm:$0xf0] }
 0x14b   :  { %v5267_v25 = vor.u32 %v6320_v23, %v5266_v22  ;;  %v5204_v22 = vld [vmem:[%s9598_s6 + $0x10] sm:$0xf0]  ;;  %v5210_v23 = vld [vmem:[%s9598_s6 + $0x8] sm:$0xf] }
 0x14c   :  { %v1630_v20 = vpop.f32.mrf.mxu2 }
 0x14d   :  { %v1631_v31 = vadd.f32 %v1630_v20, %v1617_v27  ;;  %v5295_v20 = vor.u32 %v6323_v18, %v5292_v55  ;;  %v5274_v27 = vld [vmem:[%s9598_s6 + $0x88] sm:$0xf]  ;;  %2314 = vmatpush.bf16.msrb.mxu2 %v5267_v25  ;;  %v5202_v18 = vld [vmem:[%s9598_s6] sm:$0xf]  ;;  %v6304_v55 = vld [vmem:[%s9598_s6 + $0xc] sm:$0xf0] }
 0x14e   :  { %v5203_v25 = vor.u32 %v6304_v55, %v5202_v18  ;;  %v5666_v18 = vld [vmem:[%s9601_s8 + $0x2a0] sm:$0xf]  ;;  %v6421_v55 = vld [vmem:[%s9601_s8 + $0x2b8] sm:$0xf0] }
 0x14f   :  { %v1645_v35 = vadd.f32 %v1644_v26, %v1631_v31  ;;  %2355 = vmatpush.bf16.msrb.mxu1 %v5295_v20  ;;  %v5268_v26 = vld [vmem:[%s9598_s6 + $0x90] sm:$0xf0]  ;;  %v6319_v31 = vld [vmem:[%s9598_s6 + $0x8c] sm:$0xf] }
 0x150   :  { %v1646_v36 = vpop.f32.mrf.mxu0 }
 0x151   :  { %v1618_v28 = vpop.f32.mrf.mxu3  ;;  %v1658_v30 = vpop.f32.mrf.mxu1 }
 0x152   :  { %v1619_v29 = vadd.f32 %v1618_v28, %v1605_v8  ;;  %v1659_v54 = vadd.f32 %v1658_v30, %v1645_v35  ;;  %v6321_v8 = vld [vmem:[%s9598_s6 + $0x94] sm:$0xf0] }
 0x153   :  { %v5275_v30 = vor.u32 %v6321_v8, %v5274_v27  ;;  %v6303_v27 = vld [vmem:[%s9598_s6 + $0xc] sm:$0xf]  ;;  %v5212_v8 = vld [vmem:[%s9598_s6 + $0x18] sm:$0xf0] }
 0x154   :  { %v1632_v32 = vpop.f32.mrf.mxu2  ;;  %v1666_v33 = vmax.f32 %v1659_v54, 0.0  ;;  %v6316_v54 = vld [vmem:[%s9598_s6 + $0x6c] sm:$0xf0] }
 0x155   :  { %v1633_v34 = vadd.f32 %v1632_v32, %v1619_v29  ;;  %v5271_v29 = vor.u32 %v6318_v24, %v5268_v26  ;;  %v5276_v32 = vld [vmem:[%s9598_s6 + $0x98] sm:$0xf0]  ;;  %v6305_v26 = vld [vmem:[%s9598_s6 + $0x14] sm:$0xf0] }
 0x157   :  { %v1647_v38 = vadd.f32 %v1646_v36, %v1633_v34  ;;  %v5279_v34 = vor.u32 %v6319_v31, %v5276_v32  ;;  %2328 = vmatpush.bf16.msra.mxu3 %v5271_v29  ;;  %v5250_v36 = vld [vmem:[%s9598_s6 + $0x60] sm:$0xf]  ;;  %v5215_v31 = vor.u32 %v6303_v27, %v5212_v8  ;;  %v5638_v27 = vld [vmem:[%s9601_s8 + $0x268] sm:$0xf] }
 0x159   :  { %v1660_v60 = vpop.f32.mrf.mxu1  ;;  %2356 = vmatpush.bf16.msrb.mxu1 %v5279_v34 }
 0x15a   :  { %v1661_v39 = vadd.f32 %v1660_v60, %v1647_v38  ;;  %v6314_v38 = vld [vmem:[%s9598_s6 + $0x64] sm:$0xf] }
 0x15c   :  { %v1670_v40 = vmax.f32 %v1661_v39, 0.0 }
 0x15e   :  { %v1674_v41 = vpack.c.bf16 %v1670_v40, %v1666_v33  ;;  %v5251_v33 = vor.u32 %v6316_v54, %v5250_v36  ;;  %v5252_v40 = vld [vmem:[%s9598_s6 + $0x70] sm:$0xf0]  ;;  %v6386_v54 = vld [vmem:[%s9601_s8 + $0x1a0] sm:$0xf0] }
 0x15f   :  { %v5255_v44 = vor.u32 %v6314_v38, %v5252_v40  ;;  %v5498_v38 = vld [vmem:[%s9601_s8 + $0x150] sm:$0xf] }
 0x160   :  { %5198 = vmatmul.msk.bf16.vlgmr.msra.gmra.mxu0 %vm1267_vm0, %v1674_v41  ;;  %5199 = vmatmul.msk.bf16.vlgmr.msra.gmra.mxu2 %vm1267_vm0, %v1674_v41  ;;  %v5258_v41 = vld [vmem:[%s9598_s6 + $0x68] sm:$0xf] }
 0x161   :  { %v5259_v45 = vor.u32 %v6317_v43, %v5258_v41  ;;  %2315 = vmatpush.bf16.msrb.mxu2 %v5251_v33  ;;  %2329 = vmatpush.bf16.msra.mxu3 %v5255_v44  ;;  %v6379_v33 = vld [vmem:[%s9601_s8 + $0x168] sm:$0xf0]  ;;  %v5750_v41 = vld [vmem:[%s9601_s8 + $0x348] sm:$0xf] }
 0x162   :  { %v5499_v44 = vor.u32 %v6379_v33, %v5498_v38 }
 0x165   :  { %2316 = vmatpush.bf16.msrb.mxu2 %v5235_v59  ;;  %2330 = vmatpush.bf16.msra.mxu3 %v5239_v1 }
 0x169   :  { %v1993_v7 = vpop.f32.mrf.mxu3 }
 0x16a   :  { %v1994_v21 = vadd.f32 %v1993_v7, %v1727_v6  ;;  %v6308_v7 = vld [vmem:[%s9598_s6 + $0x2c] sm:$0xf0] }
 0x16b   :  { %v5219_v12 = vor.u32 %v6308_v7, %v5218_v5  ;;  %v6365_v7 = vld [vmem:[%s9601_s8 + $0xf8] sm:$0xf0] }
 0x16d   :  { %2317 = vmatpush.bf16.msrb.mxu2 %v5219_v12  ;;  %v6491_v12 = vld [vmem:[%s9601_s8 + $0x4e8] sm:$0xf0] }
 0x170   :  { %2062 = vmatmul.bf16.vlgmr.msrb.gmra.mxu0 %v8096_v42  ;;  %v5322_v42 = vld [vmem:[%s9598_s6 + $0xe8] sm:$0xf] }
 0x171   :  { %v5323_v49 = vor.u32 %v6333_v47, %v5322_v42  ;;  %v1995_v60 = vpop.f32.mrf.mxu3  ;;  %v5260_v42 = vld [vmem:[%s9598_s6 + $0x78] sm:$0xf0]  ;;  %2318 = vmatpush.bf16.msrb.mxu2 %v5203_v25 }
 0x172   :  { %v5263_v48 = vor.u32 %v6315_v46, %v5260_v42  ;;  %v6442_v46 = vld [vmem:[%s9601_s8 + $0x360] sm:$0xf0] }
 0x173   :  { %2339 = vmatpush.bf16.msra.mxu0 %v5323_v49  ;;  %v1996_v49 = vadd.f32 %v1995_v60, %v1727_v6 }
 0x174   :  { %2357 = vmatpush.bf16.msrb.mxu1 %v5263_v48  ;;  %v5751_v48 = vor.u32 %v6442_v46, %v5750_v41  ;;  %v5358_v41 = vld [vmem:[%s9601_s8 + $0x38] sm:$0xf] }
 0x177   :  { %2340 = vmatpush.bf16.msra.mxu0 %v5307_v3  ;;  %v6311_v3 = vld [vmem:[%s9598_s6 + $0x4c] sm:$0xf] }
 0x178   :  { %v5247_v6 = vor.u32 %v6311_v3, %v5244_v4  ;;  %v6002_v3 = vld [vmem:[%s9601_s8 + $0x540] sm:$0xf]  ;;  %v6505_v4 = vld [vmem:[%s9601_s8 + $0x558] sm:$0xf0] }
 0x17a   :  { %2358 = vmatpush.bf16.msrb.mxu1 %v5247_v6  ;;  %v5442_v6 = vld [vmem:[%s9601_s8 + $0xe0] sm:$0xf] }
 0x17b   :  { %2341 = vmatpush.bf16.msra.mxu0 %v5291_v17  ;;  %v5228_v17 = vld [vmem:[%s9598_s6 + $0x38] sm:$0xf0] }
 0x17c   :  { %v2007_v13 = vpop.f32.mrf.mxu1  ;;  %v5231_v20 = vor.u32 %v6307_v52, %v5228_v17  ;;  %v5414_v17 = vld [vmem:[%s9601_s8 + $0xa8] sm:$0xf] }
 0x17d   :  { %v2008_v28 = vadd.f32 %v2007_v13, %v1994_v21  ;;  %v5223_v13 = vor.u32 %v6306_v9, %v5220_v10  ;;  %v6302_v21 = vld [vmem:[%s9598_s6 + $0x4] sm:$0xf]  ;;  %v6003_v9 = vor.u32 %v6505_v4, %v6002_v3  ;;  %v6376_v3 = vld [vmem:[%s9601_s8 + $0x154] sm:$0xf] }
 0x17e   :  { %v5207_v29 = vor.u32 %v6302_v21, %v5204_v22  ;;  %2359 = vmatpush.bf16.msrb.mxu1 %v5231_v20  ;;  %v6358_v21 = vld [vmem:[%s9601_s8 + $0xc0] sm:$0xf0]  ;;  %v5918_v22 = vld [vmem:[%s9601_s8 + $0x498] sm:$0xf]  ;;  %v6432_v4 = vld [vmem:[%s9601_s8 + $0x314] sm:$0xf] }
 0x17f   :  { %2342 = vmatpush.bf16.msra.mxu0 %v5275_v30  ;;  %2331 = vmatpush.bf16.msra.mxu3 %v5223_v13  ;;  %v5211_v30 = vor.u32 %v6305_v26, %v5210_v23  ;;  %v6484_v23 = vld [vmem:[%s9601_s8 + $0x4b0] sm:$0xf0]  ;;  %v5667_v26 = vor.u32 %v6421_v55, %v5666_v18  ;;  %v5415_v8 = vor.u32 %v6358_v21, %v5414_v17  ;;  %v5696_v17 = vld [vmem:[%s9601_s8 + $0x2f4] sm:$0xf0]  ;;  %v6355_v55 = vld [vmem:[%s9601_s8 + $0xac] sm:$0xf] }
 0x182   :  { %2360 = vmatpush.bf16.msrb.mxu1 %v5215_v31 }
 0x183   :  { %2343 = vmatpush.bf16.msra.mxu0 %v5259_v45  ;;  %2332 = vmatpush.bf16.msra.mxu3 %v5207_v29  ;;  %v5470_v45 = vld [vmem:[%s9601_s8 + $0x118] sm:$0xf]  ;;  %v5890_v29 = vld [vmem:[%s9601_s8 + $0x460] sm:$0xf] }
 0x184   :  { %v2009_v47 = vpop.f32.mrf.mxu1 }
 0x185   :  { %v2010_v0 = vadd.f32 %v2009_v47, %v1996_v49  ;;  %v6372_v47 = vld [vmem:[%s9601_s8 + $0x130] sm:$0xf0]  ;;  %v5722_v49 = vld [vmem:[%s9601_s8 + $0x310] sm:$0xf] }
 0x186   :  { %v5723_v61 = vor.u32 %v6435_v51, %v5722_v49  ;;  %v5471_v1 = vor.u32 %v6372_v47, %v5470_v45  ;;  %3547 = vmatpush.bf16.msra.mxu1 %v6003_v9  ;;  %v2097_v45 = vld [vmem:[%s9602_s1 + $0x8] sm:$0xff]  ;;  %v5472_v9 = vld [vmem:[%s9601_s8 + $0x134] sm:$0xf0] }
 0x187   :  { %2344 = vmatpush.bf16.msra.mxu0 %v5243_v2  ;;  %3512 = vmatpush.bf16.msrb.mxu3 %v5751_v48  ;;  %v6428_v2 = vld [vmem:[%s9601_s8 + $0x2f0] sm:$0xf0]  ;;  %v6383_v51 = vld [vmem:[%s9601_s8 + $0x18c] sm:$0xf] }
 0x188   :  { %v5695_v50 = vor.u32 %v6428_v2, %v5694_v63  ;;  %v5752_v63 = vld [vmem:[%s9601_s8 + $0x364] sm:$0xf0] }
 0x189   :  { %v2049_v24 = vpop.f32.mrf.mxu3 }
 0x18b   :  { %2345 = vmatpush.bf16.msra.mxu0 %v5227_v16  ;;  %3513 = vmatpush.bf16.msrb.mxu3 %v5723_v61  ;;  %v5443_v16 = vor.u32 %v6365_v7, %v5442_v6  ;;  %v6369_v7 = vld [vmem:[%s9601_s8 + $0x11c] sm:$0xf] }
 0x18f   :  { %2346 = vmatpush.bf16.msra.mxu0 %v5211_v30  ;;  %3514 = vmatpush.bf16.msrb.mxu3 %v5695_v50  ;;  %v6477_v30 = vld [vmem:[%s9601_s8 + $0x478] sm:$0xf0]  ;;  %v5582_v50 = vld [vmem:[%s9601_s8 + $0x1f8] sm:$0xf] }
 0x191   :  { %v2051_v43 = vpop.f32.mrf.mxu3 }
 0x193   :  { %3526 = vmatpush.bf16.msrb.mxu0 %v5975_v62  ;;  %3515 = vmatpush.bf16.msrb.mxu3 %v5667_v26  ;;  %v6439_v62 = vld [vmem:[%s9601_s8 + $0x34c] sm:$0xf]  ;;  %v6393_v26 = vld [vmem:[%s9601_s8 + $0x1d8] sm:$0xf0] }
 0x1b7   :  { %v2077_v34 = vpop.f32.mrf.mxu1 }
 0x1bd   :  { %v2021_v19 = vpop.f32.mrf.mxu2 }
 0x1be   :  { %v2022_v35 = vadd.f32 %v2021_v19, %v2008_v28  ;;  %v1728_v28 = vperm.slane %v8239_v56, 1  ;;  %v5526_v56 = vld [vmem:[%s9601_s8 + $0x188] sm:$0xf] }
 0x1bf   :  { %v2079_v10 = vpop.f32.mrf.mxu1 }
 0x1c0   :  { %v2050_v32 = vadd.f32 %v2049_v24, %v1728_v28  ;;  %v5919_v24 = vor.u32 %v6484_v23, %v5918_v22  ;;  %v5834_v22 = vld [vmem:[%s9601_s8 + $0x3f0] sm:$0xf]  ;;  %v6463_v23 = vld [vmem:[%s9601_s8 + $0x408] sm:$0xf0] }
 0x1c5   :  { %v2023_v58 = vpop.f32.mrf.mxu2 }
 0x1c6   :  { %v2024_v11 = vadd.f32 %v2023_v58, %v2010_v0  ;;  %v2052_v58 = vadd.f32 %v2051_v43, %v1728_v28  ;;  %v6414_v28 = vld [vmem:[%s9601_s8 + $0x280] sm:$0xf0]  ;;  %v6344_v43 = vld [vmem:[%s9601_s8 + $0x50] sm:$0xf0] }
 0x1c7   :  { %v5359_v47 = vor.u32 %v6344_v43, %v5358_v41  ;;  %v5948_v41 = vld [vmem:[%s9601_s8 + $0x4ec] sm:$0xf0] }
 0x1dd   :  { %v2035_v39 = vpop.f32.mrf.mxu0 }
 0x1de   :  { %v8332_v37 = vadd.f32 %v2035_v39, %v2022_v35  ;;  %v5527_v39 = vor.u32 %v6386_v54, %v5526_v56  ;;  %v5862_v56 = vld [vmem:[%s9601_s8 + $0x428] sm:$0xf]  ;;  %v6470_v54 = vld [vmem:[%s9601_s8 + $0x440] sm:$0xf0] }
 0x1e0   :  { %4170 = vst [vmem:[%s9600_s11] sm:$0xff] %v8332_v37  ;;  %3498 = vmatpush.bf16.msra.mxu2 %v5527_v39  ;;  %v6407_v39 = vld [vmem:[%s9601_s8 + $0x248] sm:$0xf0] }
 0x1e3   :  { %v2091_v60 = vpop.f32.mrf.mxu2 }
 0x1e4   :  { %3499 = vmatpush.bf16.msra.mxu2 %v5499_v44  ;;  %v5863_v44 = vor.u32 %v6470_v54, %v5862_v56  ;;  %v5806_v56 = vld [vmem:[%s9601_s8 + $0x3b8] sm:$0xf]  ;;  %v6456_v54 = vld [vmem:[%s9601_s8 + $0x3d0] sm:$0xf0] }
 0x1e5   :  { %v2037_v15 = vpop.f32.mrf.mxu0 }
 0x1e6   :  { %v8398_v19 = vadd.f32 %v2037_v15, %v2024_v11  ;;  %v5946_v11 = vld [vmem:[%s9601_s8 + $0x4d0] sm:$0xf] }
 0x1e7   :  { %v5947_v52 = vor.u32 %v6491_v12, %v5946_v11  ;;  %v5475_v11 = vor.u32 %v6369_v7, %v5472_v9  ;;  %v6362_v12 = vld [vmem:[%s9601_s8 + $0xe4] sm:$0xf]  ;;  %v5556_v9 = vld [vmem:[%s9601_s8 + $0x1dc] sm:$0xf0] }
 0x1e8   :  { %4172 = vst [vmem:[%s9600_s11 + $0x10] sm:$0xff] %v8398_v19  ;;  %3500 = vmatpush.bf16.msra.mxu2 %v5471_v1  ;;  %v5531_v1 = vor.u32 %v6383_v51, %v5528_v53  ;;  %v5612_v51 = vld [vmem:[%s9601_s8 + $0x24c] sm:$0xf0]  ;;  %v6390_v7 = vld [vmem:[%s9601_s8 + $0x1c4] sm:$0xf] }
 0x1e9   :  { %3527 = vmatpush.bf16.msrb.mxu0 %v5947_v52  ;;  %v6400_v52 = vld [vmem:[%s9601_s8 + $0x210] sm:$0xf0] }
 0x1eb   :  { %v2093_v15 = vpop.f32.mrf.mxu2 }
 0x1ec   :  { %3501 = vmatpush.bf16.msra.mxu2 %v5443_v16  ;;  %v5583_v16 = vor.u32 %v6400_v52, %v5582_v50  ;;  %v5836_v50 = vld [vmem:[%s9601_s8 + $0x40c] sm:$0xf0] }
 0x1ed   :  { %v2063_v35 = vpop.f32.mrf.mxu0  ;;  %3528 = vmatpush.bf16.msrb.mxu0 %v5919_v24  ;;  %v5835_v24 = vor.u32 %v6463_v23, %v5834_v22 }
 0x1ee   :  { %v2064_v36 = vadd.f32 %v2063_v35, %v2050_v32  ;;  %v5386_v32 = vld [vmem:[%s9601_s8 + $0x70] sm:$0xf]  ;;  %v5891_v35 = vor.u32 %v6477_v30, %v5890_v29  ;;  %v6495_v29 = vld [vmem:[%s9601_s8 + $0x50c] sm:$0xf]  ;;  %v5976_v30 = vld [vmem:[%s9601_s8 + $0x524] sm:$0xf0] }
 0x1f0   :  { %v2078_v40 = vadd.f32 %v2077_v34, %v2064_v36  ;;  %v6351_v34 = vld [vmem:[%s9601_s8 + $0x88] sm:$0xf0]  ;;  %v5639_v36 = vor.u32 %v6414_v28, %v5638_v27  ;;  %3502 = vmatpush.bf16.msra.mxu2 %v5415_v8  ;;  %v6418_v27 = vld [vmem:[%s9601_s8 + $0x2a4] sm:$0xf]  ;;  %v5668_v28 = vld [vmem:[%s9601_s8 + $0x2bc] sm:$0xf0] }
 0x1f1   :  { %v5387_v38 = vor.u32 %v6351_v34, %v5386_v32  ;;  %3529 = vmatpush.bf16.msrb.mxu0 %v5891_v35  ;;  %v5979_v32 = vor.u32 %v6495_v29, %v5976_v30  ;;  %v6348_v34 = vld [vmem:[%s9601_s8 + $0x74] sm:$0xf]  ;;  %v5388_v35 = vld [vmem:[%s9601_s8 + $0x8c] sm:$0xf0] }
 0x1f2   :  { %v2092_v42 = vadd.f32 %v2091_v60, %v2078_v40  ;;  %v5610_v60 = vld [vmem:[%s9601_s8 + $0x230] sm:$0xf]  ;;  %v2096_v40 = vld [vmem:[%s9602_s1] sm:$0xff]  ;;  %3516 = vmatpush.bf16.msrb.mxu3 %v5639_v36  ;;  %v5391_v36 = vor.u32 %v6348_v34, %v5388_v35 }
 0x1f3   :  { %v5611_v46 = vor.u32 %v6407_v39, %v5610_v60  ;;  %v6411_v60 = vld [vmem:[%s9601_s8 + $0x26c] sm:$0xf]  ;;  %v5640_v39 = vld [vmem:[%s9601_s8 + $0x284] sm:$0xf0]  ;;  %v5534_v34 = vld [vmem:[%s9601_s8 + $0x190] sm:$0xf] }
 0x1f4   :  { %v2098_v59 = vmul.f32 0.5, %v2092_v42  ;;  %4171 = vst [vmem:[%s9600_s11 + $0x8] sm:$0xff] %v2092_v42  ;;  %3503 = vmatpush.bf16.msra.mxu2 %v5387_v38  ;;  %v5807_v38 = vor.u32 %v6456_v54, %v5806_v56  ;;  %v6387_v56 = vld [vmem:[%s9601_s8 + $0x1a8] sm:$0xf0]  ;;  %v5758_v54 = vld [vmem:[%s9601_s8 + $0x350] sm:$0xf] }
 0x1f5   :  { %v2065_v0 = vpop.f32.mrf.mxu0  ;;  %3530 = vmatpush.bf16.msrb.mxu0 %v5863_v44  ;;  %v6341_v44 = vld [vmem:[%s9601_s8 + $0x3c] sm:$0xf] }
 0x1f6   :  { %v2066_v5 = vadd.f32 %v2065_v0, %v2052_v58  ;;  %v2100_v13 = vmul.f32 1.442695, %v2098_v59  ;;  %v6337_v58 = vld [vmem:[%s9601_s8 + $0x18] sm:$0xf0]  ;;  %3517 = vmatpush.bf16.msrb.mxu3 %v5611_v46 }
 0x1f7   :  { %v5331_v2 = vor.u32 %v6337_v58, %v5330_v57  ;;  %v6481_v57 = vld [vmem:[%s9601_s8 + $0x49c] sm:$0xf]  ;;  %v5920_v58 = vld [vmem:[%s9601_s8 + $0x4b4] sm:$0xf0] }
 0x1f8   :  { %v2080_v14 = vadd.f32 %v2079_v10, %v2066_v5  ;;  %6509 = vpow2.f32 %v2100_v13  ;;  %3504 = vmatpush.bf16.msra.mxu2 %v5359_v47  ;;  %v5724_v5 = vld [vmem:[%s9601_s8 + $0x32c] sm:$0xf0]  ;;  %v5444_v13 = vld [vmem:[%s9601_s8 + $0xfc] sm:$0xf0]  ;;  %v6449_v47 = vld [vmem:[%s9601_s8 + $0x398] sm:$0xf0] }
 0x1f9   :  { %v5727_v10 = vor.u32 %v6432_v4, %v5724_v5  ;;  %3531 = vmatpush.bf16.msrb.mxu0 %v5835_v24  ;;  %v6474_v4 = vld [vmem:[%s9601_s8 + $0x464] sm:$0xf]  ;;  %v5892_v5 = vld [vmem:[%s9601_s8 + $0x47c] sm:$0xf0] }
 0x1fa   :  { %v2094_v20 = vadd.f32 %v2093_v15, %v2080_v14  ;;  %v5447_v14 = vor.u32 %v6362_v12, %v5444_v13  ;;  %v6425_v15 = vld [vmem:[%s9601_s8 + $0x2dc] sm:$0xf]  ;;  %3518 = vmatpush.bf16.msrb.mxu3 %v5583_v16  ;;  %v5864_v12 = vld [vmem:[%s9601_s8 + $0x444] sm:$0xf0]  ;;  %v5808_v16 = vld [vmem:[%s9601_s8 + $0x3d4] sm:$0xf0] }
 0x1fb   :  { %v5699_v18 = vor.u32 %v6425_v15, %v5696_v17  ;;  %v6453_v15 = vld [vmem:[%s9601_s8 + $0x3bc] sm:$0xf] }
 0x1fc   :  { %v2099_v25 = vmul.f32 0.5, %v2094_v20  ;;  %4173 = vst [vmem:[%s9600_s11 + $0x18] sm:$0xff] %v2094_v20  ;;  %3505 = vmatpush.bf16.msra.mxu2 %v5331_v2  ;;  %v5416_v20 = vld [vmem:[%s9601_s8 + $0xc4] sm:$0xf0]  ;;  %v5811_v17 = vor.u32 %v6453_v15, %v5808_v16 }
 0x1fd   :  { %v5419_v21 = vor.u32 %v6355_v55, %v5416_v20  ;;  %3532 = vmatpush.bf16.msrb.mxu0 %v5807_v38  ;;  %v5780_v55 = vld [vmem:[%s9601_s8 + $0x39c] sm:$0xf0]  ;;  %v6443_v38 = vld [vmem:[%s9601_s8 + $0x368] sm:$0xf0]  ;;  %v5450_v16 = vld [vmem:[%s9601_s8 + $0xe8] sm:$0xf] }
 0x1fe   :  { %v2102_v31 = vmul.f32 1.442695, %v2099_v25  ;;  %v6510_v33 = vpop.eup %6509  ;;  %v5554_v25 = vld [vmem:[%s9601_s8 + $0x1c0] sm:$0xf] }
 0x1ff   :  { %v2104_v42 = vmul.f32 %v6510_v33, %v2096_v40  ;;  %v5555_v8 = vor.u32 %v6393_v26, %v5554_v25  ;;  %v5643_v33 = vor.u32 %v6411_v60, %v5640_v39  ;;  %v6488_v40 = vld [vmem:[%s9601_s8 + $0x4d4] sm:$0xf]  ;;  %v2141_v20 = vld [vmem:[%s9603_s7] sm:$0xf] }
 0x200   :  { %6511 = vpow2.f32 %v2102_v31  ;;  %v5671_v31 = vor.u32 %v6418_v27, %v5668_v28  ;;  %v5951_v43 = vor.u32 %v6488_v40, %v5948_v41  ;;  %v2145_v24 = vperm.slane %v2141_v20, 2  ;;  %v5506_v41 = vld [vmem:[%s9601_s8 + $0x158] sm:$0xf] }
 0x201   :  { %v2106_v59 = vadd.f32 %v2104_v42, %v8332_v37  ;;  %v5500_v37 = vld [vmem:[%s9601_s8 + $0x16c] sm:$0xf0]  ;;  %3519 = vmatpush.bf16.msrb.mxu3 %v5555_v8  ;;  %v5778_v42 = vld [vmem:[%s9601_s8 + $0x380] sm:$0xf]  ;;  %v2146_v25 = vperm.slane %v2141_v20, 3  ;;  %v2143_v29 = vperm.slane %v2141_v20, 0 }
 0x202   :  { %v5503_v6 = vor.u32 %v6376_v3, %v5500_v37  ;;  %v6397_v3 = vld [vmem:[%s9601_s8 + $0x1fc] sm:$0xf]  ;;  %v5584_v37 = vld [vmem:[%s9601_s8 + $0x214] sm:$0xf0]  ;;  %v2144_v30 = vperm.slane %v2141_v20, 1 }
 0x206   :  { %v6512_v48 = vpop.eup %6511 }
 0x207   :  { %v2105_v49 = vmul.f32 %v6512_v48, %v2097_v45  ;;  %v5360_v45 = vld [vmem:[%s9601_s8 + $0x54] sm:$0xf0]  ;;  %v5779_v48 = vor.u32 %v6449_v47, %v5778_v42  ;;  %v6380_v42 = vld [vmem:[%s9601_s8 + $0x170] sm:$0xf0] }
 0x208   :  { %v5363_v46 = vor.u32 %v6341_v44, %v5360_v45  ;;  %v5535_v45 = vor.u32 %v6387_v56, %v5534_v34  ;;  %v5730_v47 = vld [vmem:[%s9601_s8 + $0x318] sm:$0xf]  ;;  %v6408_v56 = vld [vmem:[%s9601_s8 + $0x250] sm:$0xf0] }
 0x209   :  { %v2107_v61 = vadd.f32 %v2105_v49, %v8398_v19  ;;  %v5755_v19 = vor.u32 %v6439_v62, %v5752_v63  ;;  %v6404_v49 = vld [vmem:[%s9601_s8 + $0x234] sm:$0xf]  ;;  %3533 = vmatpush.bf16.msrb.mxu0 %v5779_v48  ;;  %v5332_v62 = vld [vmem:[%s9601_s8 + $0x1c] sm:$0xf0]  ;;  %v6502_v63 = vld [vmem:[%s9601_s8 + $0x544] sm:$0xf] }
 0x20a   :  { %v5615_v53 = vor.u32 %v6404_v49, %v5612_v51  ;;  %v6436_v48 = vld [vmem:[%s9601_s8 + $0x330] sm:$0xf0]  ;;  %v5394_v34 = vld [vmem:[%s9601_s8 + $0x78] sm:$0xf] }
 0x20b   :  { %v2108_v0 = vpack.c.bf16 %v2107_v61, %v2106_v59  ;;  %v5923_v59 = vor.u32 %v6481_v57, %v5920_v58  ;;  %v6334_v61 = vld [vmem:[%s9601_s8 + $0x4] sm:$0xf] }
 0x20d   :  { %2319 = vmatmul.bf16.vlgmr.msrb.gmra.mxu2 %v2108_v0  ;;  %2333 = vmatmul.bf16.vlgmr.msra.gmra.mxu3 %v2108_v0 }
 0x20e   :  { %2347 = vmatmul.bf16.vlgmr.msra.gmra.mxu0 %v2108_v0  ;;  %2361 = vmatmul.bf16.vlgmr.msrb.gmra.mxu1 %v2108_v0  ;;  %v5335_v0 = vor.u32 %v6334_v61, %v5332_v62  ;;  %v5982_v61 = vld [vmem:[%s9601_s8 + $0x510] sm:$0xf]  ;;  %v5507_v62 = vor.u32 %v6380_v42, %v5506_v41 }
 0x20f   :  { %3554 = vmatpush.bf16.msrb.mxu1 %v5531_v1  ;;  %3568 = vmatpush.bf16.msrb.mxu2 %v5755_v19  ;;  %v6004_v1 = vld [vmem:[%s9601_s8 + $0x55c] sm:$0xf0]  ;;  %v5587_v19 = vor.u32 %v6397_v3, %v5584_v37 }
 0x210   :  { %3582 = vmatpush.bf16.msra.mxu3 %v5979_v32  ;;  %v6007_v2 = vor.u32 %v6502_v63, %v6004_v1  ;;  %v5731_v63 = vor.u32 %v6436_v48, %v5730_v47  ;;  %v6010_v1 = vld [vmem:[%s9601_s8 + $0x548] sm:$0xf]  ;;  %v5842_v48 = vld [vmem:[%s9601_s8 + $0x3f8] sm:$0xf] }
 0x212   :  { %3603 = vmatpush.bf16.msra.mxu0 %v6007_v2  ;;  %v6506_v2 = vld [vmem:[%s9601_s8 + $0x560] sm:$0xf0] }
 0x213   :  { %3555 = vmatpush.bf16.msrb.mxu1 %v5503_v6  ;;  %3569 = vmatpush.bf16.msrb.mxu2 %v5727_v10  ;;  %v5895_v6 = vor.u32 %v6474_v4, %v5892_v5  ;;  %v5559_v10 = vor.u32 %v6390_v7, %v5556_v9  ;;  %v5478_v5 = vld [vmem:[%s9601_s8 + $0x120] sm:$0xf]  ;;  %v6429_v9 = vld [vmem:[%s9601_s8 + $0x2f8] sm:$0xf0] }
 0x214   :  { %3583 = vmatpush.bf16.msra.mxu3 %v5951_v43  ;;  %v5702_v7 = vld [vmem:[%s9601_s8 + $0x2e0] sm:$0xf] }
 0x215   :  { %v5703_v15 = vor.u32 %v6429_v9, %v5702_v7  ;;  %v6457_v7 = vld [vmem:[%s9601_s8 + $0x3d8] sm:$0xf0]  ;;  %v6370_v9 = vld [vmem:[%s9601_s8 + $0x124] sm:$0xf] }
 0x217   :  { %3556 = vmatpush.bf16.msrb.mxu1 %v5475_v11  ;;  %3570 = vmatpush.bf16.msrb.mxu2 %v5699_v18  ;;  %v6467_v11 = vld [vmem:[%s9601_s8 + $0x42c] sm:$0xf]  ;;  %v6446_v18 = vld [vmem:[%s9601_s8 + $0x384] sm:$0xf] }
 0x218   :  { %3584 = vmatpush.bf16.msra.mxu3 %v5923_v59  ;;  %v5867_v13 = vor.u32 %v6467_v11, %v5864_v12  ;;  %v5783_v23 = vor.u32 %v6446_v18, %v5780_v55  ;;  %v5674_v18 = vld [vmem:[%s9601_s8 + $0x2a8] sm:$0xf]  ;;  %v6422_v55 = vld [vmem:[%s9601_s8 + $0x2c0] sm:$0xf0] }
 0x21b   :  { %3557 = vmatpush.bf16.msrb.mxu1 %v5447_v14  ;;  %3571 = vmatpush.bf16.msrb.mxu2 %v5671_v31  ;;  %v6460_v14 = vld [vmem:[%s9601_s8 + $0x3f4] sm:$0xf] }
 0x21c   :  { %3585 = vmatpush.bf16.msra.mxu3 %v5895_v6  ;;  %v5839_v52 = vor.u32 %v6460_v14, %v5836_v50  ;;  %v6373_v6 = vld [vmem:[%s9601_s8 + $0x138] sm:$0xf0]  ;;  %v5954_v14 = vld [vmem:[%s9601_s8 + $0x4d8] sm:$0xf]  ;;  %v6492_v50 = vld [vmem:[%s9601_s8 + $0x4f0] sm:$0xf0] }
 0x21d   :  { %v5955_v20 = vor.u32 %v6492_v50, %v5954_v14 }
 0x21f   :  { %3558 = vmatpush.bf16.msrb.mxu1 %v5419_v21  ;;  %3572 = vmatpush.bf16.msrb.mxu2 %v5643_v33 }
 0x220   :  { %3586 = vmatpush.bf16.msra.mxu3 %v5867_v13  ;;  %v6011_v13 = vor.u32 %v6506_v2, %v6010_v1  ;;  %v6394_v1 = vld [vmem:[%s9601_s8 + $0x1e0] sm:$0xf0]  ;;  %v6440_v2 = vld [vmem:[%s9601_s8 + $0x354] sm:$0xf] }
 0x223   :  { %3559 = vmatpush.bf16.msrb.mxu1 %v5391_v36  ;;  %3573 = vmatpush.bf16.msrb.mxu2 %v5615_v53 }
 0x224   :  { %3587 = vmatpush.bf16.msra.mxu3 %v5839_v52  ;;  %v5479_v52 = vor.u32 %v6373_v6, %v5478_v5  ;;  %v5984_v5 = vld [vmem:[%s9601_s8 + $0x52c] sm:$0xf0]  ;;  %v5814_v6 = vld [vmem:[%s9601_s8 + $0x3c0] sm:$0xf] }
 0x227   :  { %3560 = vmatpush.bf16.msrb.mxu1 %v5363_v46  ;;  %3574 = vmatpush.bf16.msrb.mxu2 %v5587_v19  ;;  %v5759_v46 = vor.u32 %v6443_v38, %v5758_v54  ;;  %v5870_v38 = vld [vmem:[%s9601_s8 + $0x430] sm:$0xf] }
 0x228   :  { %3588 = vmatpush.bf16.msra.mxu3 %v5811_v17  ;;  %v6366_v17 = vld [vmem:[%s9601_s8 + $0x100] sm:$0xf0] }
 0x22b   :  { %3561 = vmatpush.bf16.msrb.mxu1 %v5335_v0  ;;  %3575 = vmatpush.bf16.msrb.mxu2 %v5559_v10  ;;  %v6499_v0 = vld [vmem:[%s9601_s8 + $0x528] sm:$0xf0] }
 0x22c   :  { %3589 = vmatpush.bf16.msra.mxu3 %v5783_v23  ;;  %v5983_v12 = vor.u32 %v6499_v0, %v5982_v61  ;;  %v5451_v23 = vor.u32 %v6366_v17, %v5450_v16  ;;  %v5562_v0 = vld [vmem:[%s9601_s8 + $0x1c8] sm:$0xf]  ;;  %v5732_v16 = vld [vmem:[%s9601_s8 + $0x334] sm:$0xf0]  ;;  %v5815_v17 = vor.u32 %v6457_v7, %v5814_v6  ;;  %v6461_v7 = vld [vmem:[%s9601_s8 + $0x3fc] sm:$0xf] }
 0x22d   :  { %v5563_v14 = vor.u32 %v6394_v1, %v5562_v0  ;;  %v6342_v1 = vld [vmem:[%s9601_s8 + $0x44] sm:$0xf]  ;;  %v5620_v6 = vld [vmem:[%s9601_s8 + $0x254] sm:$0xf0] }
 0x28b   :  { %v2348_v21 = vpop.f32.mrf.mxu0  ;;  %v2362_v22 = vpop.f32.mrf.mxu1 }
 0x28c   :  { %v2349_v8 = vadd.f32 %v2348_v21, %v2145_v24  ;;  %v2363_v28 = vadd.f32 %v2362_v22, %v2146_v25  ;;  %v5926_v21 = vld [vmem:[%s9601_s8 + $0x4a0] sm:$0xf]  ;;  %v6485_v22 = vld [vmem:[%s9601_s8 + $0x4b8] sm:$0xf0] }
 0x28e   :  { %v2369_v60 = vmax.f32 %v2349_v8, 0.0  ;;  %v2370_v39 = vmax.f32 %v2363_v28, 0.0  ;;  %v6415_v8 = vld [vmem:[%s9601_s8 + $0x288] sm:$0xf0]  ;;  %v5927_v28 = vor.u32 %v6485_v22, %v5926_v21  ;;  %v5786_v21 = vld [vmem:[%s9601_s8 + $0x388] sm:$0xf] }
 0x28f   :  { %v6450_v22 = vld [vmem:[%s9601_s8 + $0x3a0] sm:$0xf0] }
 0x290   :  { %v2320_v26 = vpop.f32.mrf.mxu2  ;;  %v2334_v27 = vpop.f32.mrf.mxu3 }
 0x291   :  { %v2321_v43 = vadd.f32 %v2320_v26, %v2143_v29  ;;  %v2335_v44 = vadd.f32 %v2334_v27, %v2144_v30  ;;  %v6359_v26 = vld [vmem:[%s9601_s8 + $0xc8] sm:$0xf0]  ;;  %v5646_v27 = vld [vmem:[%s9601_s8 + $0x270] sm:$0xf] }
 0x293   :  { %v2350_v31 = vpop.f32.mrf.mxu0  ;;  %v2364_v32 = vpop.f32.mrf.mxu1  ;;  %v2367_v3 = vmax.f32 %v2321_v43, 0.0  ;;  %v2368_v37 = vmax.f32 %v2335_v44, 0.0  ;;  %v5366_v43 = vld [vmem:[%s9601_s8 + $0x40] sm:$0xf]  ;;  %v6345_v44 = vld [vmem:[%s9601_s8 + $0x58] sm:$0xf0] }
 0x294   :  { %v2351_v35 = vadd.f32 %v2350_v31, %v2145_v24  ;;  %v2365_v36 = vadd.f32 %v2364_v32, %v2146_v25  ;;  %v5675_v24 = vor.u32 %v6422_v55, %v5674_v18  ;;  %v5422_v25 = vld [vmem:[%s9601_s8 + $0xb0] sm:$0xf]  ;;  %v5647_v32 = vor.u32 %v6415_v8, %v5646_v27  ;;  %v6489_v55 = vld [vmem:[%s9601_s8 + $0x4dc] sm:$0xf] }
 0x295   :  { %v5423_v31 = vor.u32 %v6359_v26, %v5422_v25  ;;  %v6503_v25 = vld [vmem:[%s9601_s8 + $0x54c] sm:$0xf]  ;;  %v6012_v26 = vld [vmem:[%s9601_s8 + $0x564] sm:$0xf0] }
 0x296   :  { %v2373_v33 = vmax.f32 %v2351_v35, 0.0  ;;  %v2374_v40 = vmax.f32 %v2365_v36, 0.0  ;;  %v6352_v35 = vld [vmem:[%s9601_s8 + $0x90] sm:$0xf0]  ;;  %v5618_v36 = vld [vmem:[%s9601_s8 + $0x238] sm:$0xf] }
 0x297   :  { %v5619_v41 = vor.u32 %v6408_v56, %v5618_v36  ;;  %v6356_v36 = vld [vmem:[%s9601_s8 + $0xb4] sm:$0xf]  ;;  %v5424_v56 = vld [vmem:[%s9601_s8 + $0xcc] sm:$0xf0] }
 0x298   :  { %v8764_v49 = vpack.c.bf16 %v2373_v33, %v2369_v60  ;;  %v8766_v51 = vpack.c.bf16 %v2374_v40, %v2370_v39  ;;  %v2322_v53 = vpop.f32.mrf.mxu2  ;;  %v2336_v57 = vpop.f32.mrf.mxu3  ;;  %v6471_v60 = vld [vmem:[%s9601_s8 + $0x448] sm:$0xf0]  ;;  %v6384_v39 = vld [vmem:[%s9601_s8 + $0x194] sm:$0xf]  ;;  %v5536_v33 = vld [vmem:[%s9601_s8 + $0x1ac] sm:$0xf0]  ;;  %v5395_v40 = vor.u32 %v6352_v35, %v5394_v34  ;;  %v6015_v35 = vor.u32 %v6503_v25, %v6012_v26 }
 0x299   :  { %v2323_v58 = vadd.f32 %v2322_v53, %v2143_v29  ;;  %v2337_v59 = vadd.f32 %v2336_v57, %v2144_v30  ;;  %v5898_v29 = vld [vmem:[%s9601_s8 + $0x468] sm:$0xf]  ;;  %v6478_v30 = vld [vmem:[%s9601_s8 + $0x480] sm:$0xf0]  ;;  %v5871_v42 = vor.u32 %v6471_v60, %v5870_v38  ;;  %v5539_v47 = vor.u32 %v6384_v39, %v5536_v33  ;;  %v6464_v53 = vld [vmem:[%s9601_s8 + $0x410] sm:$0xf0] }
 0x29a   :  { %3534 = vmatmul.bf16.vlgmr.msrb.gmra.mxu0 %v8764_v49  ;;  %6028 = vmatmul.msk.bf16.vlgmr.msra.gmra.mxu1 %vm1267_vm0, %v8766_v51  ;;  %v5899_v54 = vor.u32 %v6478_v30, %v5898_v29  ;;  %v6377_v57 = vld [vmem:[%s9601_s8 + $0x15c] sm:$0xf]  ;;  %v5787_v29 = vor.u32 %v6450_v22, %v5786_v21  ;;  %v5928_v34 = vld [vmem:[%s9601_s8 + $0x4bc] sm:$0xf0]  ;;  %v6388_v38 = vld [vmem:[%s9601_s8 + $0x1b0] sm:$0xf0] }
 0x29b   :  { %v2371_v19 = vmax.f32 %v2323_v58, 0.0  ;;  %v2372_v4 = vmax.f32 %v2337_v59, 0.0  ;;  %3610 = vmatpush.bf16.msrb.mxu0 %v5535_v45  ;;  %3624 = vmatpush.bf16.msra.mxu1 %v5759_v46  ;;  %v5590_v45 = vld [vmem:[%s9601_s8 + $0x200] sm:$0xf]  ;;  %v6401_v46 = vld [vmem:[%s9601_s8 + $0x218] sm:$0xf0]  ;;  %v5367_v59 = vor.u32 %v6345_v44, %v5366_v43  ;;  %v5427_v44 = vor.u32 %v6356_v36, %v5424_v56 }
 0x29c   :  { %v5508_v58 = vld [vmem:[%s9601_s8 + $0x174] sm:$0xf0]  ;;  %v5591_v61 = vor.u32 %v6401_v46, %v5590_v45  ;;  %v6419_v33 = vld [vmem:[%s9601_s8 + $0x2ac] sm:$0xf]  ;;  %v5900_v43 = vld [vmem:[%s9601_s8 + $0x484] sm:$0xf0] }
 0x29d   :  { %v8795_v10 = vpack.c.bf16 %v2371_v19, %v2367_v3  ;;  %v8797_v11 = vpack.c.bf16 %v2372_v4, %v2368_v37  ;;  %v5760_v3 = vld [vmem:[%s9601_s8 + $0x36c] sm:$0xf0]  ;;  %v5843_v37 = vor.u32 %v6464_v53, %v5842_v48  ;;  %v5511_v19 = vor.u32 %v6377_v57, %v5508_v58  ;;  %v6496_v4 = vld [vmem:[%s9601_s8 + $0x514] sm:$0xf]  ;;  %v6349_v46 = vld [vmem:[%s9601_s8 + $0x7c] sm:$0xf] }
 0x29e   :  { %v5763_v50 = vor.u32 %v6440_v2, %v5760_v3  ;;  %v6381_v48 = vld [vmem:[%s9601_s8 + $0x178] sm:$0xf0]  ;;  %v6412_v58 = vld [vmem:[%s9601_s8 + $0x274] sm:$0xf]  ;;  %v5368_v2 = vld [vmem:[%s9601_s8 + $0x5c] sm:$0xf0] }
 0x29f   :  { %3611 = vmatpush.bf16.msrb.mxu0 %v5507_v62  ;;  %3625 = vmatpush.bf16.msra.mxu1 %v5731_v63  ;;  %v5338_v62 = vld [vmem:[%s9601_s8 + $0x8] sm:$0xf]  ;;  %v6338_v63 = vld [vmem:[%s9601_s8 + $0x20] sm:$0xf0]  ;;  %v5592_v21 = vld [vmem:[%s9601_s8 + $0x21c] sm:$0xf0] }
 0x2a0   :  { %3506 = vmatmul.bf16.vlgmr.msra.gmra.mxu2 %v8795_v10  ;;  %3520 = vmatmul.bf16.vlgmr.msrb.gmra.mxu3 %v8797_v11  ;;  %v5486_v3 = vld [vmem:[%s9601_s8 + $0x128] sm:$0xf]  ;;  %v6454_v22 = vld [vmem:[%s9601_s8 + $0x3c4] sm:$0xf]  ;;  %v5990_v56 = vld [vmem:[%s9601_s8 + $0x518] sm:$0xf] }
 0x2a1   :  { %3638 = vmatpush.bf16.msra.mxu2 %v5983_v12  ;;  %3659 = vmatpush.bf16.msrb.mxu3 %v6011_v13  ;;  %v5480_v12 = vld [vmem:[%s9601_s8 + $0x13c] sm:$0xf0]  ;;  %v5339_v13 = vor.u32 %v6338_v63, %v5338_v62  ;;  %v5872_v62 = vld [vmem:[%s9601_s8 + $0x44c] sm:$0xf0]  ;;  %v5788_v36 = vld [vmem:[%s9601_s8 + $0x3a4] sm:$0xf0] }
 0x2a2   :  { %v5483_v18 = vor.u32 %v6370_v9, %v5480_v12  ;;  %v5844_v9 = vld [vmem:[%s9601_s8 + $0x414] sm:$0xf0]  ;;  %v5371_v12 = vor.u32 %v6342_v1, %v5368_v2  ;;  %v6423_v1 = vld [vmem:[%s9601_s8 + $0x2c8] sm:$0xf0] }
 0x2a3   :  { %3612 = vmatpush.bf16.msrb.mxu0 %v5479_v52  ;;  %3626 = vmatpush.bf16.msra.mxu1 %v5703_v15  ;;  %v5987_v52 = vor.u32 %v6496_v4, %v5984_v5  ;;  %v6433_v15 = vld [vmem:[%s9601_s8 + $0x31c] sm:$0xf] }
 0x2a4   :  { %v5735_v27 = vor.u32 %v6433_v15, %v5732_v16  ;;  %v6405_v5 = vld [vmem:[%s9601_s8 + $0x23c] sm:$0xf]  ;;  %v6367_v15 = vld [vmem:[%s9601_s8 + $0x108] sm:$0xf0] }
 0x2a5   :  { %3639 = vmatpush.bf16.msra.mxu2 %v5955_v20  ;;  %v5956_v20 = vld [vmem:[%s9601_s8 + $0x4f4] sm:$0xf0]  ;;  %v5623_v16 = vor.u32 %v6405_v5, %v5620_v6  ;;  %v5934_v5 = vld [vmem:[%s9601_s8 + $0x4a8] sm:$0xf]  ;;  %v6486_v6 = vld [vmem:[%s9601_s8 + $0x4c0] sm:$0xf0] }
 0x2a6   :  { %v5959_v8 = vor.u32 %v6489_v55, %v5956_v20  ;;  %v6444_v55 = vld [vmem:[%s9601_s8 + $0x370] sm:$0xf0]  ;;  %v6398_v20 = vld [vmem:[%s9601_s8 + $0x204] sm:$0xf] }
 0x2a7   :  { %3613 = vmatpush.bf16.msrb.mxu0 %v5451_v23  ;;  %3627 = vmatpush.bf16.msra.mxu1 %v5675_v24  ;;  %v6363_v23 = vld [vmem:[%s9601_s8 + $0xec] sm:$0xf]  ;;  %v5452_v24 = vld [vmem:[%s9601_s8 + $0x104] sm:$0xf0] }
 0x2a8   :  { %v5455_v30 = vor.u32 %v6363_v23, %v5452_v24  ;;  %v5816_v23 = vld [vmem:[%s9601_s8 + $0x3dc] sm:$0xf0] }
 0x2a9   :  { %3640 = vmatpush.bf16.msra.mxu2 %v5927_v28  ;;  %v6426_v28 = vld [vmem:[%s9601_s8 + $0x2e4] sm:$0xf] }
 0x2aa   :  { %3562 = vmatmul.bf16.vlgmr.msrb.gmra.mxu1 %v8795_v10  ;;  %6029 = vmatmul.msk.bf16.vlgmr.msra.gmra.mxu0 %vm1267_vm0, %v8766_v51 }
 0x2ab   :  { %3614 = vmatpush.bf16.msrb.mxu0 %v5423_v31  ;;  %3628 = vmatpush.bf16.msra.mxu1 %v5647_v32  ;;  %v5704_v31 = vld [vmem:[%s9601_s8 + $0x2fc] sm:$0xf0]  ;;  %v6482_v32 = vld [vmem:[%s9601_s8 + $0x4a4] sm:$0xf] }
 0x2ac   :  { %v5707_v60 = vor.u32 %v6426_v28, %v5704_v31  ;;  %v5931_v39 = vor.u32 %v6482_v32, %v5928_v34  ;;  %v5738_v28 = vld [vmem:[%s9601_s8 + $0x320] sm:$0xf]  ;;  %v6437_v31 = vld [vmem:[%s9601_s8 + $0x338] sm:$0xf0]  ;;  %v6391_v32 = vld [vmem:[%s9601_s8 + $0x1cc] sm:$0xf] }
 0x2ad   :  { %3641 = vmatpush.bf16.msra.mxu2 %v5899_v54  ;;  %v5542_v54 = vld [vmem:[%s9601_s8 + $0x198] sm:$0xf]  ;;  %v5564_v34 = vld [vmem:[%s9601_s8 + $0x1e4] sm:$0xf0] }
 0x2ae   :  { %v5543_v45 = vor.u32 %v6388_v38, %v5542_v54  ;;  %v6500_v38 = vld [vmem:[%s9601_s8 + $0x530] sm:$0xf0] }
 0x2af   :  { %3615 = vmatpush.bf16.msrb.mxu0 %v5395_v40  ;;  %3629 = vmatpush.bf16.msra.mxu1 %v5619_v41  ;;  %v5676_v40 = vld [vmem:[%s9601_s8 + $0x2c4] sm:$0xf0]  ;;  %v6475_v41 = vld [vmem:[%s9601_s8 + $0x46c] sm:$0xf] }
 0x2b0   :  { %3576 = vmatmul.bf16.vlgmr.msrb.gmra.mxu2 %v8797_v11  ;;  %3590 = vmatmul.bf16.vlgmr.msra.gmra.mxu3 %v8764_v49  ;;  %v5679_v53 = vor.u32 %v6419_v33, %v5676_v40  ;;  %v5903_v57 = vor.u32 %v6475_v41, %v5900_v43  ;;  %v5739_v33 = vor.u32 %v6437_v31, %v5738_v28  ;;  %v5402_v40 = vld [vmem:[%s9601_s8 + $0x80] sm:$0xf]  ;;  %v6353_v41 = vld [vmem:[%s9601_s8 + $0x98] sm:$0xf0] }
 0x2b1   :  { %3642 = vmatpush.bf16.msra.mxu2 %v5871_v42  ;;  %3666 = vmatpush.bf16.msra.mxu3 %v5539_v47  ;;  %v5396_v42 = vld [vmem:[%s9601_s8 + $0x94] sm:$0xf0]  ;;  %v5514_v47 = vld [vmem:[%s9601_s8 + $0x160] sm:$0xf]  ;;  %v5567_v43 = vor.u32 %v6391_v32, %v5564_v34 }
 0x2b2   :  { %v5399_v63 = vor.u32 %v6349_v46, %v5396_v42  ;;  %v5515_v0 = vor.u32 %v6381_v48, %v5514_v47  ;;  %v6430_v46 = vld [vmem:[%s9601_s8 + $0x300] sm:$0xf0]  ;;  %v5991_v42 = vor.u32 %v6500_v38, %v5990_v56  ;;  %v6385_v48 = vld [vmem:[%s9601_s8 + $0x19c] sm:$0xf]  ;;  %v5878_v34 = vld [vmem:[%s9601_s8 + $0x438] sm:$0xf] }
 0x2b3   :  { %3616 = vmatpush.bf16.msrb.mxu0 %v5367_v59  ;;  %3630 = vmatpush.bf16.msra.mxu1 %v5591_v61  ;;  %v5648_v59 = vld [vmem:[%s9601_s8 + $0x28c] sm:$0xf0]  ;;  %v6468_v61 = vld [vmem:[%s9601_s8 + $0x434] sm:$0xf]  ;;  %v6402_v56 = vld [vmem:[%s9601_s8 + $0x220] sm:$0xf0] }
 0x2b4   :  { %v5875_v4 = vor.u32 %v6468_v61, %v5872_v62  ;;  %v5374_v62 = vld [vmem:[%s9601_s8 + $0x48] sm:$0xf] }
 0x2b5   :  { %3643 = vmatpush.bf16.msra.mxu2 %v5843_v37  ;;  %3667 = vmatpush.bf16.msra.mxu3 %v5511_v19  ;;  %v6374_v37 = vld [vmem:[%s9601_s8 + $0x140] sm:$0xf0]  ;;  %v5651_v19 = vor.u32 %v6412_v58, %v5648_v59  ;;  %v5962_v58 = vld [vmem:[%s9601_s8 + $0x4e0] sm:$0xf]  ;;  %v6493_v59 = vld [vmem:[%s9601_s8 + $0x4f8] sm:$0xf0] }
 0x2b6   :  { %v5712_v38 = vld [vmem:[%s9601_s8 + $0x304] sm:$0xf0] }
 0x2b7   :  { %3617 = vmatpush.bf16.msrb.mxu0 %v5339_v13  ;;  %3631 = vmatpush.bf16.msra.mxu1 %v5563_v14  ;;  %v5487_v13 = vor.u32 %v6374_v37, %v5486_v3  ;;  %v6335_v14 = vld [vmem:[%s9601_s8 + $0xc] sm:$0xf]  ;;  %v5963_v3 = vor.u32 %v6493_v59, %v5962_v58  ;;  %v6378_v37 = vld [vmem:[%s9601_s8 + $0x164] sm:$0xf]  ;;  %v5992_v58 = vld [vmem:[%s9601_s8 + $0x534] sm:$0xf0] }
 0x2b9   :  { %3644 = vmatpush.bf16.msra.mxu2 %v5815_v17  ;;  %3668 = vmatpush.bf16.msra.mxu3 %v5483_v18  ;;  %v5847_v17 = vor.u32 %v6461_v7, %v5844_v9  ;;  %v5766_v18 = vld [vmem:[%s9601_s8 + $0x358] sm:$0xf]  ;;  %v5346_v9 = vld [vmem:[%s9601_s8 + $0x10] sm:$0xf] }
 0x2ba   :  { %3618 = vmatmul.bf16.vlgmr.msrb.gmra.mxu0 %v8795_v10  ;;  %3632 = vmatmul.bf16.vlgmr.msra.gmra.mxu1 %v8797_v11  ;;  %v5767_v26 = vor.u32 %v6444_v55, %v5766_v18  ;;  %v6371_v18 = vld [vmem:[%s9601_s8 + $0x12c] sm:$0xf]  ;;  %v5488_v55 = vld [vmem:[%s9601_s8 + $0x144] sm:$0xf0] }
 0x2bb   :  { %3680 = vmatpush.bf16.msra.mxu0 %v5763_v50  ;;  %3694 = vmatpush.bf16.msrb.mxu1 %v5987_v52  ;;  %v5340_v50 = vld [vmem:[%s9601_s8 + $0x24] sm:$0xf0]  ;;  %v5458_v52 = vld [vmem:[%s9601_s8 + $0xf0] sm:$0xf] }
 0x2bc   :  { %v5343_v24 = vor.u32 %v6335_v14, %v5340_v50  ;;  %v5459_v25 = vor.u32 %v6367_v15, %v5458_v52  ;;  %v6416_v14 = vld [vmem:[%s9601_s8 + $0x290] sm:$0xf0]  ;;  %v6441_v50 = vld [vmem:[%s9601_s8 + $0x35c] sm:$0xf]  ;;  %v5768_v52 = vld [vmem:[%s9601_s8 + $0x374] sm:$0xf0] }
 0x2bd   :  { %3645 = vmatpush.bf16.msra.mxu2 %v5787_v29  ;;  %3669 = vmatpush.bf16.msra.mxu3 %v5455_v30  ;;  %v5595_v29 = vor.u32 %v6398_v20, %v5592_v21  ;;  %v5819_v30 = vor.u32 %v6454_v22, %v5816_v23  ;;  %v5771_v21 = vor.u32 %v6441_v50, %v5768_v52  ;;  %v5906_v22 = vld [vmem:[%s9601_s8 + $0x470] sm:$0xf]  ;;  %v6479_v23 = vld [vmem:[%s9601_s8 + $0x488] sm:$0xf0]  ;;  %v6406_v52 = vld [vmem:[%s9601_s8 + $0x244] sm:$0xf] }
 0x2be   :  { %v5907_v28 = vor.u32 %v6479_v23, %v5906_v22  ;;  %v6451_v50 = vld [vmem:[%s9601_s8 + $0x3a8] sm:$0xf0]  ;;  %v6336_v23 = vld [vmem:[%s9601_s8 + $0x14] sm:$0xf] }
 0x2bf   :  { %3681 = vmatpush.bf16.msra.mxu0 %v5735_v27  ;;  %3695 = vmatpush.bf16.msrb.mxu1 %v5959_v8  ;;  %v5430_v27 = vld [vmem:[%s9601_s8 + $0xb8] sm:$0xf]  ;;  %v6360_v8 = vld [vmem:[%s9601_s8 + $0xd0] sm:$0xf0] }
 0x2c0   :  { %3646 = vmatmul.bf16.vlgmr.msra.gmra.mxu2 %v8764_v49  ;;  %6030 = vmatmul.msk.bf16.vlgmr.msrb.gmra.mxu3 %vm1267_vm0, %v8766_v51  ;;  %v5431_v54 = vor.u32 %v6360_v8, %v5430_v27  ;;  %v5740_v27 = vld [vmem:[%s9601_s8 + $0x33c] sm:$0xf0]  ;;  %v5491_v8 = vor.u32 %v6371_v18, %v5488_v55  ;;  %v6020_v18 = vld [vmem:[%s9601_s8 + $0x56c] sm:$0xf0] }
 0x2c1   :  { %3715 = vmatpush.bf16.msrb.mxu2 %v6015_v35  ;;  %3670 = vmatpush.bf16.msra.mxu3 %v5427_v44  ;;  %v6447_v35 = vld [vmem:[%s9601_s8 + $0x38c] sm:$0xf] }
 0x2c2   :  { %v5791_v44 = vor.u32 %v6447_v35, %v5788_v36  ;;  %v6472_v35 = vld [vmem:[%s9601_s8 + $0x450] sm:$0xf0]  ;;  %v5598_v36 = vld [vmem:[%s9601_s8 + $0x208] sm:$0xf] }
 0x2c3   :  { %3682 = vmatpush.bf16.msra.mxu0 %v5707_v60  ;;  %3696 = vmatpush.bf16.msrb.mxu1 %v5931_v39  ;;  %v6018_v60 = vld [vmem:[%s9601_s8 + $0x550] sm:$0xf]  ;;  %v6507_v39 = vld [vmem:[%s9601_s8 + $0x568] sm:$0xf0] }
 0x2c4   :  { %v6019_v47 = vor.u32 %v6507_v39, %v6018_v60  ;;  %v5879_v39 = vor.u32 %v6472_v35, %v5878_v34  ;;  %v6476_v35 = vld [vmem:[%s9601_s8 + $0x474] sm:$0xf] }
 0x2c5   :  { %3722 = vmatpush.bf16.msra.mxu2 %v5543_v45  ;;  %3671 = vmatpush.bf16.msra.mxu3 %v5399_v63  ;;  %v5710_v45 = vld [vmem:[%s9601_s8 + $0x2e8] sm:$0xf]  ;;  %v6346_v63 = vld [vmem:[%s9601_s8 + $0x60] sm:$0xf0] }
 0x2c6   :  { %v5711_v61 = vor.u32 %v6430_v46, %v5710_v45  ;;  %v6465_v45 = vld [vmem:[%s9601_s8 + $0x418] sm:$0xf0]  ;;  %v5570_v46 = vld [vmem:[%s9601_s8 + $0x1d0] sm:$0xf] }
 0x2c7   :  { %3683 = vmatpush.bf16.msra.mxu0 %v5679_v53  ;;  %3697 = vmatpush.bf16.msrb.mxu1 %v5903_v57  ;;  %v5403_v53 = vor.u32 %v6353_v41, %v5402_v40  ;;  %v5544_v57 = vld [vmem:[%s9601_s8 + $0x1b4] sm:$0xf0]  ;;  %v5599_v41 = vor.u32 %v6402_v56, %v5598_v36  ;;  %v5908_v36 = vld [vmem:[%s9601_s8 + $0x48c] sm:$0xf0] }
 0x2c8   :  { %v5547_v2 = vor.u32 %v6385_v48, %v5544_v57  ;;  %v5432_v40 = vld [vmem:[%s9601_s8 + $0xd4] sm:$0xf0]  ;;  %v5684_v48 = vld [vmem:[%s9601_s8 + $0x2cc] sm:$0xf0]  ;;  %v6497_v57 = vld [vmem:[%s9601_s8 + $0x51c] sm:$0xf] }
 0x2c9   :  { %3723 = vmatpush.bf16.msra.mxu2 %v5515_v0  ;;  %3672 = vmatpush.bf16.msra.mxu3 %v5371_v12  ;;  %v5682_v0 = vld [vmem:[%s9601_s8 + $0x2b0] sm:$0xf]  ;;  %v6339_v12 = vld [vmem:[%s9601_s8 + $0x28] sm:$0xf0] }
 0x2ca   :  { %v5683_v7 = vor.u32 %v6423_v1, %v5682_v0  ;;  %v5822_v1 = vld [vmem:[%s9601_s8 + $0x3c8] sm:$0xf] }
 0x2cb   :  { %3684 = vmatpush.bf16.msra.mxu0 %v5651_v19  ;;  %3698 = vmatpush.bf16.msrb.mxu1 %v5875_v4  ;;  %v5375_v19 = vor.u32 %v6346_v63, %v5374_v62  ;;  %v5516_v4 = vld [vmem:[%s9601_s8 + $0x17c] sm:$0xf0] }
 0x2cc   :  { %v5519_v15 = vor.u32 %v6378_v37, %v5516_v4  ;;  %v5404_v62 = vld [vmem:[%s9601_s8 + $0x9c] sm:$0xf0]  ;;  %v6413_v37 = vld [vmem:[%s9601_s8 + $0x27c] sm:$0xf] }
 0x2cd   :  { %3724 = vmatpush.bf16.msra.mxu2 %v5487_v13  ;;  %3673 = vmatpush.bf16.msra.mxu3 %v5343_v24  ;;  %v5654_v13 = vld [vmem:[%s9601_s8 + $0x278] sm:$0xf]  ;;  %v5626_v24 = vld [vmem:[%s9601_s8 + $0x240] sm:$0xf] }
 0x2ce   :  { %v5655_v20 = vor.u32 %v6416_v14, %v5654_v13  ;;  %v5794_v14 = vld [vmem:[%s9601_s8 + $0x390] sm:$0xf] }
 0x2cf   :  { %3685 = vmatpush.bf16.msra.mxu0 %v5623_v16  ;;  %3699 = vmatpush.bf16.msrb.mxu1 %v5847_v17  ;;  %v5935_v16 = vor.u32 %v6486_v6, %v5934_v5  ;;  %v5347_v17 = vor.u32 %v6339_v12, %v5346_v9  ;;  %v6490_v5 = vld [vmem:[%s9601_s8 + $0x4e4] sm:$0xf]  ;;  %v5964_v6 = vld [vmem:[%s9601_s8 + $0x4fc] sm:$0xf0]  ;;  %v6343_v9 = vld [vmem:[%s9601_s8 + $0x4c] sm:$0xf]  ;;  %v5795_v22 = vor.u32 %v6451_v50, %v5794_v14 }
 0x2d0   :  { %3674 = vmatmul.bf16.vlgmr.msra.gmra.mxu3 %v8795_v10  ;;  %6031 = vmatmul.msk.bf16.vlgmr.msrb.gmra.mxu2 %vm1267_vm0, %v8766_v51  ;;  %v5376_v12 = vld [vmem:[%s9601_s8 + $0x64] sm:$0xf0]  ;;  %v6455_v14 = vld [vmem:[%s9601_s8 + $0x3cc] sm:$0xf] }
 0x2d1   :  { %3725 = vmatpush.bf16.msra.mxu2 %v5459_v25  ;;  %3736 = vmatpush.bf16.msrb.mxu3 %v5767_v26  ;;  %v6409_v25 = vld [vmem:[%s9601_s8 + $0x258] sm:$0xf0]  ;;  %v6434_v26 = vld [vmem:[%s9601_s8 + $0x324] sm:$0xf]  ;;  %v5379_v55 = vor.u32 %v6343_v9, %v5376_v12  ;;  %v5690_v12 = vld [vmem:[%s9601_s8 + $0x2b8] sm:$0xf] }
 0x2d2   :  { %v5627_v31 = vor.u32 %v6409_v25, %v5626_v24  ;;  %v5743_v32 = vor.u32 %v6434_v26, %v5740_v27  ;;  %v5348_v24 = vld [vmem:[%s9601_s8 + $0x2c] sm:$0xf0]  ;;  %v5550_v25 = vld [vmem:[%s9601_s8 + $0x1a0] sm:$0xf]  ;;  %v5824_v50 = vld [vmem:[%s9601_s8 + $0x3e4] sm:$0xf0] }
 0x2d3   :  { %3686 = vmatpush.bf16.msra.mxu0 %v5595_v29  ;;  %3700 = vmatpush.bf16.msrb.mxu1 %v5819_v30  ;;  %v6364_v29 = vld [vmem:[%s9601_s8 + $0xf4] sm:$0xf]  ;;  %v5460_v30 = vld [vmem:[%s9601_s8 + $0x10c] sm:$0xf0]  ;;  %v5351_v34 = vor.u32 %v6336_v23, %v5348_v24  ;;  %v6417_v23 = vld [vmem:[%s9601_s8 + $0x298] sm:$0xf0] }
 0x2d4   :  { %v5463_v60 = vor.u32 %v6364_v29, %v5460_v30  ;;  %v6445_v29 = vld [vmem:[%s9601_s8 + $0x378] sm:$0xf0]  ;;  %v6448_v24 = vld [vmem:[%s9601_s8 + $0x394] sm:$0xf] }
 0x2d5   :  { %3726 = vmatpush.bf16.msra.mxu2 %v5431_v54  ;;  %3737 = vmatpush.bf16.msrb.mxu3 %v5739_v33  ;;  %v6427_v54 = vld [vmem:[%s9601_s8 + $0x2ec] sm:$0xf]  ;;  %v6357_v33 = vld [vmem:[%s9601_s8 + $0xbc] sm:$0xf] }
 0x2d7   :  { %3687 = vmatpush.bf16.msra.mxu0 %v5567_v43  ;;  %3701 = vmatpush.bf16.msrb.mxu1 %v5791_v44  ;;  %v5715_v43 = vor.u32 %v6427_v54, %v5712_v38  ;;  %v5850_v44 = vld [vmem:[%s9601_s8 + $0x400] sm:$0xf]  ;;  %v5522_v38 = vld [vmem:[%s9601_s8 + $0x168] sm:$0xf] }
 0x2d8   :  { %v5851_v59 = vor.u32 %v6465_v45, %v5850_v44  ;;  %v5572_v44 = vld [vmem:[%s9601_s8 + $0x1ec] sm:$0xf0]  ;;  %v6469_v45 = vld [vmem:[%s9601_s8 + $0x43c] sm:$0xf] }
 0x2d9   :  { %3727 = vmatpush.bf16.msra.mxu2 %v5403_v53  ;;  %3738 = vmatpush.bf16.msrb.mxu3 %v5711_v61  ;;  %v5435_v53 = vor.u32 %v6357_v33, %v5432_v40  ;;  %v6350_v61 = vld [vmem:[%s9601_s8 + $0x84] sm:$0xf]  ;;  %v5746_v33 = vld [vmem:[%s9601_s8 + $0x328] sm:$0xf] }
 0x2da   :  { %3688 = vmatmul.bf16.vlgmr.msra.gmra.mxu0 %v8797_v11  ;;  %3702 = vmatmul.bf16.vlgmr.msrb.gmra.mxu1 %v8764_v49  ;;  %v5407_v4 = vor.u32 %v6350_v61, %v5404_v62  ;;  %v6438_v40 = vld [vmem:[%s9601_s8 + $0x340] sm:$0xf0] }
 0x2db   :  { %3750 = vmatpush.bf16.msrb.mxu0 %v5991_v42  ;;  %3771 = vmatpush.bf16.msra.mxu1 %v6019_v47  ;;  %v6395_v42 = vld [vmem:[%s9601_s8 + $0x1e8] sm:$0xf0]  ;;  %v6420_v47 = vld [vmem:[%s9601_s8 + $0x2b4] sm:$0xf] }
 0x2dc   :  { %v5571_v63 = vor.u32 %v6395_v42, %v5570_v46  ;;  %v5687_v0 = vor.u32 %v6420_v47, %v5684_v48  ;;  %v5880_v46 = vld [vmem:[%s9601_s8 + $0x454] sm:$0xf0]  ;;  %v5998_v42 = vld [vmem:[%s9601_s8 + $0x520] sm:$0xf]  ;;  %v6501_v47 = vld [vmem:[%s9601_s8 + $0x538] sm:$0xf0] }
 0x2dd   :  { %3728 = vmatpush.bf16.msra.mxu2 %v5375_v19  ;;  %3739 = vmatpush.bf16.msrb.mxu3 %v5683_v7  ;;  %v5656_v19 = vld [vmem:[%s9601_s8 + $0x294] sm:$0xf0]  ;;  %v5883_v61 = vor.u32 %v6469_v45, %v5880_v46  ;;  %v5999_v62 = vor.u32 %v6501_v47, %v5998_v42  ;;  %v6403_v45 = vld [vmem:[%s9601_s8 + $0x228] sm:$0xf0]  ;;  %v5858_v46 = vld [vmem:[%s9601_s8 + $0x408] sm:$0xf] }
 0x2de   :  { %v5659_v13 = vor.u32 %v6413_v37, %v5656_v19  ;;  %v6494_v37 = vld [vmem:[%s9601_s8 + $0x500] sm:$0xf0] }
 0x2df   :  { %3778 = vmatpush.bf16.msrb.mxu1 %v5547_v2  ;;  %3751 = vmatpush.bf16.msrb.mxu0 %v5963_v3  ;;  %v6458_v2 = vld [vmem:[%s9601_s8 + $0x3e0] sm:$0xf0]  ;;  %v5995_v3 = vor.u32 %v6497_v57, %v5992_v58  ;;  %v5494_v58 = vld [vmem:[%s9601_s8 + $0x130] sm:$0xf] }
 0x2e0   :  { %v5823_v7 = vor.u32 %v6458_v2, %v5822_v1  ;;  %v6462_v1 = vld [vmem:[%s9601_s8 + $0x404] sm:$0xf]  ;;  %v5852_v2 = vld [vmem:[%s9601_s8 + $0x41c] sm:$0xf0] }
 0x2e1   :  { %3729 = vmatpush.bf16.msra.mxu2 %v5347_v17  ;;  %3740 = vmatpush.bf16.msrb.mxu3 %v5655_v20  ;;  %v6504_v17 = vld [vmem:[%s9601_s8 + $0x554] sm:$0xf]  ;;  %v6483_v20 = vld [vmem:[%s9601_s8 + $0x4ac] sm:$0xf]  ;;  %v6466_v42 = vld [vmem:[%s9601_s8 + $0x420] sm:$0xf0] }
 0x2e2   :  { %v6023_v27 = vor.u32 %v6504_v17, %v6020_v18  ;;  %v5438_v18 = vld [vmem:[%s9601_s8 + $0xc0] sm:$0xf] }
 0x2e3   :  { %3779 = vmatpush.bf16.msrb.mxu1 %v5519_v15  ;;  %3752 = vmatpush.bf16.msrb.mxu0 %v5935_v16  ;;  %v5967_v15 = vor.u32 %v6490_v5, %v5964_v6  ;;  %v5628_v16 = vld [vmem:[%s9601_s8 + $0x25c] sm:$0xf0]  ;;  %v5466_v5 = vld [vmem:[%s9601_s8 + $0xf8] sm:$0xf]  ;;  %v6368_v6 = vld [vmem:[%s9601_s8 + $0x110] sm:$0xf0] }
 0x2e4   :  { %3730 = vmatmul.bf16.vlgmr.msra.gmra.mxu2 %v8795_v10  ;;  %v5631_v26 = vor.u32 %v6406_v52, %v5628_v16  ;;  %v5942_v52 = vld [vmem:[%s9601_s8 + $0x4b0] sm:$0xf]  ;;  %v5467_v16 = vor.u32 %v6368_v6, %v5466_v5  ;;  %v9536_v6 = vld [vmem:[%s9604_s9] sm:$0xff] }
 0x2e5   :  { %3792 = vmatpush.bf16.msrb.mxu2 %v5771_v21  ;;  %3741 = vmatpush.bf16.msrb.mxu3 %v5627_v31  ;;  %v5936_v21 = vld [vmem:[%s9601_s8 + $0x4c4] sm:$0xf0]  ;;  %v6399_v31 = vld [vmem:[%s9601_s8 + $0x20c] sm:$0xf] }
 0x2e6   :  { %v5939_v30 = vor.u32 %v6483_v20, %v5936_v21  ;;  %v5827_v20 = vor.u32 %v6455_v14, %v5824_v50 }
 0x2e7   :  { %3780 = vmatpush.bf16.msrb.mxu1 %v5491_v8  ;;  %3753 = vmatpush.bf16.msrb.mxu0 %v5907_v28  ;;  %v6389_v8 = vld [vmem:[%s9601_s8 + $0x1b8] sm:$0xf0]  ;;  %v5774_v28 = vld [vmem:[%s9601_s8 + $0x360] sm:$0xf] }
 0x2e8   :  { %v5551_v56 = vor.u32 %v6389_v8, %v5550_v25  ;;  %v5775_v54 = vor.u32 %v6445_v29, %v5774_v28  ;;  %v5796_v25 = vld [vmem:[%s9601_s8 + $0x3ac] sm:$0xf0]  ;;  %v6026_v28 = vld [vmem:[%s9601_s8 + $0x558] sm:$0xf]  ;;  %v6508_v29 = vld [vmem:[%s9601_s8 + $0x570] sm:$0xf0] }
 0x2e9   :  { %3793 = vmatpush.bf16.msrb.mxu2 %v5743_v32  ;;  %3742 = vmatpush.bf16.msrb.mxu3 %v5599_v41  ;;  %v5600_v32 = vld [vmem:[%s9601_s8 + $0x224] sm:$0xf0]  ;;  %v5911_v41 = vor.u32 %v6476_v35, %v5908_v36 }
 0x2ea   :  { %6032 = vmatmul.msk.bf16.vlgmr.msra.gmra.mxu1 %vm1267_vm0, %v8766_v51  ;;  %v5634_v36 = vld [vmem:[%s9601_s8 + $0x248] sm:$0xf] }
 0x2eb   :  { %3781 = vmatpush.bf16.msrb.mxu1 %v5463_v60  ;;  %3754 = vmatpush.bf16.msrb.mxu0 %v5879_v39  ;;  %v5603_v60 = vor.u32 %v6399_v31, %v5600_v32  ;;  %v6382_v39 = vld [vmem:[%s9601_s8 + $0x180] sm:$0xf0]  ;;  %v5410_v31 = vld [vmem:[%s9601_s8 + $0x88] sm:$0xf] }
 0x2ec   :  { %v5523_v48 = vor.u32 %v6382_v39, %v5522_v38  ;;  %v6354_v32 = vld [vmem:[%s9601_s8 + $0xa0] sm:$0xf0]  ;;  %v6473_v38 = vld [vmem:[%s9601_s8 + $0x458] sm:$0xf0] }
 0x2ed   :  { %3794 = vmatpush.bf16.msrb.mxu2 %v5715_v43  ;;  %3743 = vmatpush.bf16.msrb.mxu3 %v5571_v63  ;;  %v6392_v43 = vld [vmem:[%s9601_s8 + $0x1d4] sm:$0xf]  ;;  %v5718_v63 = vld [vmem:[%s9601_s8 + $0x2f0] sm:$0xf]  ;;  %v5411_v39 = vor.u32 %v6354_v32, %v5410_v31 }
 0x2ee   :  { %v5575_v57 = vor.u32 %v6392_v43, %v5572_v44  ;;  %v5606_v44 = vld [vmem:[%s9601_s8 + $0x210] sm:$0xf] }
 0x2ef   :  { %3782 = vmatpush.bf16.msrb.mxu1 %v5435_v53  ;;  %3755 = vmatpush.bf16.msrb.mxu0 %v5851_v59  ;;  %v5747_v53 = vor.u32 %v6438_v40, %v5746_v33  ;;  %v6375_v59 = vld [vmem:[%s9601_s8 + $0x148] sm:$0xf0]  ;;  %v5382_v40 = vld [vmem:[%s9601_s8 + $0x50] sm:$0xf] }
 0x2f0   :  { %3744 = vmatmul.bf16.vlgmr.msrb.gmra.mxu3 %v8797_v11  ;;  %v5495_v19 = vor.u32 %v6375_v59, %v5494_v58  ;;  %v5859_v58 = vor.u32 %v6466_v42, %v5858_v46  ;;  %v5578_v59 = vld [vmem:[%s9601_s8 + $0x1d8] sm:$0xf] }
 0x2f1   :  { %3795 = vmatpush.bf16.msrb.mxu2 %v5687_v0  ;;  %3806 = vmatpush.bf16.msra.mxu3 %v5995_v3  ;;  %v6431_v0 = vld [vmem:[%s9601_s8 + $0x308] sm:$0xf0]  ;;  %v5970_v3 = vld [vmem:[%s9601_s8 + $0x4e8] sm:$0xf] }
 0x2f2   :  { %v5971_v9 = vor.u32 %v6494_v37, %v5970_v3  ;;  %v5802_v3 = vld [vmem:[%s9601_s8 + $0x398] sm:$0xf]  ;;  %v6452_v37 = vld [vmem:[%s9601_s8 + $0x3b0] sm:$0xf0] }
 0x2f3   :  { %3783 = vmatpush.bf16.msrb.mxu1 %v5407_v4  ;;  %3756 = vmatpush.bf16.msrb.mxu0 %v5823_v7  ;;  %v5719_v4 = vor.u32 %v6431_v0, %v5718_v63  ;;  %v5855_v7 = vor.u32 %v6462_v1, %v5852_v2  ;;  %v6459_v63 = vld [vmem:[%s9601_s8 + $0x3e8] sm:$0xf0] }
 0x2f5   :  { %3796 = vmatpush.bf16.msrb.mxu2 %v5659_v13  ;;  %3807 = vmatpush.bf16.msra.mxu3 %v5967_v15  ;;  %v6424_v13 = vld [vmem:[%s9601_s8 + $0x2d0] sm:$0xf0]  ;;  %v6487_v15 = vld [vmem:[%s9601_s8 + $0x4c8] sm:$0xf0] }
 0x2f6   :  { %v5691_v17 = vor.u32 %v6424_v13, %v5690_v12  ;;  %v5943_v21 = vor.u32 %v6487_v15, %v5942_v52 }
 0x2f7   :  { %3784 = vmatpush.bf16.msrb.mxu1 %v5379_v55  ;;  %3757 = vmatpush.bf16.msrb.mxu0 %v5795_v22  ;;  %v6361_v55 = vld [vmem:[%s9601_s8 + $0xd8] sm:$0xf0]  ;;  %v5662_v22 = vld [vmem:[%s9601_s8 + $0x280] sm:$0xf] }
 0x2f8   :  { %v5439_v8 = vor.u32 %v6361_v55, %v5438_v18  ;;  %v2582_v55 = vperm.slane %v9536_v6, 1 }
 0x2f9   :  { %3797 = vmatpush.bf16.msrb.mxu2 %v5631_v26  ;;  %3808 = vmatpush.bf16.msra.mxu3 %v5939_v30  ;;  %v5914_v26 = vld [vmem:[%s9601_s8 + $0x478] sm:$0xf]  ;;  %v5663_v30 = vor.u32 %v6417_v23, %v5662_v22 }
 0x2fa   :  { %3758 = vmatmul.bf16.vlgmr.msrb.gmra.mxu0 %v8764_v49 }
 0x2fb   :  { %3827 = vmatpush.bf16.msra.mxu0 %v6023_v27  ;;  %3785 = vmatpush.bf16.msrb.mxu1 %v5351_v34  ;;  %v6480_v27 = vld [vmem:[%s9601_s8 + $0x490] sm:$0xf0]  ;;  %v5799_v34 = vor.u32 %v6448_v24, %v5796_v25 }
 0x2fc   :  { %v5915_v35 = vor.u32 %v6480_v27, %v5914_v26 }
 0x2fd   :  { %3798 = vmatpush.bf16.msrb.mxu2 %v5603_v60  ;;  %3809 = vmatpush.bf16.msra.mxu3 %v5911_v41  ;;  %v6027_v60 = vor.u32 %v6508_v29, %v6026_v28  ;;  %v6347_v41 = vld [vmem:[%s9601_s8 + $0x68] sm:$0xf0] }
 0x2fe   :  { %3786 = vmatmul.bf16.vlgmr.msrb.gmra.mxu1 %v8795_v10  ;;  %v5383_v47 = vor.u32 %v6347_v41, %v5382_v40 }
 0x2ff   :  { %3834 = vmatpush.bf16.msrb.mxu0 %v5551_v56  ;;  %3848 = vmatpush.bf16.msra.mxu1 %v5775_v54  ;;  %v6410_v56 = vld [vmem:[%s9601_s8 + $0x260] sm:$0xf0]  ;;  %v5886_v54 = vld [vmem:[%s9601_s8 + $0x440] sm:$0xf] }
 0x300   :  { %v5635_v33 = vor.u32 %v6410_v56, %v5634_v36  ;;  %v5887_v43 = vor.u32 %v6473_v38, %v5886_v54 }
 0x301   :  { %3799 = vmatpush.bf16.msrb.mxu2 %v5575_v57  ;;  %3810 = vmatpush.bf16.msra.mxu3 %v5883_v61  ;;  %v6340_v57 = vld [vmem:[%s9601_s8 + $0x30] sm:$0xf0] }
 0x302   :  { %v6396_v61 = vld [vmem:[%s9601_s8 + $0x1f0] sm:$0xf0] }
 0x303   :  { %3835 = vmatpush.bf16.msrb.mxu0 %v5523_v48  ;;  %3849 = vmatpush.bf16.msra.mxu1 %v5747_v53  ;;  %v5607_v48 = vor.u32 %v6403_v45, %v5606_v44  ;;  %v5354_v53 = vld [vmem:[%s9601_s8 + $0x18] sm:$0xf]  ;;  %v5579_v1 = vor.u32 %v6396_v61, %v5578_v59 }
 0x304   :  { %3800 = vmatmul.bf16.vlgmr.msrb.gmra.mxu2 %v8797_v11  ;;  %v5355_v0 = vor.u32 %v6340_v57, %v5354_v53 }
 0x305   :  { %3862 = vmatpush.bf16.msra.mxu2 %v5999_v62  ;;  %3811 = vmatpush.bf16.msra.mxu3 %v5855_v7  ;;  %v5830_v62 = vld [vmem:[%s9601_s8 + $0x3d0] sm:$0xf] }
 0x306   :  { %v5831_v2 = vor.u32 %v6459_v63, %v5830_v62 }
 0x307   :  { %3836 = vmatpush.bf16.msrb.mxu0 %v5495_v19  ;;  %3850 = vmatpush.bf16.msra.mxu1 %v5719_v4  ;;  %v5803_v19 = vor.u32 %v6452_v37, %v5802_v3 }
 0x309   :  { %3863 = vmatpush.bf16.msra.mxu2 %v5971_v9  ;;  %3812 = vmatpush.bf16.msra.mxu3 %v5827_v20  ;;  %v2581_v9 = vperm.slane %v9536_v6, 0 }
 0x30a   :  { %6033 = vmatmul.msk.bf16.vlgmr.msra.gmra.mxu0 %vm1267_vm0, %v8766_v51 }
 0x30b   :  { %3837 = vmatpush.bf16.msrb.mxu0 %v5467_v16  ;;  %3851 = vmatpush.bf16.msra.mxu1 %v5691_v17 }
 0x30d   :  { %3864 = vmatpush.bf16.msra.mxu2 %v5943_v21  ;;  %3813 = vmatpush.bf16.msra.mxu3 %v5799_v34 }
 0x30f   :  { %3838 = vmatpush.bf16.msrb.mxu0 %v5439_v8  ;;  %3852 = vmatpush.bf16.msra.mxu1 %v5663_v30 }
 0x310   :  { %3814 = vmatmul.bf16.vlgmr.msra.gmra.mxu3 %v8764_v49 }
 0x311   :  { %3865 = vmatpush.bf16.msra.mxu2 %v5915_v35  ;;  %3883 = vmatpush.bf16.msrb.mxu3 %v6027_v60  ;;  %v2583_v60 = vperm.slane %v9536_v6, 2 }
 0x313   :  { %3839 = vmatpush.bf16.msrb.mxu0 %v5411_v39  ;;  %3853 = vmatpush.bf16.msra.mxu1 %v5635_v33 }
 0x315   :  { %3866 = vmatpush.bf16.msra.mxu2 %v5887_v43 }
 0x317   :  { %3840 = vmatpush.bf16.msrb.mxu0 %v5383_v47  ;;  %3854 = vmatpush.bf16.msra.mxu1 %v5607_v48  ;;  %v3535_v4 = vpop.f32.mrf.mxu0  ;;  %v3549_v5 = vpop.f32.mrf.mxu1 }
 0x319   :  { %3867 = vmatpush.bf16.msra.mxu2 %v5859_v58 }
 0x31b   :  { %3841 = vmatpush.bf16.msrb.mxu0 %v5355_v0  ;;  %3855 = vmatpush.bf16.msra.mxu1 %v5579_v1 }
 0x31d   :  { %3868 = vmatpush.bf16.msra.mxu2 %v5831_v2 }
 0x31e   :  { %3842 = vmatmul.bf16.vlgmr.msrb.gmra.mxu0 %v8795_v10  ;;  %3856 = vmatmul.bf16.vlgmr.msra.gmra.mxu1 %v8797_v11 }
 0x31f   :  { %v3537_v7 = vpop.f32.mrf.mxu0  ;;  %v3551_v12 = vpop.f32.mrf.mxu1 }
 0x320   :  { %6034 = vmatmul.msk.bf16.vlgmr.msrb.gmra.mxu3 %vm1267_vm0, %v8766_v51 }
 0x321   :  { %3869 = vmatpush.bf16.msra.mxu2 %v5803_v19 }
 0x323   :  { %v3507_v10 = vpop.f32.mrf.mxu2  ;;  %v3521_v13 = vpop.f32.mrf.mxu3 }
 0x324   :  { %3870 = vmatmul.bf16.vlgmr.msra.gmra.mxu2 %v8764_v49  ;;  %v3508_v11 = vadd.f32 %v3507_v10, %v2581_v9 }
 0x326   :  { %v3522_v14 = vadd.f32 %v3521_v13, %v3508_v11 }
 0x327   :  { %v3605_v50 = vpop.f32.mrf.mxu0  ;;  %v3563_v18 = vpop.f32.mrf.mxu1 }
 0x328   :  { %v3536_v52 = vadd.f32 %v3535_v4, %v3522_v14  ;;  %v3564_v23 = vadd.f32 %v3563_v18, %v2582_v55 }
 0x32a   :  { %v3550_v15 = vadd.f32 %v3549_v5, %v3536_v52 }
 0x32b   :  { %v3509_v49 = vpop.f32.mrf.mxu2  ;;  %v3523_v16 = vpop.f32.mrf.mxu3 }
 0x32c   :  { %v6035_v17 = vmul.f32 -1.442695, %v3550_v15  ;;  %v3510_v51 = vadd.f32 %v3509_v49, %v2581_v9 }
 0x32e   :  { %6513 = vpow2.f32 %v6035_v17  ;;  %v3524_v20 = vadd.f32 %v3523_v16, %v3510_v51 }
 0x32f   :  { %v3607_v22 = vpop.f32.mrf.mxu0  ;;  %v3565_v31 = vpop.f32.mrf.mxu1 }
 0x330   :  { %v3538_v21 = vadd.f32 %v3537_v7, %v3524_v20  ;;  %v3566_v34 = vadd.f32 %v3565_v31, %v2582_v55  ;;  %v2584_v31 = vperm.slane %v9536_v6, 3 }
 0x332   :  { %v3552_v24 = vadd.f32 %v3551_v12, %v3538_v21 }
 0x333   :  { %v3577_v25 = vpop.f32.mrf.mxu2  ;;  %v3591_v26 = vpop.f32.mrf.mxu3 }
 0x334   :  { %v6514_v27 = vpop.eup %6513  ;;  %v6042_v8 = vmul.f32 -1.442695, %v3552_v24  ;;  %v3578_v28 = vadd.f32 %v3577_v25, %v3564_v23 }
 0x335   :  { %v3932_v29 = vadd.f32 1.0, %v6514_v27 }
 0x336   :  { %6515 = vpow2.f32 %v6042_v8  ;;  %v3592_v30 = vadd.f32 %v3591_v26, %v3578_v28 }
 0x337   :  { %6517 = vrcp.f32 %v3932_v29  ;;  %v3619_v36 = vpop.f32.mrf.mxu0  ;;  %v3957_v42 = vand.u32 2147483648, %v3932_v29  ;;  %v3633_v47 = vpop.f32.mrf.mxu1  ;;  %v3955_v57 = vand.u32 2147483647, %v3932_v29  ;;  %vm3951_vm2 = vweird.f32 %v3932_v29 }
 0x338   :  { %v3606_v32 = vadd.f32 %v3605_v50, %v3592_v30  ;;  %v3620_v45 = vadd.f32 %v3619_v36, %v2583_v60 }
 0x339   :  { %v3958_v2 = vor.u32 1.1754944e-38, %v3957_v42  ;;  %vm3956_vm4 = vcmp.eq.f32.partialorder %v3955_v57, 8.507059e+37 }
 0x33a   :  { %v6036_v35 = vmul.f32 -1.442695, %v3606_v32  ;;  %v3634_v62 = vadd.f32 %v3633_v47, %v3620_v45 }
 0x33b   :  { %v3579_v56 = vpop.f32.mrf.mxu2  ;;  %v3593_v54 = vpop.f32.mrf.mxu3 }
 0x33c   :  { %v6516_v38 = vpop.eup %6515  ;;  %6519 = vpow2.f32 %v6036_v35  ;;  %v3580_v39 = vadd.f32 %v3579_v56, %v3566_v34 }
 0x33d   :  { %v6518_v33 = vpop.eup %6517  ;;  %v3939_v40 = vadd.f32 1.0, %v6516_v38 }
 0x33e   :  { %v3947_v41 = vmul.f32 %v6518_v33, %v3932_v29  ;;  %v3594_v43 = vadd.f32 %v3593_v54, %v3580_v39  ;;  %vm3952_vm1 = vweird.f32 %v6518_v33 }
 0x33f   :  { %6521 = vrcp.f32 %v3939_v40  ;;  %vm3953_vm3 = vmor %vm3951_vm2, %vm3952_vm1  ;;  %v3621_v3 = vpop.f32.mrf.mxu0  ;;  %v4062_v10 = vand.u32 2147483648, %v3939_v40  ;;  %v4060_v14 = vand.u32 2147483647, %v3939_v40  ;;  %vm4056_vm6 = vweird.f32 %v3939_v40  ;;  %v3635_v49 = vpop.f32.mrf.mxu1 }
 0x340   :  { %v3948_v44 = vsub.f32 1.0, %v3947_v41  ;;  %v3608_v46 = vadd.f32 %v3607_v22, %v3594_v43  ;;  %v3622_v9 = vadd.f32 %v3621_v3, %v2583_v60 }
 0x341   :  { %v4063_v20 = vor.u32 1.1754944e-38, %v4062_v10  ;;  %vm4061_vm8 = vcmp.eq.f32.partialorder %v4060_v14, 8.507059e+37 }
 0x342   :  { %v6520_v48 = vpop.eup %6519  ;;  %v3949_v53 = vmul.f32 %v6518_v33, %v3948_v44  ;;  %v6043_v58 = vmul.f32 -1.442695, %v3608_v46  ;;  %v3636_v51 = vadd.f32 %v3635_v49, %v3622_v9 }
 0x343   :  { %v9541_v59 = vadd.f32 1.0, %v6520_v48  ;;  %v3647_v63 = vpop.f32.mrf.mxu2  ;;  %v3661_v0 = vpop.f32.mrf.mxu3 }
 0x344   :  { %v3950_v61 = vadd.f32 %v6518_v33, %v3949_v53  ;;  %6523 = vpow2.f32 %v6043_v58  ;;  %v3648_v4 = vadd.f32 %v3647_v63, %v3634_v62 }
 0x345   :  { %v6522_v1 = vpop.eup %6521  ;;  %6525 = vrcp.f32 %v9541_v59  ;;  %v3972_v25 = vand.u32 2147483648, %v9541_v59  ;;  %v3970_v27 = vand.u32 2147483647, %v9541_v59  ;;  %vm3966_vm10 = vweird.f32 %v9541_v59 }
 0x346   :  { %v3954_v37 = vsel %vm3953_vm3, %v6518_v33, %v3950_v61  ;;  %v4052_v19 = vmul.f32 %v6522_v1, %v3939_v40  ;;  %v3662_v12 = vadd.f32 %v3661_v0, %v3648_v4  ;;  %vm4057_vm5 = vweird.f32 %v6522_v1 }
 0x347   :  { %v3959_v5 = vsel %vm3956_vm4, %v3958_v2, %v3954_v37  ;;  %vm4058_vm7 = vmor %vm4056_vm6, %vm4057_vm5  ;;  %v3973_v34 = vor.u32 1.1754944e-38, %v3972_v25  ;;  %vm3971_vm12 = vcmp.eq.f32.partialorder %v3970_v27, 8.507059e+37 }
 0x348   :  { %4156 = vst [vmem:[%s9605_s10] sm:$0xff] %v3959_v5  ;;  %v4053_v7 = vsub.f32 1.0, %v4052_v19  ;;  %v6037_v50 = vmul.f32 -1.442695, %v3662_v12 }
 0x34a   :  { %v6524_v13 = vpop.eup %6523  ;;  %v4054_v11 = vmul.f32 %v6522_v1, %v4053_v7  ;;  %6527 = vpow2.f32 %v6037_v50 }
 0x34b   :  { %v6526_v52 = vpop.eup %6525  ;;  %v3940_v15 = vadd.f32 1.0, %v6524_v13  ;;  %v3649_v18 = vpop.f32.mrf.mxu2 }
 0x34c   :  { %v4055_v16 = vadd.f32 %v6522_v1, %v4054_v11  ;;  %v3962_v17 = vmul.f32 %v6526_v52, %v9541_v59  ;;  %v3663_v55 = vpop.f32.mrf.mxu3  ;;  %v3650_v23 = vadd.f32 %v3649_v18, %v3636_v51  ;;  %vm3967_vm9 = vweird.f32 %v6526_v52 }
 0x34d   :  { %6529 = vrcp.f32 %v3940_v15  ;;  %vm3968_vm11 = vmor %vm3966_vm10, %vm3967_vm9  ;;  %v4077_v40 = vand.u32 2147483648, %v3940_v15  ;;  %v4075_v45 = vand.u32 2147483647, %v3940_v15  ;;  %vm4071_vm14 = vweird.f32 %v3940_v15 }
 0x34e   :  { %v4059_v21 = vsel %vm4058_vm7, %v6522_v1, %v4055_v16  ;;  %v3963_v22 = vsub.f32 1.0, %v3962_v17  ;;  %v3664_v8 = vadd.f32 %v3663_v55, %v3650_v23 }
 0x34f   :  { %v4064_v24 = vsel %vm4061_vm8, %v4063_v20, %v4059_v21  ;;  %v4078_v57 = vor.u32 1.1754944e-38, %v4077_v40  ;;  %vm4076_vm0 = vcmp.eq.f32.partialorder %v4075_v45, 8.507059e+37 }
 0x350   :  { %4163 = vst [vmem:[%s9605_s10 + $0x38] sm:$0xff] %v4064_v24  ;;  %v3964_v26 = vmul.f32 %v6526_v52, %v3963_v22  ;;  %v6528_v28 = vpop.eup %6527  ;;  %v6044_v30 = vmul.f32 -1.442695, %v3664_v8 }
 0x351   :  { %v3934_v35 = vadd.f32 1.0, %v6528_v28 }
 0x352   :  { %v3965_v29 = vadd.f32 %v6526_v52, %v3964_v26  ;;  %6531 = vpow2.f32 %v6044_v30  ;;  %v2585_v26 = vperm.slane %v9536_v6, 4 }
 0x353   :  { %v6530_v32 = vpop.eup %6529  ;;  %6533 = vrcp.f32 %v3934_v35  ;;  %v3717_v43 = vpop.f32.mrf.mxu2  ;;  %v3985_v37 = vand.u32 2147483647, %v3934_v35  ;;  %v3987_v19 = vand.u32 2147483648, %v3934_v35  ;;  %vm3981_vm2 = vweird.f32 %v3934_v35 }
 0x354   :  { %v3969_v36 = vsel %vm3968_vm11, %v6526_v52, %v3965_v29  ;;  %v4067_v56 = vmul.f32 %v6530_v32, %v3940_v15  ;;  %v3675_v54 = vpop.f32.mrf.mxu3  ;;  %vm4072_vm13 = vweird.f32 %v6530_v32 }
 0x355   :  { %v3974_v38 = vsel %vm3971_vm12, %v3973_v34, %v3969_v36  ;;  %v3676_v33 = vadd.f32 %v3675_v54, %v2584_v31  ;;  %vm4073_vm15 = vmor %vm4071_vm14, %vm4072_vm13  ;;  %v3988_v14 = vor.u32 1.1754944e-38, %v3987_v19  ;;  %vm3986_vm4 = vcmp.eq.f32.partialorder %v3985_v37, 8.507059e+37 }
 0x356   :  { %4157 = vst [vmem:[%s9605_s10 + $0x8] sm:$0xff] %v3974_v38  ;;  %v4068_v39 = vsub.f32 1.0, %v4067_v56 }
 0x357   :  { %v3689_v60 = vpop.f32.mrf.mxu0  ;;  %v3703_v41 = vpop.f32.mrf.mxu1 }
 0x358   :  { %v4069_v44 = vmul.f32 %v6530_v32, %v4068_v39  ;;  %v3690_v46 = vadd.f32 %v3689_v60, %v3676_v33  ;;  %v6532_v42 = vpop.eup %6531 }
 0x359   :  { %v6534_v53 = vpop.eup %6533  ;;  %v3941_v58 = vadd.f32 1.0, %v6532_v42 }
 0x35a   :  { %v4070_v47 = vadd.f32 %v6530_v32, %v4069_v44  ;;  %v3704_v48 = vadd.f32 %v3703_v41, %v3690_v46  ;;  %v3977_v61 = vmul.f32 %v6534_v53, %v3934_v35  ;;  %vm3982_vm1 = vweird.f32 %v6534_v53 }
 0x35b   :  { %6535 = vrcp.f32 %v3941_v58  ;;  %v3719_v12 = vpop.f32.mrf.mxu2  ;;  %vm3983_vm3 = vmor %vm3981_vm2, %vm3982_vm1  ;;  %v4092_v18 = vand.u32 2147483648, %v3941_v58  ;;  %v4090_v21 = vand.u32 2147483647, %v3941_v58  ;;  %vm4086_vm6 = vweird.f32 %v3941_v58 }
 0x35c   :  { %v4074_v59 = vsel %vm4073_vm15, %v6530_v32, %v4070_v47  ;;  %v3718_v62 = vadd.f32 %v3717_v43, %v3704_v48  ;;  %v3677_v63 = vpop.f32.mrf.mxu3  ;;  %v3978_v1 = vsub.f32 1.0, %v3977_v61 }
 0x35d   :  { %v4079_v0 = vsel %vm4076_vm0, %v4078_v57, %v4074_v59  ;;  %v3678_v3 = vadd.f32 %v3677_v63, %v2584_v31  ;;  %v4093_v23 = vor.u32 1.1754944e-38, %v4092_v18  ;;  %vm4091_vm8 = vcmp.eq.f32.partialorder %v4090_v21, 8.507059e+37 }
 0x35e   :  { %4164 = vst [vmem:[%s9605_s10 + $0x40] sm:$0xff] %v4079_v0  ;;  %v6038_v2 = vmul.f32 -1.442695, %v3718_v62  ;;  %v3979_v5 = vmul.f32 %v6534_v53, %v3978_v1 }
 0x35f   :  { %v3691_v4 = vpop.f32.mrf.mxu0  ;;  %v3705_v9 = vpop.f32.mrf.mxu1 }
 0x360   :  { %6537 = vpow2.f32 %v6038_v2  ;;  %v3692_v7 = vadd.f32 %v3691_v4, %v3678_v3  ;;  %v3980_v10 = vadd.f32 %v6534_v53, %v3979_v5 }
 0x361   :  { %v6536_v11 = vpop.eup %6535 }
 0x362   :  { %v3706_v13 = vadd.f32 %v3705_v9, %v3692_v7  ;;  %v3984_v50 = vsel %vm3983_vm3, %v6534_v53, %v3980_v10  ;;  %v4082_v52 = vmul.f32 %v6536_v11, %v3941_v58  ;;  %vm4087_vm5 = vweird.f32 %v6536_v11 }
 0x363   :  { %v3989_v49 = vsel %vm3986_vm4, %v3988_v14, %v3984_v50  ;;  %vm4088_vm7 = vmor %vm4086_vm6, %vm4087_vm5 }
 0x364   :  { %v3720_v15 = vadd.f32 %v3719_v12, %v3706_v13  ;;  %4158 = vst [vmem:[%s9605_s10 + $0x10] sm:$0xff] %v3989_v49  ;;  %v4083_v17 = vsub.f32 1.0, %v4082_v52  ;;  %v2586_v13 = vperm.slane %v9536_v6, 5 }
 0x366   :  { %v6538_v16 = vpop.eup %6537  ;;  %v6045_v51 = vmul.f32 -1.442695, %v3720_v15  ;;  %v4084_v20 = vmul.f32 %v6536_v11, %v4083_v17 }
 0x367   :  { %v3935_v55 = vadd.f32 1.0, %v6538_v16  ;;  %v3731_v24 = vpop.f32.mrf.mxu2  ;;  %v3773_v35 = vpop.f32.mrf.mxu1 }
 0x368   :  { %6539 = vpow2.f32 %v6045_v51  ;;  %v4085_v22 = vadd.f32 %v6536_v11, %v4084_v20  ;;  %v3732_v31 = vadd.f32 %v3731_v24, %v2585_v26 }
 0x369   :  { %6541 = vrcp.f32 %v3935_v55  ;;  %v4000_v54 = vand.u32 2147483647, %v3935_v55  ;;  %v4002_v38 = vand.u32 2147483648, %v3935_v55  ;;  %vm3996_vm10 = vweird.f32 %v3935_v55 }
 0x36a   :  { %v4089_v25 = vsel %vm4088_vm7, %v6536_v11, %v4085_v22 }
 0x36b   :  { %v4094_v27 = vsel %vm4091_vm8, %v4093_v23, %v4089_v25  ;;  %vm4001_vm12 = vcmp.eq.f32.partialorder %v4000_v54, 8.507059e+37  ;;  %v4003_v44 = vor.u32 1.1754944e-38, %v4002_v38  ;;  %v2587_v54 = vperm.slane %v9536_v6, 6 }
 0x36c   :  { %4165 = vst [vmem:[%s9605_s10 + $0x48] sm:$0xff] %v4094_v27 }
 0x36e   :  { %v6540_v8 = vpop.eup %6539 }
 0x36f   :  { %v6542_v28 = vpop.eup %6541  ;;  %v3942_v29 = vadd.f32 1.0, %v6540_v8  ;;  %v3733_v33 = vpop.f32.mrf.mxu2 }
 0x370   :  { %v3992_v30 = vmul.f32 %v6542_v28, %v3935_v55  ;;  %vm3997_vm9 = vweird.f32 %v6542_v28  ;;  %v3734_v42 = vadd.f32 %v3733_v33, %v2585_v26  ;;  %v3775_v0 = vpop.f32.mrf.mxu1 }
 0x371   :  { %6543 = vrcp.f32 %v3942_v29  ;;  %vm3998_vm11 = vmor %vm3996_vm10, %vm3997_vm9  ;;  %v4107_v61 = vand.u32 2147483648, %v3942_v29  ;;  %v4105_v63 = vand.u32 2147483647, %v3942_v29  ;;  %vm4101_vm14 = vweird.f32 %v3942_v29 }
 0x372   :  { %v3993_v34 = vsub.f32 1.0, %v3992_v30 }
 0x373   :  { %v3745_v32 = vpop.f32.mrf.mxu3  ;;  %v4108_v37 = vor.u32 1.1754944e-38, %v4107_v61  ;;  %vm4106_vm0 = vcmp.eq.f32.partialorder %v4105_v63, 8.507059e+37 }
 0x374   :  { %v3746_v36 = vadd.f32 %v3745_v32, %v3732_v31  ;;  %v3994_v60 = vmul.f32 %v6542_v28, %v3993_v34 }
 0x376   :  { %v3995_v40 = vadd.f32 %v6542_v28, %v3994_v60 }
 0x377   :  { %v3759_v56 = vpop.f32.mrf.mxu0  ;;  %v6544_v43 = vpop.eup %6543 }
 0x378   :  { %v3760_v39 = vadd.f32 %v3759_v56, %v3746_v36  ;;  %v3999_v45 = vsel %vm3998_vm11, %v6542_v28, %v3995_v40  ;;  %v4097_v46 = vmul.f32 %v6544_v43, %v3942_v29  ;;  %vm4102_vm13 = vweird.f32 %v6544_v43 }
 0x379   :  { %v4004_v48 = vsel %vm4001_vm12, %v4003_v44, %v3999_v45  ;;  %vm4103_vm15 = vmor %vm4101_vm14, %vm4102_vm13 }
 0x37a   :  { %v3774_v41 = vadd.f32 %v3773_v35, %v3760_v39  ;;  %4159 = vst [vmem:[%s9605_s10 + $0x18] sm:$0xff] %v4004_v48  ;;  %v4098_v57 = vsub.f32 1.0, %v4097_v46 }
 0x37b   :  { %v3747_v53 = vpop.f32.mrf.mxu3  ;;  %v3787_v10 = vpop.f32.mrf.mxu1 }
 0x37c   :  { %v6039_v47 = vmul.f32 -1.442695, %v3774_v41  ;;  %v3748_v58 = vadd.f32 %v3747_v53, %v3734_v42  ;;  %v4099_v62 = vmul.f32 %v6544_v43, %v4098_v57  ;;  %v3788_v16 = vadd.f32 %v3787_v10, %v2586_v13 }
 0x37e   :  { %6545 = vpow2.f32 %v6039_v47  ;;  %v4100_v2 = vadd.f32 %v6544_v43, %v4099_v62 }
 0x37f   :  { %v3761_v59 = vpop.f32.mrf.mxu0 }
 0x380   :  { %v3762_v1 = vadd.f32 %v3761_v59, %v3748_v58  ;;  %v4104_v4 = vsel %vm4103_vm15, %v6544_v43, %v4100_v2 }
 0x381   :  { %v4109_v7 = vsel %vm4106_vm0, %v4108_v37, %v4104_v4 }
 0x382   :  { %v3776_v3 = vadd.f32 %v3775_v0, %v3762_v1  ;;  %4166 = vst [vmem:[%s9605_s10 + $0x50] sm:$0xff] %v4109_v7 }
 0x383   :  { %v3789_v24 = vpop.f32.mrf.mxu1 }
 0x384   :  { %v6546_v19 = vpop.eup %6545  ;;  %v6046_v5 = vmul.f32 -1.442695, %v3776_v3  ;;  %v3790_v31 = vadd.f32 %v3789_v24, %v2586_v13 }
 0x385   :  { %v3936_v9 = vadd.f32 1.0, %v6546_v19 }
 0x386   :  { %6547 = vpow2.f32 %v6046_v5 }
 0x387   :  { %v3829_v12 = vpop.f32.mrf.mxu0  ;;  %6549 = vrcp.f32 %v3936_v9  ;;  %v3801_v14 = vpop.f32.mrf.mxu2  ;;  %v4017_v51 = vand.u32 2147483648, %v3936_v9  ;;  %v4015_v20 = vand.u32 2147483647, %v3936_v9  ;;  %vm4011_vm2 = vweird.f32 %v3936_v9 }
 0x388   :  { %v3802_v18 = vadd.f32 %v3801_v14, %v3788_v16 }
 0x389   :  { %v4018_v26 = vor.u32 1.1754944e-38, %v4017_v51  ;;  %vm4016_vm4 = vcmp.eq.f32.partialorder %v4015_v20, 8.507059e+37 }
 0x38c   :  { %v6548_v11 = vpop.eup %6547 }
 0x38d   :  { %v6550_v50 = vpop.eup %6549  ;;  %v3943_v52 = vadd.f32 1.0, %v6548_v11 }
 0x38e   :  { %v4007_v15 = vmul.f32 %v6550_v50, %v3936_v9  ;;  %vm4012_vm1 = vweird.f32 %v6550_v50 }
 0x38f   :  { %v3831_v49 = vpop.f32.mrf.mxu0  ;;  %6551 = vrcp.f32 %v3943_v52  ;;  %vm4013_vm3 = vmor %vm4011_vm2, %vm4012_vm1  ;;  %v3803_v29 = vpop.f32.mrf.mxu2  ;;  %v4122_v36 = vand.u32 2147483648, %v3943_v52  ;;  %v4120_v60 = vand.u32 2147483647, %v3943_v52  ;;  %vm4116_vm6 = vweird.f32 %v3943_v52 }
 0x390   :  { %v4008_v17 = vsub.f32 1.0, %v4007_v15  ;;  %v3804_v56 = vadd.f32 %v3803_v29, %v3790_v31 }
 0x391   :  { %v4123_v41 = vor.u32 1.1754944e-38, %v4122_v36  ;;  %vm4121_vm8 = vcmp.eq.f32.partialorder %v4120_v60, 8.507059e+37 }
 0x392   :  { %v4009_v55 = vmul.f32 %v6550_v50, %v4008_v17 }
 0x393   :  { %v3815_v21 = vpop.f32.mrf.mxu3 }
 0x394   :  { %v3816_v22 = vadd.f32 %v3815_v21, %v3802_v18  ;;  %v4010_v23 = vadd.f32 %v6550_v50, %v4009_v55 }
 0x395   :  { %v6552_v25 = vpop.eup %6551 }
 0x396   :  { %v3830_v27 = vadd.f32 %v3829_v12, %v3816_v22  ;;  %v4014_v8 = vsel %vm4013_vm3, %v6550_v50, %v4010_v23  ;;  %v4112_v28 = vmul.f32 %v6552_v25, %v3943_v52  ;;  %vm4117_vm5 = vweird.f32 %v6552_v25 }
 0x397   :  { %v4019_v30 = vsel %vm4016_vm4, %v4018_v26, %v4014_v8  ;;  %vm4118_vm7 = vmor %vm4116_vm6, %vm4117_vm5 }
 0x398   :  { %v6040_v32 = vmul.f32 -1.442695, %v3830_v27  ;;  %4160 = vst [vmem:[%s9605_s10 + $0x20] sm:$0xff] %v4019_v30  ;;  %v4113_v35 = vsub.f32 1.0, %v4112_v28 }
 0x39a   :  { %6553 = vpow2.f32 %v6040_v32  ;;  %v4114_v38 = vmul.f32 %v6552_v25, %v4113_v35 }
 0x39b   :  { %v3843_v34 = vpop.f32.mrf.mxu0  ;;  %v3817_v39 = vpop.f32.mrf.mxu3 }
 0x39c   :  { %v3818_v33 = vadd.f32 %v3817_v39, %v3804_v56  ;;  %v4115_v40 = vadd.f32 %v6552_v25, %v4114_v38  ;;  %v3844_v43 = vadd.f32 %v3843_v34, %v2587_v54  ;;  %v3857_v46 = vpop.f32.mrf.mxu1 }
 0x39e   :  { %v3832_v44 = vadd.f32 %v3831_v49, %v3818_v33  ;;  %v4119_v45 = vsel %vm4118_vm7, %v6552_v25, %v4115_v40  ;;  %v3858_v53 = vadd.f32 %v3857_v46, %v3844_v43 }
 0x39f   :  { %v4124_v47 = vsel %vm4121_vm8, %v4123_v41, %v4119_v45 }
 0x3a0   :  { %v6554_v42 = vpop.eup %6553  ;;  %v6047_v48 = vmul.f32 -1.442695, %v3832_v44  ;;  %4167 = vst [vmem:[%s9605_s10 + $0x58] sm:$0xff] %v4124_v47 }
 0x3a1   :  { %v3937_v6 = vadd.f32 1.0, %v6554_v42 }
 0x3a2   :  { %6555 = vpow2.f32 %v6047_v48 }
 0x3a3   :  { %v3845_v57 = vpop.f32.mrf.mxu0  ;;  %6557 = vrcp.f32 %v3937_v6  ;;  %v3885_v59 = vpop.f32.mrf.mxu3  ;;  %v4032_v12 = vand.u32 2147483648, %v3937_v6  ;;  %v4030_v11 = vand.u32 2147483647, %v3937_v6  ;;  %vm4026_vm10 = vweird.f32 %v3937_v6 }
 0x3a4   :  { %v3846_v62 = vadd.f32 %v3845_v57, %v2587_v54  ;;  %v3859_v37 = vpop.f32.mrf.mxu1 }
 0x3a5   :  { %v4033_v16 = vor.u32 1.1754944e-38, %v4032_v12  ;;  %vm4031_vm12 = vcmp.eq.f32.partialorder %v4030_v11, 8.507059e+37 }
 0x3a6   :  { %v3860_v4 = vadd.f32 %v3859_v37, %v3846_v62 }
 0x3a7   :  { %v3871_v58 = vpop.f32.mrf.mxu2 }
 0x3a8   :  { %v3872_v61 = vadd.f32 %v3871_v58, %v3858_v53  ;;  %v6556_v0 = vpop.eup %6555 }
 0x3a9   :  { %v6558_v2 = vpop.eup %6557  ;;  %v3944_v3 = vadd.f32 1.0, %v6556_v0 }
 0x3aa   :  { %v3886_v63 = vadd.f32 %v3885_v59, %v3872_v61  ;;  %v4022_v19 = vmul.f32 %v6558_v2, %v3937_v6  ;;  %vm4027_vm9 = vweird.f32 %v6558_v2 }
 0x3ab   :  { %v3887_v10 = vpop.f32.mrf.mxu3  ;;  %vm4028_vm11 = vmor %vm4026_vm10, %vm4027_vm9  ;;  %v4137_v21 = vand.u32 2147483648, %v3944_v3  ;;  %v4135_v23 = vand.u32 2147483647, %v3944_v3  ;;  %vm4131_vm14 = vweird.f32 %v3944_v3 }
 0x3ac   :  { %v6041_v1 = vmul.f32 -1.442695, %v3886_v63  ;;  %v4023_v7 = vsub.f32 1.0, %v4022_v19 }
 0x3ad   :  { %v4138_v27 = vor.u32 1.1754944e-38, %v4137_v21  ;;  %vm4136_vm0 = vcmp.eq.f32.partialorder %v4135_v23, 8.507059e+37 }
 0x3ae   :  { %6559 = vpow2.f32 %v6041_v1  ;;  %v4024_v13 = vmul.f32 %v6558_v2, %v4023_v7 }
 0x3af   :  { %6561 = vrcp.f32 %v3944_v3  ;;  %v3873_v5 = vpop.f32.mrf.mxu2 }
 0x3b0   :  { %v3874_v9 = vadd.f32 %v3873_v5, %v3860_v4  ;;  %v4025_v52 = vadd.f32 %v6558_v2, %v4024_v13 }
 0x3b2   :  { %v3888_v14 = vadd.f32 %v3887_v10, %v3874_v9  ;;  %v4029_v51 = vsel %vm4028_vm11, %v6558_v2, %v4025_v52 }
 0x3b3   :  { %v4034_v55 = vsel %vm4031_vm12, %v4033_v16, %v4029_v51 }
 0x3b4   :  { %v6560_v50 = vpop.eup %6559  ;;  %v6048_v15 = vmul.f32 -1.442695, %v3888_v14  ;;  %4161 = vst [vmem:[%s9605_s10 + $0x28] sm:$0xff] %v4034_v55 }
 0x3b5   :  { %v6562_v49 = vpop.eup %6561  ;;  %v3938_v17 = vadd.f32 1.0, %v6560_v50 }
 0x3b6   :  { %v4127_v18 = vmul.f32 %v6562_v49, %v3944_v3  ;;  %6563 = vpow2.f32 %v6048_v15  ;;  %vm4132_vm13 = vweird.f32 %v6562_v49 }
 0x3b7   :  { %6565 = vrcp.f32 %v3938_v17  ;;  %vm4133_vm15 = vmor %vm4131_vm14, %vm4132_vm13  ;;  %v4047_v32 = vand.u32 2147483648, %v3938_v17  ;;  %v4045_v35 = vand.u32 2147483647, %v3938_v17  ;;  %vm4041_vm2 = vweird.f32 %v3938_v17 }
 0x3b8   :  { %v4128_v20 = vsub.f32 1.0, %v4127_v18 }
 0x3b9   :  { %v4048_v54 = vor.u32 1.1754944e-38, %v4047_v32  ;;  %vm4046_vm4 = vcmp.eq.f32.partialorder %v4045_v35, 8.507059e+37 }
 0x3ba   :  { %v4129_v22 = vmul.f32 %v6562_v49, %v4128_v20 }
 0x3bc   :  { %v6564_v24 = vpop.eup %6563  ;;  %v4130_v25 = vadd.f32 %v6562_v49, %v4129_v22 }
 0x3bd   :  { %v6566_v26 = vpop.eup %6565  ;;  %v3945_v8 = vadd.f32 1.0, %v6564_v24 }
 0x3be   :  { %v4134_v28 = vsel %vm4133_vm15, %v6562_v49, %v4130_v25  ;;  %v4037_v29 = vmul.f32 %v6566_v26, %v3938_v17  ;;  %vm4042_vm1 = vweird.f32 %v6566_v26 }
 0x3bf   :  { %v4139_v30 = vsel %vm4136_vm0, %v4138_v27, %v4134_v28  ;;  %6567 = vrcp.f32 %v3945_v8  ;;  %vm4043_vm3 = vmor %vm4041_vm2, %vm4042_vm1  ;;  %v4152_v40 = vand.u32 2147483648, %v3945_v8  ;;  %v4150_v43 = vand.u32 2147483647, %v3945_v8 }
 0x3c0   :  { %4168 = vst [vmem:[%s9605_s10 + $0x60] sm:$0xff] %v4139_v30  ;;  %v4038_v31 = vsub.f32 1.0, %v4037_v29  ;;  %vm4146_vm6 = vweird.f32 %v3945_v8 }
 0x3c1   :  { %v4153_v45 = vor.u32 1.1754944e-38, %v4152_v40  ;;  %vm4151_vm8 = vcmp.eq.f32.partialorder %v4150_v43, 8.507059e+37 }
 0x3c2   :  { %v4039_v34 = vmul.f32 %v6566_v26, %v4038_v31 }
 0x3c4   :  { %v4040_v36 = vadd.f32 %v6566_v26, %v4039_v34 }
 0x3c5   :  { %v6568_v56 = vpop.eup %6567 }
 0x3c6   :  { %v4044_v38 = vsel %vm4043_vm3, %v6566_v26, %v4040_v36  ;;  %v4142_v60 = vmul.f32 %v6568_v56, %v3945_v8  ;;  %vm4147_vm5 = vweird.f32 %v6568_v56 }
 0x3c7   :  { %v4049_v39 = vsel %vm4046_vm4, %v4048_v54, %v4044_v38  ;;  %vm4148_vm7 = vmor %vm4146_vm6, %vm4147_vm5 }
 0x3c8   :  { %4162 = vst [vmem:[%s9605_s10 + $0x30] sm:$0xff] %v4049_v39  ;;  %v4143_v33 = vsub.f32 1.0, %v4142_v60 }
 0x3ca   :  { %v4144_v41 = vmul.f32 %v6568_v56, %v4143_v33 }
 0x3cc   :  { %v4145_v44 = vadd.f32 %v6568_v56, %v4144_v41 }
 0x3ce   :  { %v4149_v46 = vsel %vm4148_vm7, %v6568_v56, %v4145_v44 }
 0x3cf   :  { %v4154_v42 = vsel %vm4151_vm8, %v4153_v45, %v4149_v46 }
 0x3d0   :  { %4169 = vst [vmem:[%s9605_s10 + $0x68] sm:$0xff] %v4154_v42 }

</bundles_post_ra>
